<compile_context>
chip_gen: v5e
topology: v5e:2x2
jax: 0.10.0
libtpu: 0.0.40
codegen_flags: <defaults>
</compile_context>

<pallas_src>
import math

import jax
import jax.numpy as jnp
import numpy as np
from jax.experimental import pallas as pl
from jax.experimental.pallas import tpu as pltpu


# Rows per grid step.  512 amortizes per-step overhead and fills the v6e/v7x
# MXU; v5e is fine with anything >=128 (tiles this size still fit easily).
TILE_M_MAX = 512


def _round_up(x, m):
    return ((x + m - 1) // m) * m


def _choose_tiling(n_rows, tile_m_max=TILE_M_MAX):
    """Pick (tile_m, n_pad, n_steps).

    Preferences: >=2 grid steps (so the 'parallel' axis feeds both v7x
    TensorCores), 128-row-aligned tiles when N is large (lane-dense, unmasked
    stores), and minimal padded (wasted MXU) rows for awkward N.
    """
    n_rows = max(int(n_rows), 1)
    if n_rows <= 32:                       # too tiny to be worth splitting
        tile = _round_up(n_rows, 16)
        return tile, tile, 1
    n16 = _round_up(n_rows, 16)
    n_steps = max(2, -(-n16 // tile_m_max))
    align = 128 if n16 >= 256 else 16
    tile_m = _round_up(-(-n16 // n_steps), align)
    # If 128-alignment wastes too many rows (awkward N), fall back to 16-row grain.
    if align == 128 and (tile_m * n_steps - n_rows) > max(128, n_rows // 8):
        tile_m = _round_up(-(-n16 // n_steps), 16)
    return tile_m, tile_m * n_steps, n_steps


# ----------------------------------------------------------------------------
# Pallas kernel: fused bottom (block-diagonal, bias folded) matmul + 2 big MLP
# matmuls on the MXU, width-1 head on the VPU/XLU, softplus, lane-dense store.
# ----------------------------------------------------------------------------
def weight_sampler_kernel(
    x_ref,                      # (TILE_M, K_pad) f32 packed [t | p | mean | var | 1 | 0]
    wbd_ref,                    # (K_pad, 4*TH)   f32 block-diag bottom weights + bias row
    wm1_ref, bm1_ref,           # (4*TH, 1024) bf16, (1, 1024) f32
    wm2_ref, bm2_ref,           # (1024, 1024) bf16, (1, 1024) f32
    wm3_ref, bm3_ref,           # (1, 1024) f32, (1, 1) f32
    w_ref,                      # out: (8, TILE_M) f32 (row replicated over sublanes)
):
    # bottom1..4 + bias + ReLU + concat as one block-diagonal matmul (f32 operands:
    # raw features keep full precision; this matmul is ~1.6% of total FLOPs).
    h = jnp.dot(x_ref[...], wbd_ref[...], preferred_element_type=jnp.float32)
    h = jnp.maximum(h, 0.0).astype(jnp.bfloat16)                    # (TM, 4*TH)

    # main MLP: Linear(4*TH,1024)+ReLU -> Linear(1024,1024)+ReLU (bf16 MXU, f32 acc)
    h = jnp.dot(h, wm1_ref[...], preferred_element_type=jnp.float32) + bm1_ref[...]
    h = jnp.maximum(h, 0.0).astype(jnp.bfloat16)                    # (TM, 1024)
    h = jnp.dot(h, wm2_ref[...], preferred_element_type=jnp.float32) + bm2_ref[...]
    h = jnp.maximum(h, 0.0)                                         # (TM, 1024) f32

    # Final Linear(1024, 1): width-1 output -> keep it off the MXU.
    # VPU multiply + XLU lane reduction.
    z = jnp.sum(h * wm3_ref[...], axis=-1, keepdims=True) + bm3_ref[...]   # (TM, 1)

    # Softplus (torch default beta=1, threshold=20), log1p for accuracy.
    zc = jnp.minimum(z, 20.0)
    sp = jnp.where(z > 20.0, z, jnp.log1p(jnp.exp(zc)))                    # (TM, 1)

    # Lane-dense store: (TM,1) -> (1,TM) via cheap XLU transpose, replicate
    # across the 8 sublanes so the output block is a full, unmasked store.
    row = jnp.transpose(sp, (1, 0))                                        # (1, TM)
    w_ref[...] = jnp.broadcast_to(row, w_ref.shape)                        # (8, TM)


# ----------------------------------------------------------------------------
# JAX glue: pack inputs, build block-diagonal bottom weight (+ folded biases),
# tile over rows, run the per-(batch,frame) softmax / log outside the kernel.
# ----------------------------------------------------------------------------
@jax.jit
def weight_sampler_forward(params, proposal_mean, proposal_variance, particles, t_seq):
    B, F, P, TH = particles.shape
    N = B * F * P

    (w1, b1), (w2, b2), (w3, b3), (w4, b4), (wm1, bm1), (wm2, bm2), (wm3, bm3) = params

    tile_m, n_pad, n_steps = _choose_tiling(N)

    # Packed bottom input [t | particles | mean | var | 1 | 0-pad] -> (n_pad, K_pad) f32.
    # The trailing 1.0 lane carries the folded bottom biases (row `bias_col` of w_bd).
    K_in = 1 + 3 * TH
    bias_col = K_in
    K_pad = _round_up(K_in + 1, 128)

    t_flat = t_seq.reshape(N, 1).astype(jnp.float32)
    p_flat = particles.reshape(N, TH).astype(jnp.float32)
    m_flat = jnp.broadcast_to(proposal_mean[:, :, None, :], (B, F, P, TH)) \
        .reshape(N, TH).astype(jnp.float32)
    v_flat = jnp.broadcast_to(proposal_variance[:, :, None, :], (B, F, P, TH)) \
        .reshape(N, TH).astype(jnp.float32)
    ones = jnp.ones((N, 1), jnp.float32)

    x_cat = jnp.concatenate([t_flat, p_flat, m_flat, v_flat, ones], axis=-1)
    x_cat = jnp.pad(x_cat, ((0, n_pad - N), (0, K_pad - (K_in + 1))))      # f32

    # Block-diagonal bottom weight (K_pad, 4*TH); biases folded into row `bias_col`.
    H0 = 4 * TH
    w_bd = jnp.zeros((K_pad, H0), jnp.float32)
    w_bd = w_bd.at[0:1, 0:TH].set(w1)
    w_bd = w_bd.at[1:1 + TH, TH:2 * TH].set(w2)
    w_bd = w_bd.at[1 + TH:1 + 2 * TH, 2 * TH:3 * TH].set(w3)
    w_bd = w_bd.at[1 + 2 * TH:1 + 3 * TH, 3 * TH:4 * TH].set(w4)
    b_cat = jnp.concatenate([b1, b2, b3, b4], axis=-1).reshape(-1)          # (4*TH,)
    w_bd = w_bd.at[bias_col, :].set(b_cat)

    wm1_b = wm1.astype(jnp.bfloat16)
    wm2_b = wm2.astype(jnp.bfloat16)
    wm3_row = wm3.reshape(1, -1).astype(jnp.float32)                        # (1, 1024)

    param_list = [w_bd, wm1_b, bm1, wm2_b, bm2, wm3_row, bm3]

    # Constant-index full-array blocks: weights stay VMEM-resident across steps.
    # Buffered(1) avoids the pointless second pipeline buffer for grid-invariant
    # params (falls back to the default spec if this jax lacks pipeline_mode).
    def const_spec(a):
        idx = lambda i: (0,) * a.ndim
        try:
            return pl.BlockSpec(a.shape, idx, pipeline_mode=pl.Buffered(1))
        except Exception:
            return pl.BlockSpec(a.shape, idx)

    grid = (n_steps,)

    w_raw = pl.pallas_call(
        weight_sampler_kernel,
        out_shape=jax.ShapeDtypeStruct((8 * n_steps, tile_m), jnp.float32),
        grid_spec=pltpu.PrefetchScalarGridSpec(
            num_scalar_prefetch=0,
            grid=grid,
            in_specs=[pl.BlockSpec((tile_m, K_pad), lambda i: (i, 0))]
                     + [const_spec(a) for a in param_list],
            out_specs=pl.BlockSpec((8, tile_m), lambda i: (i, 0)),
        ),
        compiler_params=pltpu.CompilerParams(
            dimension_semantics=("parallel",),     # lets v7x split steps over both TCs
            vmem_limit_bytes=48 * 1024 * 1024,     # headroom even on v7x's 64 MiB VMEM
        ),
    )(x_cat, *param_list)

    # Sublane 0 of each step block is the real data; drop padded tail rows.
    w = w_raw.reshape(n_steps, 8, tile_m)[:, 0, :].reshape(-1)[:N].reshape(B, F, P)

    # Per-(batch,frame) softmax over particles + log-weights: O(N) scalars,
    # done here so the kernel tile is not pinned to P rows.
    log_weights = jnp.log(w + 1e-10)
    weights = jax.nn.softmax(w, axis=-1)
    return weights, log_weights


# ----------------------------------------------------------------------------
# Deterministic parameter init (mimics nn.Linear's uniform(-1/sqrt(in), +)).
# Weights stored as (in_features, out_features).
# ----------------------------------------------------------------------------
def init_linear(key, fan_in, fan_out):
    kw, kb = jax.random.split(key)
    bound = 1.0 / math.sqrt(fan_in)
    W = jax.random.uniform(kw, (fan_in, fan_out), jnp.float32, -bound, bound)
    b = jax.random.uniform(kb, (1, fan_out), jnp.float32, -bound, bound)
    return W, b


def init_params(key, theta_dim):
    keys = jax.random.split(key, 7)
    return (
        init_linear(keys[0], 1, theta_dim),              # bottom1
        init_linear(keys[1], theta_dim, theta_dim),      # bottom2
        init_linear(keys[2], theta_dim, theta_dim),      # bottom3
        init_linear(keys[3], theta_dim, theta_dim),      # bottom4
        init_linear(keys[4], theta_dim * 4, 1024),       # main[0]
        init_linear(keys[5], 1024, 1024),                # main[2]
        init_linear(keys[6], 1024, 1),                   # main[4]
    )


# ----------------------------------------------------------------------------
# Pure-JAX f32 reference (same math, no Pallas) for a self-check.
# ----------------------------------------------------------------------------
def weight_sampler_reference(params, proposal_mean, proposal_variance, particles, t_seq):
    (w1, b1), (w2, b2), (w3, b3), (w4, b4), (wm1, bm1), (wm2, bm2), (wm3, bm3) = params
    B, F, P, TH = particles.shape
    m = jnp.broadcast_to(proposal_mean[:, :, None, :], (B, F, P, TH))
    v = jnp.broadcast_to(proposal_variance[:, :, None, :], (B, F, P, TH))
    h1 = jax.nn.relu(t_seq @ w1 + b1)
    h2 = jax.nn.relu(particles @ w2 + b2)
    h3 = jax.nn.relu(m @ w3 + b3)
    h4 = jax.nn.relu(v @ w4 + b4)
    x = jnp.concatenate([h1, h2, h3, h4], axis=-1).reshape(B * F * P, -1)
    h = jax.nn.relu(x @ wm1 + bm1)
    h = jax.nn.relu(h @ wm2 + bm2)
    z = h @ wm3 + bm3
    zc = jnp.minimum(z, 20.0)
    w = jnp.where(z > 20.0, z, jnp.log1p(jnp.exp(zc))).reshape(B, F, P)
    log_w = jnp.log(w + 1e-10)
    w = jax.nn.softmax(w, axis=-1)
    return w, log_w


if __name__ == "__main__":
    # Small shapes consistent with the module's forward.
    batch, frame, n_particle, theta_dim = 2, 4, 8, 32

    key = jax.random.PRNGKey(0)
    k_params, k_m, k_v, k_p, k_t = jax.random.split(key, 5)

    params = init_params(k_params, theta_dim)

    proposal_mean = jax.random.normal(k_m, (batch, frame, theta_dim), jnp.float32)
    proposal_variance = jax.random.uniform(
        k_v, (batch, frame, theta_dim), jnp.float32, 0.1, 1.0)
    particles = jax.random.normal(k_p, (batch, frame, n_particle, theta_dim), jnp.float32)
    t_seq = jax.random.uniform(k_t, (batch, frame, n_particle, 1), jnp.float32, 0.0, 1.0)

    weights, log_weights = weight_sampler_forward(
        params, proposal_mean, proposal_variance, particles, t_seq)
    jax.block_until_ready((weights, log_weights))

    # Self-check against a pure-JAX f32 reference (wm1/wm2 matmul operands are
    # bf16 with f32 accumulation in the kernel -> relaxed tolerance).
    w_ref, lw_ref = weight_sampler_reference(
        params, proposal_mean, proposal_variance, particles, t_seq)
    np.testing.assert_allclose(np.asarray(weights), np.asarray(w_ref), rtol=2e-2, atol=2e-2)
    np.testing.assert_allclose(np.asarray(log_weights), np.asarray(lw_ref), rtol=2e-2, atol=2e-2)

    print("KERNEL_OK")
</pallas_src>

<mosaic_0001>
module attributes {stable_mosaic.version = 11 : i64} {
  func.func @weight_sampler_kernel(%arg0: i32, %arg1: memref<32x128xf32, #tpu.memory_space<vmem>>, %arg2: memref<128x128xf32, #tpu.memory_space<vmem>>, %arg3: memref<128x1024xbf16, #tpu.memory_space<vmem>>, %arg4: memref<1x1024xf32, #tpu.memory_space<vmem>>, %arg5: memref<1024x1024xbf16, #tpu.memory_space<vmem>>, %arg6: memref<1x1024xf32, #tpu.memory_space<vmem>>, %arg7: memref<1x1024xf32, #tpu.memory_space<vmem>>, %arg8: memref<1x1xf32, #tpu.memory_space<vmem>>, %arg9: memref<8x32xf32, #tpu.memory_space<vmem>>) attributes {dimension_semantics = [#tpu.dimension_semantics<parallel>], iteration_bounds = array<i64: 2>, scalar_prefetch = 0 : i64, scratch_operands = 0 : i64, tpu.core_type = #tpu.core_type<tc>, window_params = [{transform_indices = @transform_0, window_bounds = array<i64: 32, 128>}, {pipeline_mode = #tpu.pipeline_mode<synchronous>, transform_indices = @transform_1, window_bounds = array<i64: 128, 128>}, {pipeline_mode = #tpu.pipeline_mode<synchronous>, transform_indices = @transform_2, window_bounds = array<i64: 128, 1024>}, {pipeline_mode = #tpu.pipeline_mode<synchronous>, transform_indices = @transform_3, window_bounds = array<i64: 1, 1024>}, {pipeline_mode = #tpu.pipeline_mode<synchronous>, transform_indices = @transform_4, window_bounds = array<i64: 1024, 1024>}, {pipeline_mode = #tpu.pipeline_mode<synchronous>, transform_indices = @transform_5, window_bounds = array<i64: 1, 1024>}, {pipeline_mode = #tpu.pipeline_mode<synchronous>, transform_indices = @transform_6, window_bounds = array<i64: 1, 1024>}, {pipeline_mode = #tpu.pipeline_mode<synchronous>, transform_indices = @transform_7, window_bounds = array<i64: 1, 1>}, {transform_indices = @transform_8, window_bounds = array<i64: 8, 32>}]} {
    %c0 = arith.constant 0 : index
    %c0_0 = arith.constant 0 : index
    %0 = vector.load %arg1[%c0, %c0_0] : memref<32x128xf32, #tpu.memory_space<vmem>>, vector<32x128xf32>
    %c0_1 = arith.constant 0 : index
    %c0_2 = arith.constant 0 : index
    %1 = vector.load %arg2[%c0_1, %c0_2] : memref<128x128xf32, #tpu.memory_space<vmem>>, vector<128x128xf32>
    %cst = arith.constant dense<0.000000e+00> : vector<32x128xf32>
    %2 = tpu.matmul %0, %1, %cst {dimension_numbers = #tpu.dot_dimension_numbers<[1], [0], [0], [1], [0, 0, 1, 1], [], []>} : vector<32x128xf32>, vector<128x128xf32>, vector<32x128xf32> -> vector<32x128xf32>
    %cst_3 = arith.constant 0.000000e+00 : f32
    %3 = vector.broadcast %cst_3 : f32 to vector<32x128xf32>
    %4 = arith.maximumf %2, %3 : vector<32x128xf32>
    %5 = arith.truncf %4 : vector<32x128xf32> to vector<32x128xbf16>
    %c0_4 = arith.constant 0 : index
    %c0_5 = arith.constant 0 : index
    %6 = vector.load %arg3[%c0_4, %c0_5] : memref<128x1024xbf16, #tpu.memory_space<vmem>>, vector<128x1024xbf16>
    %cst_6 = arith.constant dense<0.000000e+00> : vector<32x1024xf32>
    %7 = tpu.matmul %5, %6, %cst_6 {dimension_numbers = #tpu.dot_dimension_numbers<[1], [0], [0], [1], [0, 0, 1, 1], [], []>} : vector<32x128xbf16>, vector<128x1024xbf16>, vector<32x1024xf32> -> vector<32x1024xf32>
    %c0_7 = arith.constant 0 : index
    %c0_8 = arith.constant 0 : index
    %8 = vector.load %arg4[%c0_7, %c0_8] : memref<1x1024xf32, #tpu.memory_space<vmem>>, vector<1x1024xf32>
    %9 = vector.broadcast %8 : vector<1x1024xf32> to vector<32x1024xf32>
    %10 = arith.addf %7, %9 : vector<32x1024xf32>
    %cst_9 = arith.constant 0.000000e+00 : f32
    %11 = vector.broadcast %cst_9 : f32 to vector<32x1024xf32>
    %12 = arith.maximumf %10, %11 : vector<32x1024xf32>
    %13 = arith.truncf %12 : vector<32x1024xf32> to vector<32x1024xbf16>
    %c0_10 = arith.constant 0 : index
    %c0_11 = arith.constant 0 : index
    %14 = vector.load %arg5[%c0_10, %c0_11] : memref<1024x1024xbf16, #tpu.memory_space<vmem>>, vector<1024x1024xbf16>
    %cst_12 = arith.constant dense<0.000000e+00> : vector<32x1024xf32>
    %15 = tpu.matmul %13, %14, %cst_12 {dimension_numbers = #tpu.dot_dimension_numbers<[1], [0], [0], [1], [0, 0, 1, 1], [], []>} : vector<32x1024xbf16>, vector<1024x1024xbf16>, vector<32x1024xf32> -> vector<32x1024xf32>
    %c0_13 = arith.constant 0 : index
    %c0_14 = arith.constant 0 : index
    %16 = vector.load %arg6[%c0_13, %c0_14] : memref<1x1024xf32, #tpu.memory_space<vmem>>, vector<1x1024xf32>
    %17 = vector.broadcast %16 : vector<1x1024xf32> to vector<32x1024xf32>
    %18 = arith.addf %15, %17 : vector<32x1024xf32>
    %cst_15 = arith.constant 0.000000e+00 : f32
    %19 = vector.broadcast %cst_15 : f32 to vector<32x1024xf32>
    %20 = arith.maximumf %18, %19 : vector<32x1024xf32>
    %c0_16 = arith.constant 0 : index
    %c0_17 = arith.constant 0 : index
    %21 = vector.load %arg7[%c0_16, %c0_17] : memref<1x1024xf32, #tpu.memory_space<vmem>>, vector<1x1024xf32>
    %22 = vector.broadcast %21 : vector<1x1024xf32> to vector<32x1024xf32>
    %23 = arith.mulf %20, %22 : vector<32x1024xf32>
    %cst_18 = arith.constant dense<0.000000e+00> : vector<32xf32>
    %24 = vector.multi_reduction <add>, %23, %cst_18 [1] : vector<32x1024xf32> to vector<32xf32>
    %25 = vector.shape_cast %24 : vector<32xf32> to vector<32x1xf32>
    %c0_19 = arith.constant 0 : index
    %c0_20 = arith.constant 0 : index
    %26 = vector.load %arg8[%c0_19, %c0_20] : memref<1x1xf32, #tpu.memory_space<vmem>>, vector<1x1xf32>
    %27 = vector.broadcast %26 : vector<1x1xf32> to vector<32x1xf32>
    %28 = arith.addf %25, %27 : vector<32x1xf32>
    %cst_21 = arith.constant 2.000000e+01 : f32
    %29 = vector.broadcast %cst_21 : f32 to vector<32x1xf32>
    %30 = arith.minimumf %28, %29 : vector<32x1xf32>
    %cst_22 = arith.constant 2.000000e+01 : f32
    %31 = vector.broadcast %cst_22 : f32 to vector<32x1xf32>
    %32 = arith.cmpf ogt, %28, %31 : vector<32x1xf32>
    %33 = math.exp %30 : vector<32x1xf32>
    %34 = math.log1p %33 : vector<32x1xf32>
    %35 = arith.select %32, %28, %34 : vector<32x1xi1>, vector<32x1xf32>
    %36 = tpu.transpose %35, [1, 0] : vector<32x1xf32> -> vector<1x32xf32>
    %37 = vector.shape_cast %36 : vector<1x32xf32> to vector<1x32xf32>
    %38 = vector.broadcast %37 : vector<1x32xf32> to vector<8x32xf32>
    %c0_23 = arith.constant 0 : index
    %c0_24 = arith.constant 0 : index
    %39 = vector.load %arg9[%c0_23, %c0_24] : memref<8x32xf32, #tpu.memory_space<vmem>>, vector<8x32xf32>
    tpu.vector_store %arg9[%c0_23, %c0_24], %38 {strides = array<i32>} : memref<8x32xf32, #tpu.memory_space<vmem>>, vector<8x32xf32>,
    return
  }
  func.func @transform_0(%arg0: i32) -> (i32, i32) {
    %c0_i32 = arith.constant 0 : i32
    %c0_i32_0 = arith.constant 0 : i32
    return %arg0, %c0_i32 : i32, i32
  }
  func.func @transform_1(%arg0: i32) -> (i32, i32) {
    %c0_i32 = arith.constant 0 : i32
    %c0_i32_0 = arith.constant 0 : i32
    %c0_i32_1 = arith.constant 0 : i32
    return %c0_i32, %c0_i32_0 : i32, i32
  }
  func.func @transform_2(%arg0: i32) -> (i32, i32) {
    %c0_i32 = arith.constant 0 : i32
    %c0_i32_0 = arith.constant 0 : i32
    %c0_i32_1 = arith.constant 0 : i32
    return %c0_i32, %c0_i32_0 : i32, i32
  }
  func.func @transform_3(%arg0: i32) -> (i32, i32) {
    %c0_i32 = arith.constant 0 : i32
    %c0_i32_0 = arith.constant 0 : i32
    %c0_i32_1 = arith.constant 0 : i32
    return %c0_i32, %c0_i32_0 : i32, i32
  }
  func.func @transform_4(%arg0: i32) -> (i32, i32) {
    %c0_i32 = arith.constant 0 : i32
    %c0_i32_0 = arith.constant 0 : i32
    %c0_i32_1 = arith.constant 0 : i32
    return %c0_i32, %c0_i32_0 : i32, i32
  }
  func.func @transform_5(%arg0: i32) -> (i32, i32) {
    %c0_i32 = arith.constant 0 : i32
    %c0_i32_0 = arith.constant 0 : i32
    %c0_i32_1 = arith.constant 0 : i32
    return %c0_i32, %c0_i32_0 : i32, i32
  }
  func.func @transform_6(%arg0: i32) -> (i32, i32) {
    %c0_i32 = arith.constant 0 : i32
    %c0_i32_0 = arith.constant 0 : i32
    %c0_i32_1 = arith.constant 0 : i32
    return %c0_i32, %c0_i32_0 : i32, i32
  }
  func.func @transform_7(%arg0: i32) -> (i32, i32) {
    %c0_i32 = arith.constant 0 : i32
    %c0_i32_0 = arith.constant 0 : i32
    %c0_i32_1 = arith.constant 0 : i32
    return %c0_i32, %c0_i32_0 : i32, i32
  }
  func.func @transform_8(%arg0: i32) -> (i32, i32) {
    %c0_i32 = arith.constant 0 : i32
    %c0_i32_0 = arith.constant 0 : i32
    return %arg0, %c0_i32 : i32, i32
  }
}

</mosaic_0001>

<bundles_post_ra>
// kernel: squeeze.1
= control target key start
LH: loop header
LB: loop body
LE: loop exit
PB: predicated region body
PF: predicated region fallthrough
CT: control target
= control target key end

     0   :  { %s44_s8 = smov 104   ;;  %s45_s9 = smov 112   ;;  %vm7_vm0 = vcmask 64512   ;;  %s65_s0 = inlined_call_operand.vmem [shape: f32[2,1,32], index: 0, kind: input, shape index: {}]   ;;  %s66_s1 = inlined_call_operand.vmem [shape: f32[2,4,8], index: 1, kind: output, shape index: {}]  }
   0x1   :  { %v4_v0 = vld [vmem:[%s65_s0] sm:$0x3]  ;;  %s43_s0 = smov 120  }
   0x2   :  { %5 = vst [vmem:[#allocation1] sm:$0x3] %v4_v0 }
   0x9   :  { %v9_v1 = vld [vmem:[#allocation1] sm:$0x3]  }
   0xa   :  { %v21_v2 = vld [vmem:[#allocation1] sm:$0x3]   ;;  %10 = vrot.lane.b32.xlu0 %v9_v1, %s43_s0 }
   0xb   :  { %22 = vrot.lane.b32.xlu1 %v21_v2, %s44_s8  ;;  %v15_v3 = vld [vmem:[#allocation1] sm:$0x3]  }
   0xc   :  { %v6_v4 = vld [vmem:[#allocation1] sm:$0x3]  }
   0xd   :  { %8 = vst.msk [vmem:[#allocation0] ss:$8 sm:$0x3] %vm7_vm0, %v6_v4  }
  0x12   :  { %16 = vrot.lane.b32.xlu0 %v15_v3, %s45_s9 }
  0x7c   :  { %v11_v5 = vpop.permute.xlu0 %10  }
  0x7d   :  { %v23_v6 = vpop.permute.xlu1 %22   ;;  %14 = vst.msk [vmem:[#allocation0 + $0x1] ss:$8 sm:$0x3] %vm7_vm0, %v11_v5  }
  0x7e   :  { %26 = vst.msk [vmem:[#allocation0 + $0x3] ss:$8 sm:$0x3] %vm7_vm0, %v23_v6  }
  0x84   :  { %v17_v7 = vpop.permute.xlu0 %16  }
  0x85   :  { %20 = vst.msk [vmem:[#allocation0 + $0x2] ss:$8 sm:$0x3] %vm7_vm0, %v17_v7  }
  0x8c   :  { %v29_v8 = vld [vmem:[#allocation0] sm:$0xf]  ;;  %v34_v9 = vld [vmem:[#allocation0 + $0x8] sm:$0xf] }
  0x8d   :  { %32 = vst [vmem:[%s66_s1] sm:$0xf] %v29_v8 }
  0x8e   :  { %39 = vst [vmem:[%s66_s1 + $0x4] sm:$0xf] %v34_v9 }

// kernel: weight_sampler_forward.1
= control target key start
LH: loop header
LB: loop body
LE: loop exit
PB: predicated region body
PF: predicated region fallthrough
CT: control target
= control target key end

     0   :  { %s8526_s29 = smov 0   ;;  %s12769_s0 = inlined_call_operand.vmem [shape: f32[64,128], index: 0, kind: input, shape index: {}]   ;;  %s12770_s1 = inlined_call_operand.vmem [shape: f32[128,128], index: 1, kind: input, shape index: {}]   ;;  %s12771_s2 = inlined_call_operand.vmem [shape: bf16[128,1024], index: 2, kind: input, shape index: {}]   ;;  %s12772_s3 = inlined_call_operand.vmem [shape: f32[1,1024], index: 3, kind: input, shape index: {}]   ;;  %s12773_s4 = inlined_call_operand.vmem [shape: bf16[1024,1024], index: 4, kind: input, shape index: {}]   ;;  %s12774_s5 = inlined_call_operand.vmem [shape: f32[1,1024], index: 5, kind: input, shape index: {}]   ;;  %s12775_s6 = inlined_call_operand.vmem [shape: f32[1,1024], index: 6, kind: input, shape index: {}]   ;;  %s12776_s7 = inlined_call_operand.<no memory space> [shape: f32[1,1], index: 7, kind: input, shape index: {}]   ;;  %s12777_s8 = inlined_call_operand.vmem [shape: f32[16,32], index: 8, kind: output, shape index: {}]  }
   0x1   :  { %v13_v0 = vstv %s12776_s7 }
   0x2   :  { %14 = vst [vmem:[#allocation2] sm:$0x1] %v13_v0 }
   0x3 LB: > { %s8532_s30 = sadd.s32 4294967295, %s8476_s29   ;;  %p5545_p0 = scmp.ge.s32.totalorder %s8476_s29, 1  ;;  %s8476_s29 = sphi %s8526_s29, %s20_s29  }
   0x4   : > { %p265_p1 = scmp.lt.s32.totalorder %s8476_s29, 3 }
   0x6   : > { %p266_p2 = pnand %p5545_p0, %p265_p1 }
   0x7   : > { %s5546_s22 = sshll.u32 (!%p266_p2), %s8532_s30, 2  ;;  %p304_p4 = scmp.lt.s32.totalorder (!%p266_p2), %s8532_s30, 1 }
   0x8   : > { %269 = sbr.rel (%p266_p2) target bundleno = 1499 (0x5db), region = 52  ;;  %p299_p3 = scmp.lt.s32.totalorder (!%p266_p2), %s5546_s22, 7 }
   0xd   : > { %v327_v1 = vld [vmem:[%s12770_s1 + $0x78] sm:$0xff]  ;;  %v326_v2 = vld [vmem:[%s12770_s1 + $0x70] sm:$0xff]  ;;  %v325_v3 = vld [vmem:[%s12770_s1 + $0x68] sm:$0xff]  ;;  %s12779_s22 = smov (!%p299_p3, %s5546_s22), 7  ;;  %s12781_s30 = smov (!%p304_p4, %s8532_s30), 1  ;;  %vm5486_vm8 = vcmask 261120  }
   0xe   : > { %328 = vmatpush.msra.mxu0 %v327_v1  ;;  %v324_v4 = vld [vmem:[%s12770_s1 + $0x60] sm:$0xff]  ;;  %v323_v5 = vld [vmem:[%s12770_s1 + $0x58] sm:$0xff]  ;;  %v322_v6 = vld [vmem:[%s12770_s1 + $0x50] sm:$0xff]  ;;  %s5547_s12 = sshll.u32 %s12779_s22, 3  ;;  %s5548_s16 = sshll.u32 %s12781_s30, 3 }
   0xf   : > { %v321_v7 = vld [vmem:[%s12770_s1 + $0x48] sm:$0xff]  ;;  %v320_v8 = vld [vmem:[%s12770_s1 + $0x40] sm:$0xff]  ;;  %v319_v9 = vld [vmem:[%s12770_s1 + $0x38] sm:$0xff]  ;;  %s8585_s21 = scalar_lea.vmem %s12769_s0, %s5547_s12  ;;  %s307_s19 = scalar_lea.vmem %s12777_s8, %s5548_s16 }
  0x10   : > { %329 = vmatpush.msra.mxu0 %v326_v2  ;;  %v318_v10 = vld [vmem:[%s12770_s1 + $0x30] sm:$0xff]  ;;  %v317_v11 = vld [vmem:[%s12770_s1 + $0x28] sm:$0xff]  ;;  %v316_v12 = vld [vmem:[%s12770_s1 + $0x20] sm:$0xff] }
  0x11   : > { %v315_v13 = vld [vmem:[%s12770_s1 + $0x18] sm:$0xff]  ;;  %v314_v14 = vld [vmem:[%s12770_s1 + $0x10] sm:$0xff]  ;;  %v313_v15 = vld [vmem:[%s12770_s1 + $0x8] sm:$0xff] }
  0x12   : > { %330 = vmatpush.msra.mxu0 %v325_v3  ;;  %v5775_v16 = vld [vmem:[%s12771_s2 + $0x1c0] sm:$0xf]  ;;  %v7911_v18 = vld [vmem:[%s12771_s2 + $0x1c4] sm:$0xf]  ;;  %v5783_v21 = vld [vmem:[%s12771_s2 + $0x1c8] sm:$0xf] }
  0x13   : > { %v7915_v17 = vld [vmem:[%s12771_s2 + $0x1dc] sm:$0xf0]  ;;  %v5777_v20 = vld [vmem:[%s12771_s2 + $0x1e0] sm:$0xf0]  ;;  %v7916_v22 = vld [vmem:[%s12771_s2 + $0x1e4] sm:$0xf0] }
  0x14   : > { %331 = vmatpush.msra.mxu0 %v324_v4  ;;  %v5776_v19 = vor.u32 %v7915_v17, %v5775_v16  ;;  %v312_v23 = vld [vmem:[%s12770_s1] sm:$0xff]  ;;  %v5780_v24 = vor.u32 %v7911_v18, %v5777_v20  ;;  %v5784_v25 = vor.u32 %v7916_v22, %v5783_v21  ;;  %v7912_v26 = vld [vmem:[%s12771_s2 + $0x1cc] sm:$0xf]  ;;  %v5751_v35 = vld [vmem:[%s12771_s2 + $0x188] sm:$0xf] }
  0x15   : > { %v5785_v27 = vld [vmem:[%s12771_s2 + $0x1e8] sm:$0xf0]  ;;  %v5743_v28 = vld [vmem:[%s12771_s2 + $0x180] sm:$0xf]  ;;  %v7903_v31 = vld [vmem:[%s12771_s2 + $0x184] sm:$0xf] }
  0x16   : > { %332 = vmatpush.msra.mxu0 %v323_v5  ;;  %v308_v29 = vld [vmem:[%s8585_s21] sm:$0xff]  ;;  %765 = vmatpush.bf16.msra.mxu1 %v5776_v19  ;;  %v7908_v36 = vld [vmem:[%s12771_s2 + $0x1a4] sm:$0xf0]  ;;  %v7904_v37 = vld [vmem:[%s12771_s2 + $0x18c] sm:$0xf]  ;;  %v5788_v38 = vor.u32 %v7912_v26, %v5785_v27 }
  0x17   : > { %v7907_v30 = vld [vmem:[%s12771_s2 + $0x19c] sm:$0xf0]  ;;  %v5745_v32 = vld [vmem:[%s12771_s2 + $0x1a0] sm:$0xf0]  ;;  %784 = vmatpush.bf16.msra.mxu2 %v5780_v24  ;;  %803 = vmatpush.bf16.msra.mxu3 %v5784_v25  ;;  %v5752_v39 = vor.u32 %v7908_v36, %v5751_v35  ;;  %v5753_v40 = vld [vmem:[%s12771_s2 + $0x1a8] sm:$0xf0] }
  0x18   : > { %333 = vmatpush.msra.mxu0 %v322_v6  ;;  %v5744_v33 = vor.u32 %v7907_v30, %v5743_v28  ;;  %v5748_v34 = vor.u32 %v7903_v31, %v5745_v32  ;;  %v5711_v41 = vld [vmem:[%s12771_s2 + $0x140] sm:$0xf]  ;;  %v7895_v43 = vld [vmem:[%s12771_s2 + $0x144] sm:$0xf]  ;;  %v5719_v45 = vld [vmem:[%s12771_s2 + $0x148] sm:$0xf]  ;;  %v5756_v51 = vor.u32 %v7904_v37, %v5753_v40 }
  0x19   : > { %v7899_v42 = vld [vmem:[%s12771_s2 + $0x15c] sm:$0xf0]  ;;  %v5713_v44 = vld [vmem:[%s12771_s2 + $0x160] sm:$0xf0]  ;;  %v7900_v47 = vld [vmem:[%s12771_s2 + $0x164] sm:$0xf0] }
  0x1a   : > { %334 = vmatpush.msra.mxu0 %v321_v7  ;;  %766 = vmatpush.bf16.msra.mxu1 %v5744_v33  ;;  %v5712_v46 = vor.u32 %v7899_v42, %v5711_v41  ;;  %v5716_v48 = vor.u32 %v7895_v43, %v5713_v44  ;;  %v5679_v49 = vld [vmem:[%s12771_s2 + $0x100] sm:$0xf]  ;;  %v5720_v52 = vor.u32 %v7900_v47, %v5719_v45  ;;  %v7896_v53 = vld [vmem:[%s12771_s2 + $0x14c] sm:$0xf]  ;;  %v7887_v54 = vld [vmem:[%s12771_s2 + $0x104] sm:$0xf] }
  0x1b   : > { %785 = vmatpush.bf16.msra.mxu2 %v5748_v34  ;;  %v7891_v50 = vld [vmem:[%s12771_s2 + $0x11c] sm:$0xf0]  ;;  %804 = vmatpush.bf16.msra.mxu3 %v5752_v39  ;;  %v5681_v55 = vld [vmem:[%s12771_s2 + $0x120] sm:$0xf0]  ;;  %v5721_v56 = vld [vmem:[%s12771_s2 + $0x168] sm:$0xf0] }
  0x1c   : > { %335 = vmatpush.msra.mxu0 %v320_v8  ;;  %v5687_v57 = vld [vmem:[%s12771_s2 + $0x108] sm:$0xf]  ;;  %v5680_v59 = vor.u32 %v7891_v50, %v5679_v49  ;;  %v5684_v61 = vor.u32 %v7887_v54, %v5681_v55  ;;  %v5647_v62 = vld [vmem:[%s12771_s2 + $0xc0] sm:$0xf]  ;;  %v5724_v0 = vor.u32 %v7896_v53, %v5721_v56  ;;  %v7888_v2 = vld [vmem:[%s12771_s2 + $0x10c] sm:$0xf] }
  0x1d   : > { %v7892_v58 = vld [vmem:[%s12771_s2 + $0x124] sm:$0xf0]  ;;  %v7883_v63 = vld [vmem:[%s12771_s2 + $0xdc] sm:$0xf0]  ;;  %v7879_v3 = vld [vmem:[%s12771_s2 + $0xc4] sm:$0xf] }
  0x1e   : > { %336 = vmatpush.msra.mxu0 %v319_v9  ;;  %767 = vmatpush.bf16.msra.mxu1 %v5712_v46  ;;  %v309_v60 = vld [vmem:[%s8585_s21 + $0x8] sm:$0xff]  ;;  %v5688_v1 = vor.u32 %v7892_v58, %v5687_v57  ;;  %v5649_v4 = vld [vmem:[%s12771_s2 + $0xe0] sm:$0xf0]  ;;  %v5648_v8 = vor.u32 %v7883_v63, %v5647_v62  ;;  %v311_v16 = vld [vmem:[%s8585_s21 + $0x18] sm:$0xff] }
  0x1f   : > { %786 = vmatpush.bf16.msra.mxu2 %v5716_v48  ;;  %805 = vmatpush.bf16.msra.mxu3 %v5720_v52  ;;  %v5689_v5 = vld [vmem:[%s12771_s2 + $0x128] sm:$0xf0]  ;;  %v5655_v6 = vld [vmem:[%s12771_s2 + $0xc8] sm:$0xf]  ;;  %v5652_v9 = vor.u32 %v7879_v3, %v5649_v4  ;;  %v5615_v17 = vld [vmem:[%s12771_s2 + $0x80] sm:$0xf] }
  0x20   : > { %337 = vmatpush.msra.mxu0 %v318_v10  ;;  %v7884_v7 = vld [vmem:[%s12771_s2 + $0xe4] sm:$0xf0]  ;;  %v5692_v10 = vor.u32 %v7888_v2, %v5689_v5  ;;  %v7875_v18 = vld [vmem:[%s12771_s2 + $0x9c] sm:$0xf0]  ;;  %v7871_v19 = vld [vmem:[%s12771_s2 + $0x84] sm:$0xf] }
  0x21   : > { %v5616_v20 = vor.u32 %v7875_v18, %v5615_v17  ;;  %v5617_v21 = vld [vmem:[%s12771_s2 + $0xa0] sm:$0xf0]  ;;  %v5623_v22 = vld [vmem:[%s12771_s2 + $0x88] sm:$0xf]  ;;  %v7872_v26 = vld [vmem:[%s12771_s2 + $0x8c] sm:$0xf] }
  0x22   : > { %338 = vmatpush.msra.mxu0 %v317_v11  ;;  %768 = vmatpush.bf16.msra.mxu1 %v5680_v59  ;;  %v5656_v11 = vor.u32 %v7884_v7, %v5655_v6  ;;  %v5620_v24 = vor.u32 %v7871_v19, %v5617_v21  ;;  %v5625_v27 = vld [vmem:[%s12771_s2 + $0xa8] sm:$0xf0]  ;;  %v5583_v28 = vld [vmem:[%s12771_s2 + $0x40] sm:$0xf]  ;;  %v7863_v31 = vld [vmem:[%s12771_s2 + $0x44] sm:$0xf] }
  0x23   : > { %787 = vmatpush.bf16.msra.mxu2 %v5684_v61  ;;  %806 = vmatpush.bf16.msra.mxu3 %v5688_v1  ;;  %v7867_v30 = vld [vmem:[%s12771_s2 + $0x5c] sm:$0xf0]  ;;  %v5585_v32 = vld [vmem:[%s12771_s2 + $0x60] sm:$0xf0]  ;;  %v5591_v35 = vld [vmem:[%s12771_s2 + $0x48] sm:$0xf] }
  0x24   : > { %339 = vmatpush.msra.mxu0 %v316_v12  ;;  %v7880_v12 = vld [vmem:[%s12771_s2 + $0xcc] sm:$0xf]  ;;  %v5584_v33 = vor.u32 %v7867_v30, %v5583_v28  ;;  %v5588_v34 = vor.u32 %v7863_v31, %v5585_v32  ;;  %v7868_v36 = vld [vmem:[%s12771_s2 + $0x64] sm:$0xf0]  ;;  %v5551_v41 = vld [vmem:[%s12771_s2] sm:$0xf] }
  0x25   : > { %v7864_v37 = vld [vmem:[%s12771_s2 + $0x4c] sm:$0xf]  ;;  %v7859_v42 = vld [vmem:[%s12771_s2 + $0x1c] sm:$0xf0]  ;;  %v7855_v43 = vld [vmem:[%s12771_s2 + $0x4] sm:$0xf] }
  0x26   : > { %340 = vmatpush.msra.mxu0 %v315_v13  ;;  %v5657_v13 = vld [vmem:[%s12771_s2 + $0xe8] sm:$0xf0]  ;;  %769 = vmatpush.bf16.msra.mxu1 %v5648_v8  ;;  %v5552_v44 = vor.u32 %v7859_v42, %v5551_v41  ;;  %v5553_v45 = vld [vmem:[%s12771_s2 + $0x20] sm:$0xf0]  ;;  %v5559_v46 = vld [vmem:[%s12771_s2 + $0x8] sm:$0xf] }
  0x27   : > { %788 = vmatpush.bf16.msra.mxu2 %v5652_v9  ;;  %807 = vmatpush.bf16.msra.mxu3 %v5656_v11  ;;  %v5593_v39 = vld [vmem:[%s12771_s2 + $0x68] sm:$0xf0]  ;;  %v7860_v47 = vld [vmem:[%s12771_s2 + $0x24] sm:$0xf0]  ;;  %v5556_v48 = vor.u32 %v7855_v43, %v5553_v45  ;;  %v5791_v53 = vld [vmem:[%s12771_s2 + $0x1d0] sm:$0xf] }
  0x28   : > { %341 = vmatpush.msra.mxu0 %v314_v14  ;;  %v310_v14 = vld [vmem:[%s8585_s21 + $0x10] sm:$0xff]  ;;  %v5596_v40 = vor.u32 %v7864_v37, %v5593_v39  ;;  %v5560_v49 = vor.u32 %v7860_v47, %v5559_v46  ;;  %v7856_v50 = vld [vmem:[%s12771_s2 + $0xc] sm:$0xf]  ;;  %v5799_v58 = vld [vmem:[%s12771_s2 + $0x1d8] sm:$0xf] }
  0x29   : > { %v7917_v54 = vld [vmem:[%s12771_s2 + $0x1ec] sm:$0xf0]  ;;  %v7913_v55 = vld [vmem:[%s12771_s2 + $0x1d4] sm:$0xf]  ;;  %v7918_v59 = vld [vmem:[%s12771_s2 + $0x1f4] sm:$0xf0] }
  0x2a   : > { %342 = vmatpush.msra.mxu0 %v313_v15  ;;  %v5660_v15 = vor.u32 %v7880_v12, %v5657_v13  ;;  %770 = vmatpush.bf16.msra.mxu1 %v5616_v20  ;;  %v5792_v56 = vor.u32 %v7917_v54, %v5791_v53  ;;  %v5793_v57 = vld [vmem:[%s12771_s2 + $0x1f0] sm:$0xf0]  ;;  %v5800_v61 = vor.u32 %v7918_v59, %v5799_v58  ;;  %v7914_v62 = vld [vmem:[%s12771_s2 + $0x1dc] sm:$0xf]  ;;  %v5759_v1 = vld [vmem:[%s12771_s2 + $0x190] sm:$0xf] }
  0x2b   : > { %789 = vmatpush.bf16.msra.mxu2 %v5620_v24  ;;  %v5801_v63 = vld [vmem:[%s12771_s2 + $0x1f8] sm:$0xf0]  ;;  %v7909_v2 = vld [vmem:[%s12771_s2 + $0x1ac] sm:$0xf0]  ;;  %v7905_v3 = vld [vmem:[%s12771_s2 + $0x194] sm:$0xf] }
  0x2c   : > { %343 = vmatpush.msra.mxu0 %v312_v23  ;;  %v7876_v23 = vld [vmem:[%s12771_s2 + $0xa4] sm:$0xf0]  ;;  %v5760_v4 = vor.u32 %v7909_v2, %v5759_v1  ;;  %v5761_v5 = vld [vmem:[%s12771_s2 + $0x1b0] sm:$0xf0]  ;;  %v5767_v6 = vld [vmem:[%s12771_s2 + $0x198] sm:$0xf] }
  0x2d   : > { %344 = vmatmul.f32.vlgmr.msra.gmra.mxu0 %v308_v29  ;;  %v5624_v25 = vor.u32 %v7876_v23, %v5623_v22  ;;  %v5628_v29 = vor.u32 %v7872_v26, %v5625_v27  ;;  %v7910_v7 = vld [vmem:[%s12771_s2 + $0x1b4] sm:$0xf0]  ;;  %v5764_v8 = vor.u32 %v7905_v3, %v5761_v5  ;;  %v5769_v11 = vld [vmem:[%s12771_s2 + $0x1b8] sm:$0xf0]  ;;  %v5727_v12 = vld [vmem:[%s12771_s2 + $0x150] sm:$0xf] }
  0x2e   : > { %822 = vmatpush.bf16.msrb.mxu0 %v5788_v38  ;;  %v5592_v38 = vor.u32 %v7868_v36, %v5591_v35  ;;  %771 = vmatpush.bf16.msra.mxu1 %v5584_v33  ;;  %v5768_v9 = vor.u32 %v7910_v7, %v5767_v6  ;;  %v5735_v19 = vld [vmem:[%s12771_s2 + $0x158] sm:$0xf]  ;;  %v7898_v21 = vld [vmem:[%s12771_s2 + $0x15c] sm:$0xf]  ;;  %v7893_v26 = vld [vmem:[%s12771_s2 + $0x12c] sm:$0xf0] }
  0x2f   : > { %808 = vmatpush.bf16.msra.mxu3 %v5624_v25  ;;  %790 = vmatpush.bf16.msra.mxu2 %v5588_v34  ;;  %v7902_v20 = vld [vmem:[%s12771_s2 + $0x174] sm:$0xf0]  ;;  %v5737_v23 = vld [vmem:[%s12771_s2 + $0x178] sm:$0xf0]  ;;  %v5695_v25 = vld [vmem:[%s12771_s2 + $0x110] sm:$0xf] }
  0x30   : > { %v5736_v22 = vor.u32 %v7902_v20, %v5735_v19  ;;  %v5740_v24 = vor.u32 %v7898_v21, %v5737_v23  ;;  %v7889_v27 = vld [vmem:[%s12771_s2 + $0x114] sm:$0xf]  ;;  %v5696_v28 = vor.u32 %v7893_v26, %v5695_v25  ;;  %v5703_v30 = vld [vmem:[%s12771_s2 + $0x118] sm:$0xf]  ;;  %v7890_v34 = vld [vmem:[%s12771_s2 + $0x11c] sm:$0xf] }
  0x31   : > { %v7894_v31 = vld [vmem:[%s12771_s2 + $0x134] sm:$0xf0]  ;;  %v5705_v35 = vld [vmem:[%s12771_s2 + $0x138] sm:$0xf0]  ;;  %v5663_v37 = vld [vmem:[%s12771_s2 + $0xd0] sm:$0xf] }
  0x32   : > { %823 = vmatpush.bf16.msrb.mxu0 %v5756_v51  ;;  %v5561_v51 = vld [vmem:[%s12771_s2 + $0x28] sm:$0xf0]  ;;  %772 = vmatpush.bf16.msra.mxu1 %v5552_v44  ;;  %v5704_v33 = vor.u32 %v7894_v31, %v5703_v30  ;;  %v5708_v36 = vor.u32 %v7890_v34, %v5705_v35  ;;  %v7881_v39 = vld [vmem:[%s12771_s2 + $0xd4] sm:$0xf]  ;;  %v5671_v42 = vld [vmem:[%s12771_s2 + $0xd8] sm:$0xf] }
  0x33   : > { %809 = vmatpush.bf16.msra.mxu3 %v5592_v38  ;;  %v5564_v52 = vor.u32 %v7856_v50, %v5561_v51  ;;  %791 = vmatpush.bf16.msra.mxu2 %v5556_v48  ;;  %v7885_v38 = vld [vmem:[%s12771_s2 + $0xec] sm:$0xf0]  ;;  %v5665_v41 = vld [vmem:[%s12771_s2 + $0xf0] sm:$0xf0]  ;;  %v7886_v43 = vld [vmem:[%s12771_s2 + $0xf4] sm:$0xf0] }
  0x34   : > { %v5668_v44 = vor.u32 %v7881_v39, %v5665_v41  ;;  %v5672_v45 = vor.u32 %v7886_v43, %v5671_v42  ;;  %v7882_v46 = vld [vmem:[%s12771_s2 + $0xdc] sm:$0xf]  ;;  %v5631_v48 = vld [vmem:[%s12771_s2 + $0x90] sm:$0xf]  ;;  %v7873_v51 = vld [vmem:[%s12771_s2 + $0x94] sm:$0xf] }
  0x35   : > { %347 = vmatmul.f32.gmra.mxu0 %v309_v60  ;;  %v5796_v60 = vor.u32 %v7913_v55, %v5793_v57  ;;  %v5673_v47 = vld [vmem:[%s12771_s2 + $0xf8] sm:$0xf0]  ;;  %v7877_v50 = vld [vmem:[%s12771_s2 + $0xac] sm:$0xf0]  ;;  %v7878_v57 = vld [vmem:[%s12771_s2 + $0xb4] sm:$0xf0] }
  0x36   : > { %824 = vmatpush.bf16.msrb.mxu0 %v5724_v0  ;;  %841 = vmatpush.bf16.msrb.mxu1 %v5792_v56  ;;  %v5804_v0 = vor.u32 %v7914_v62, %v5801_v63  ;;  %v5632_v54 = vor.u32 %v7877_v50, %v5631_v48  ;;  %v5639_v56 = vld [vmem:[%s12771_s2 + $0x98] sm:$0xf]  ;;  %v7874_v58 = vld [vmem:[%s12771_s2 + $0x9c] sm:$0xf]  ;;  %v7869_v63 = vld [vmem:[%s12771_s2 + $0x6c] sm:$0xf0] }
  0x37   : > { %810 = vmatpush.bf16.msra.mxu3 %v5560_v49  ;;  %860 = vmatpush.bf16.msrb.mxu2 %v5796_v60  ;;  %v5676_v49 = vor.u32 %v7882_v46, %v5673_v47  ;;  %v5640_v59 = vor.u32 %v7878_v57, %v5639_v56  ;;  %v5641_v60 = vld [vmem:[%s12771_s2 + $0xb8] sm:$0xf0]  ;;  %v5601_v1 = vld [vmem:[%s12771_s2 + $0x70] sm:$0xf0]  ;;  %v5607_v3 = vld [vmem:[%s12771_s2 + $0x58] sm:$0xf] }
  0x38   : > { %v5644_v62 = vor.u32 %v7874_v58, %v5641_v60  ;;  %v7866_v5 = vld [vmem:[%s12771_s2 + $0x5c] sm:$0xf]  ;;  %v6031_v31 = vld [vmem:[%s12773_s4 + $0x1c0] sm:$0xf] }
  0x39   : > { %v7858_v20 = vld [vmem:[%s12771_s2 + $0x1c] sm:$0xf]  ;;  %v8171_v35 = vld [vmem:[%s12773_s4 + $0x7dc] sm:$0xf0] }
  0x3a   : > { %825 = vmatpush.bf16.msrb.mxu0 %v5692_v10  ;;  %v7906_v10 = vld [vmem:[%s12771_s2 + $0x19c] sm:$0xf]  ;;  %842 = vmatpush.bf16.msrb.mxu1 %v5760_v4  ;;  %v7870_v4 = vld [vmem:[%s12771_s2 + $0x74] sm:$0xf0]  ;;  %v6767_v39 = vld [vmem:[%s12773_s4 + $0x780] sm:$0xf] }
  0x3b   : > { %879 = vmatpush.bf16.msrb.mxu3 %v5800_v61  ;;  %v5772_v13 = vor.u32 %v7906_v10, %v5769_v11  ;;  %861 = vmatpush.bf16.msrb.mxu2 %v5764_v8  ;;  %v5599_v61 = vld [vmem:[%s12771_s2 + $0x50] sm:$0xf]  ;;  %v5608_v7 = vor.u32 %v7870_v4, %v5607_v3  ;;  %v5609_v8 = vld [vmem:[%s12771_s2 + $0x78] sm:$0xf0]  ;;  %v6287_v41 = vld [vmem:[%s12773_s4 + $0x3c0] sm:$0xf] }
  0x3c   : > { %v5600_v2 = vor.u32 %v7869_v63, %v5599_v61  ;;  %v7861_v10 = vld [vmem:[%s12771_s2 + $0x2c] sm:$0xf0]  ;;  %v5612_v11 = vor.u32 %v7866_v5, %v5609_v8  ;;  %v5577_v21 = vld [vmem:[%s12771_s2 + $0x38] sm:$0xf0]  ;;  %v8043_v43 = vld [vmem:[%s12773_s4 + $0x3dc] sm:$0xf0] }
  0x3d   : > { %350 = vmatmul.f32.gmra.mxu0 %v310_v14  ;;  %v7901_v14 = vld [vmem:[%s12771_s2 + $0x16c] sm:$0xf0]  ;;  %v5580_v25 = vor.u32 %v7858_v20, %v5577_v21  ;;  %v6288_v47 = vor.u32 %v8043_v43, %v6287_v41  ;;  %v7963_v50 = vld [vmem:[%s12773_s4 + $0x15c] sm:$0xf0] }
  0x3e   : > { %826 = vmatpush.bf16.msrb.mxu0 %v5660_v15  ;;  %v7897_v15 = vld [vmem:[%s12771_s2 + $0x154] sm:$0xf]  ;;  %v5728_v17 = vor.u32 %v7901_v14, %v5727_v12  ;;  %v5575_v14 = vld [vmem:[%s12771_s2 + $0x18] sm:$0xf]  ;;  %v6511_v56 = vld [vmem:[%s12773_s4 + $0x580] sm:$0xf] }
  0x3f   : > { %880 = vmatpush.bf16.msrb.mxu3 %v5768_v9  ;;  %v5567_v9 = vld [vmem:[%s12771_s2 + $0x10] sm:$0xf]  ;;  %v7857_v12 = vld [vmem:[%s12771_s2 + $0x14] sm:$0xf]  ;;  %v8099_v57 = vld [vmem:[%s12773_s4 + $0x59c] sm:$0xf0] }
  0x40   : > { %843 = vmatpush.bf16.msrb.mxu1 %v5728_v17  ;;  %v6223_v61 = vld [vmem:[%s12773_s4 + $0x340] sm:$0xf] }
  0x41   : > { %v6479_v63 = vld [vmem:[%s12773_s4 + $0x540] sm:$0xf] }
  0x42   : > { %827 = vmatpush.bf16.msrb.mxu0 %v5628_v29  ;;  %v5697_v29 = vld [vmem:[%s12771_s2 + $0x130] sm:$0xf0]  ;;  %v6703_v3 = vld [vmem:[%s12773_s4 + $0x700] sm:$0xf] }
  0x43   : > { %881 = vmatpush.bf16.msrb.mxu3 %v5736_v22  ;;  %v5700_v32 = vor.u32 %v7889_v27, %v5697_v29  ;;  %v8147_v4 = vld [vmem:[%s12773_s4 + $0x71c] sm:$0xf0] }
  0x44   : > { %844 = vmatpush.bf16.msrb.mxu1 %v5696_v28  ;;  %v6704_v8 = vor.u32 %v8147_v4, %v6703_v3  ;;  %v5871_v21 = vld [vmem:[%s12773_s4 + $0x80] sm:$0xf] }
  0x45   : > { %353 = vmatmul.f32.gmra.mxu0 %v311_v16  ;;  %v5729_v16 = vld [vmem:[%s12771_s2 + $0x170] sm:$0xf0]  ;;  %v6383_v41 = vld [vmem:[%s12773_s4 + $0x480] sm:$0xf] }
  0x46   : > { %828 = vmatpush.bf16.msrb.mxu0 %v5596_v40  ;;  %v5732_v18 = vor.u32 %v7897_v15, %v5729_v16  ;;  %v5664_v40 = vor.u32 %v7885_v38, %v5663_v37  ;;  %v7862_v15 = vld [vmem:[%s12771_s2 + $0x34] sm:$0xf0]  ;;  %v5568_v16 = vor.u32 %v7861_v10, %v5567_v9  ;;  %v7971_v37 = vld [vmem:[%s12773_s4 + $0x19c] sm:$0xf0] }
  0x47   : > { %882 = vmatpush.bf16.msrb.mxu3 %v5704_v33  ;;  %v5576_v19 = vor.u32 %v7862_v15, %v5575_v14  ;;  %v6799_v33 = vld [vmem:[%s12773_s4 + $0x7c0] sm:$0xf] }
  0x48   : > { %862 = vmatpush.bf16.msrb.mxu2 %v5732_v18  ;;  %845 = vmatpush.bf16.msrb.mxu1 %v5664_v40  ;;  %v6800_v38 = vor.u32 %v8171_v35, %v6799_v33  ;;  %v8163_v40 = vld [vmem:[%s12773_s4 + $0x79c] sm:$0xf0] }
  0x49   : > { %v6768_v46 = vor.u32 %v8163_v40, %v6767_v39  ;;  %v5903_v9 = vld [vmem:[%s12773_s4 + $0xc0] sm:$0xf] }
  0x4a   : > { %829 = vmatpush.bf16.msrb.mxu0 %v5564_v52  ;;  %v5633_v52 = vld [vmem:[%s12771_s2 + $0xb0] sm:$0xf0]  ;;  %v7947_v10 = vld [vmem:[%s12773_s4 + $0xdc] sm:$0xf0] }
  0x4b   : > { %883 = vmatpush.bf16.msrb.mxu3 %v5672_v45  ;;  %v5636_v55 = vor.u32 %v7873_v51, %v5633_v52  ;;  %v8107_v45 = vld [vmem:[%s12773_s4 + $0x5dc] sm:$0xf0] }
  0x4c   : > { %863 = vmatpush.bf16.msrb.mxu2 %v5700_v32  ;;  %846 = vmatpush.bf16.msrb.mxu1 %v5632_v54  ;;  %v7979_v32 = vld [vmem:[%s12773_s4 + $0x1dc] sm:$0xf0] }
  0x4d   : > { %v6032_v34 = vor.u32 %v7979_v32, %v6031_v31  ;;  %v6735_v51 = vld [vmem:[%s12773_s4 + $0x740] sm:$0xf] }
  0x4e   : > { %898 = vmatpush.bf16.msra.mxu0 %v5804_v0  ;;  %v7865_v0 = vld [vmem:[%s12771_s2 + $0x54] sm:$0xf]  ;;  %v8155_v52 = vld [vmem:[%s12773_s4 + $0x75c] sm:$0xf0] }
  0x4f   : > { %884 = vmatpush.bf16.msrb.mxu3 %v5640_v59  ;;  %v5604_v6 = vor.u32 %v7865_v0, %v5601_v1  ;;  %v8035_v54 = vld [vmem:[%s12773_s4 + $0x39c] sm:$0xf0]  ;;  %v6512_v59 = vor.u32 %v8099_v57, %v6511_v56  ;;  %v6736_v60 = vor.u32 %v8155_v52, %v6735_v51 }
  0x50   : > { %864 = vmatpush.bf16.msrb.mxu2 %v5668_v44  ;;  %847 = vmatpush.bf16.msrb.mxu1 %v5600_v2  ;;  %v6543_v44 = vld [vmem:[%s12773_s4 + $0x5c0] sm:$0xf] }
  0x51   : > { %v6544_v48 = vor.u32 %v8107_v45, %v6543_v44  ;;  %v5935_v0 = vld [vmem:[%s12773_s4 + $0x100] sm:$0xf] }
  0x52   : > { %899 = vmatpush.bf16.msra.mxu0 %v5772_v13  ;;  %v5569_v13 = vld [vmem:[%s12771_s2 + $0x30] sm:$0xf0]  ;;  %v8091_v1 = vld [vmem:[%s12773_s4 + $0x55c] sm:$0xf0] }
  0x53   : > { %885 = vmatpush.bf16.msrb.mxu3 %v5608_v7  ;;  %v5572_v18 = vor.u32 %v7857_v12, %v5569_v13  ;;  %v7955_v2 = vld [vmem:[%s12773_s4 + $0x11c] sm:$0xf0] }
  0x54   : > { %865 = vmatpush.bf16.msrb.mxu2 %v5636_v55  ;;  %848 = vmatpush.bf16.msrb.mxu1 %v5568_v16  ;;  %v5936_v7 = vor.u32 %v7955_v2, %v5935_v0  ;;  %v6671_v12 = vld [vmem:[%s12773_s4 + $0x6c0] sm:$0xf] }
  0x55   : > { %v8139_v13 = vld [vmem:[%s12773_s4 + $0x6dc] sm:$0xf0] }
  0x56   : > { %900 = vmatpush.bf16.msra.mxu0 %v5740_v24  ;;  %v6672_v14 = vor.u32 %v8139_v13, %v6671_v12  ;;  %v6191_v15 = vld [vmem:[%s12773_s4 + $0x300] sm:$0xf] }
  0x57   : > { %886 = vmatpush.bf16.msrb.mxu3 %v5576_v19  ;;  %v8019_v16 = vld [vmem:[%s12773_s4 + $0x31c] sm:$0xf0] }
  0x58   : > { %866 = vmatpush.bf16.msrb.mxu2 %v5604_v6  ;;  %v6480_v6 = vor.u32 %v8091_v1, %v6479_v63  ;;  %v8083_v19 = vld [vmem:[%s12773_s4 + $0x51c] sm:$0xf0] }
  0x59   : > { %v8075_v31 = vld [vmem:[%s12773_s4 + $0x4dc] sm:$0xf0] }
  0x5a   : > { %901 = vmatpush.bf16.msra.mxu0 %v5708_v36  ;;  %v5999_v36 = vld [vmem:[%s12773_s4 + $0x180] sm:$0xf] }
  0x5b   : > { %v6000_v42 = vor.u32 %v7971_v37, %v5999_v36  ;;  %v5839_v33 = vld [vmem:[%s12773_s4 + $0x40] sm:$0xf] }
  0x5c   : > { %867 = vmatpush.bf16.msrb.mxu2 %v5572_v18  ;;  %v6447_v18 = vld [vmem:[%s12773_s4 + $0x500] sm:$0xf] }
  0x5d   : > { %v6448_v20 = vor.u32 %v8083_v19, %v6447_v18  ;;  %v6607_v36 = vld [vmem:[%s12773_s4 + $0x640] sm:$0xf] }
  0x5e   : > { %902 = vmatpush.bf16.msra.mxu0 %v5676_v49  ;;  %v5967_v49 = vld [vmem:[%s12773_s4 + $0x140] sm:$0xf] }
  0x5f   : > { %v5968_v58 = vor.u32 %v7963_v50, %v5967_v49  ;;  %v8123_v37 = vld [vmem:[%s12773_s4 + $0x65c] sm:$0xf0] }
  0x60   : > { %v6127_v39 = vld [vmem:[%s12773_s4 + $0x280] sm:$0xf] }
  0x61   : > { %v8003_v40 = vld [vmem:[%s12773_s4 + $0x29c] sm:$0xf0] }
  0x62   : > { %903 = vmatpush.bf16.msra.mxu0 %v5644_v62  ;;  %v8027_v62 = vld [vmem:[%s12773_s4 + $0x35c] sm:$0xf0] }
  0x63   : > { %v6224_v5 = vor.u32 %v8027_v62, %v6223_v61  ;;  %v8067_v43 = vld [vmem:[%s12773_s4 + $0x49c] sm:$0xf0] }
  0x64   : > { %v6384_v44 = vor.u32 %v8067_v43, %v6383_v41  ;;  %v5807_v45 = vld [vmem:[%s12773_s4] sm:$0xf] }
  0x65   : > { %v8115_v49 = vld [vmem:[%s12773_s4 + $0x61c] sm:$0xf0] }
  0x66   : > { %904 = vmatpush.bf16.msra.mxu0 %v5612_v11  ;;  %v5904_v11 = vor.u32 %v7947_v10, %v5903_v9  ;;  %v6095_v51 = vld [vmem:[%s12773_s4 + $0x240] sm:$0xf] }
  0x67   : > { %v7995_v52 = vld [vmem:[%s12773_s4 + $0x25c] sm:$0xf0] }
  0x68   : > { %v7055_v57 = vld [vmem:[%s12773_s4 + $0x9c0] sm:$0xf] }
  0x69   : > { %v8427_v61 = vld [vmem:[%s12773_s4 + $0xfdc] sm:$0xf0] }
  0x6a   : > { %905 = vmatpush.bf16.msra.mxu0 %v5580_v25  ;;  %v8131_v25 = vld [vmem:[%s12773_s4 + $0x69c] sm:$0xf0] }
  0x6b   : > { %v6063_v63 = vld [vmem:[%s12773_s4 + $0x200] sm:$0xf] }
  0x6c   : > { %v7987_v0 = vld [vmem:[%s12773_s4 + $0x21c] sm:$0xf0] }
  0x6d   : > { %v6319_v1 = vld [vmem:[%s12773_s4 + $0x400] sm:$0xf]  ;;  %v6064_v2 = vor.u32 %v7987_v0, %v6063_v63 }
  0x6e   : > { %v8051_v3 = vld [vmem:[%s12773_s4 + $0x41c] sm:$0xf0] }
  0x6f   : > { %v6320_v4 = vor.u32 %v8051_v3, %v6319_v1  ;;  %v8419_v9 = vld [vmem:[%s12773_s4 + $0xf9c] sm:$0xf0] }
  0x70   : > { %v8299_v12 = vld [vmem:[%s12773_s4 + $0xbdc] sm:$0xf0] }
  0x71   : > { %v7567_v13 = vld [vmem:[%s12773_s4 + $0xdc0] sm:$0xf] }
  0x72   : > { %v8219_v18 = vld [vmem:[%s12773_s4 + $0x95c] sm:$0xf0] }
  0x73   : > { %v7759_v19 = vld [vmem:[%s12773_s4 + $0xf40] sm:$0xf] }
  0x74   : > { %v6927_v41 = vld [vmem:[%s12773_s4 + $0x8c0] sm:$0xf] }
  0x75   : > { %v7695_v43 = vld [vmem:[%s12773_s4 + $0xec0] sm:$0xf] }
  0x76   : > { %v7183_v0 = vld [vmem:[%s12773_s4 + $0xac0] sm:$0xf] }
  0x77   : > { %v8267_v1 = vld [vmem:[%s12773_s4 + $0xadc] sm:$0xf0] }
  0x78   : > { %v7439_v3 = vld [vmem:[%s12773_s4 + $0xcc0] sm:$0xf] }
  0xaa   : > { %v345_v53 = vpop.f32.mrf.mxu0 }
  0xab   : > { %v357_v22 = vmax.f32 %v345_v53, 0.0  ;;  %v6255_v53 = vld [vmem:[%s12773_s4 + $0x380] sm:$0xf] }
  0xac   : > { %v6256_v55 = vor.u32 %v8035_v54, %v6255_v53  ;;  %v6351_v53 = vld [vmem:[%s12773_s4 + $0x440] sm:$0xf]  ;;  %v6096_v54 = vor.u32 %v7995_v52, %v6095_v51 }
  0xb2   : > { %v348_v17 = vpop.f32.mrf.mxu0 }
  0xb3   : > { %v358_v23 = vmax.f32 %v348_v17, 0.0  ;;  %v6192_v17 = vor.u32 %v8019_v16, %v6191_v15  ;;  %v8363_v15 = vld [vmem:[%s12773_s4 + $0xddc] sm:$0xf0] }
  0xb4   : > { %v7568_v16 = vor.u32 %v8363_v15, %v7567_v13  ;;  %v8379_v13 = vld [vmem:[%s12773_s4 + $0xe5c] sm:$0xf0] }
  0xb5   : > { %v8978_v24 = vpack.c.bf16 %v358_v23, %v357_v22  ;;  %v7939_v22 = vld [vmem:[%s12773_s4 + $0x9c] sm:$0xf0] }
  0xb6   : > { %v6639_v23 = vld [vmem:[%s12773_s4 + $0x680] sm:$0xf] }
  0xb7   : > { %773 = vmatmul.bf16.vlgmr.msra.gmra.mxu1 %v8978_v24  ;;  %792 = vmatmul.bf16.vlgmr.msra.gmra.mxu2 %v8978_v24 }
  0xb8   : > { %811 = vmatmul.bf16.vlgmr.msra.gmra.mxu3 %v8978_v24  ;;  %830 = vmatmul.bf16.vlgmr.msrb.gmra.mxu0 %v8978_v24 }
  0xb9   : > { %4055 = vmatpush.bf16.msra.mxu1 %v6032_v34  ;;  %4112 = vmatpush.bf16.msrb.mxu0 %v6800_v38  ;;  %v7931_v34 = vld [vmem:[%s12773_s4 + $0x5c] sm:$0xf0]  ;;  %v6608_v38 = vor.u32 %v8123_v37, %v6607_v36 }
  0xba   : > { %v351_v26 = vpop.f32.mrf.mxu0  ;;  %4074 = vmatpush.bf16.msra.mxu2 %v6288_v47  ;;  %4093 = vmatpush.bf16.msra.mxu3 %v6544_v48  ;;  %v5840_v35 = vor.u32 %v7931_v34, %v5839_v33  ;;  %v6575_v47 = vld [vmem:[%s12773_s4 + $0x600] sm:$0xf] }
  0xbb   : > { %v359_v28 = vmax.f32 %v351_v26, 0.0  ;;  %v6640_v26 = vor.u32 %v8131_v25, %v6639_v23  ;;  %v6576_v50 = vor.u32 %v8115_v49, %v6575_v47  ;;  %v7279_v23 = vld [vmem:[%s12773_s4 + $0xb80] sm:$0xf] }
  0xbc   : > { %v7535_v25 = vld [vmem:[%s12773_s4 + $0xd80] sm:$0xf] }
  0xbd   : > { %4056 = vmatpush.bf16.msra.mxu1 %v6000_v42  ;;  %4113 = vmatpush.bf16.msrb.mxu0 %v6768_v46  ;;  %v6128_v42 = vor.u32 %v8003_v40, %v6127_v39  ;;  %v7923_v46 = vld [vmem:[%s12773_s4 + $0x1c] sm:$0xf0] }
  0xbe   : > { %4075 = vmatpush.bf16.msra.mxu2 %v6256_v55  ;;  %4094 = vmatpush.bf16.msra.mxu3 %v6512_v59  ;;  %v5808_v48 = vor.u32 %v7923_v46, %v5807_v45  ;;  %v8059_v55 = vld [vmem:[%s12773_s4 + $0x45c] sm:$0xf0] }
  0xbf   : > { %v6352_v56 = vor.u32 %v8059_v55, %v6351_v53  ;;  %v7823_v59 = vld [vmem:[%s12773_s4 + $0xfc0] sm:$0xf] }
  0xc0   : > { %v7824_v62 = vor.u32 %v8427_v61, %v7823_v59  ;;  %v8403_v33 = vld [vmem:[%s12773_s4 + $0xf1c] sm:$0xf0] }
  0xc1   : > { %4057 = vmatpush.bf16.msra.mxu1 %v5968_v58  ;;  %4114 = vmatpush.bf16.msrb.mxu0 %v6736_v60  ;;  %v8235_v58 = vld [vmem:[%s12773_s4 + $0x9dc] sm:$0xf0] }
  0xc2   : > { %v354_v27 = vpop.f32.mrf.mxu0  ;;  %4076 = vmatpush.bf16.msra.mxu2 %v6224_v5  ;;  %4095 = vmatpush.bf16.msra.mxu3 %v6480_v6  ;;  %v7056_v60 = vor.u32 %v8235_v58, %v7055_v57  ;;  %v7023_v5 = vld [vmem:[%s12773_s4 + $0x980] sm:$0xf] }
  0xc3   : > { %v360_v29 = vmax.f32 %v354_v27, 0.0  ;;  %v6159_v27 = vld [vmem:[%s12773_s4 + $0x2c0] sm:$0xf] }
  0xc4   : > { %v8227_v6 = vld [vmem:[%s12773_s4 + $0x99c] sm:$0xf0] }
  0xc5   : > { %v8984_v30 = vpack.c.bf16 %v360_v29, %v359_v28  ;;  %4058 = vmatpush.bf16.msra.mxu1 %v5936_v7  ;;  %4115 = vmatpush.bf16.msrb.mxu0 %v6704_v8  ;;  %v8011_v28 = vld [vmem:[%s12773_s4 + $0x2dc] sm:$0xf0]  ;;  %v7024_v8 = vor.u32 %v8227_v6, %v7023_v5 }
  0xc6   : > { %4077 = vmatpush.bf16.msra.mxu2 %v6192_v17  ;;  %4096 = vmatpush.bf16.msra.mxu3 %v6448_v20  ;;  %v6160_v29 = vor.u32 %v8011_v28, %v6159_v27  ;;  %v7791_v7 = vld [vmem:[%s12773_s4 + $0xf80] sm:$0xf] }
  0xc7   : > { %778 = vmatmul.bf16.gmra.mxu1 %v8984_v30  ;;  %797 = vmatmul.bf16.gmra.mxu2 %v8984_v30  ;;  %v7792_v10 = vor.u32 %v8419_v9, %v7791_v7  ;;  %v6991_v17 = vld [vmem:[%s12773_s4 + $0x940] sm:$0xf] }
  0xc8   : > { %816 = vmatmul.bf16.gmra.mxu3 %v8984_v30  ;;  %835 = vmatmul.bf16.gmra.mxu0 %v8984_v30  ;;  %v6992_v20 = vor.u32 %v8219_v18, %v6991_v17  ;;  %v8355_v27 = vld [vmem:[%s12773_s4 + $0xd9c] sm:$0xf0] }
  0xc9   : > { %4059 = vmatpush.bf16.msra.mxu1 %v5904_v11  ;;  %4116 = vmatpush.bf16.msrb.mxu0 %v6672_v14  ;;  %v7311_v11 = vld [vmem:[%s12773_s4 + $0xbc0] sm:$0xf]  ;;  %v7536_v28 = vor.u32 %v8355_v27, %v7535_v25 }
  0xca   : > { %4078 = vmatpush.bf16.msra.mxu2 %v6160_v29  ;;  %v7312_v14 = vor.u32 %v8299_v12, %v7311_v11  ;;  %v6959_v29 = vld [vmem:[%s12773_s4 + $0x900] sm:$0xf] }
  0xcb   : > { %v8283_v36 = vld [vmem:[%s12773_s4 + $0xb5c] sm:$0xf0] }
  0xcc   : > { %v7503_v37 = vld [vmem:[%s12773_s4 + $0xd40] sm:$0xf] }
  0xcd   : > { %4117 = vmatpush.bf16.msrb.mxu0 %v6640_v26  ;;  %v8347_v39 = vld [vmem:[%s12773_s4 + $0xd5c] sm:$0xf0] }
  0xce   : > { %4079 = vmatpush.bf16.msra.mxu2 %v6128_v42  ;;  %v7504_v40 = vor.u32 %v8347_v39, %v7503_v37  ;;  %v8203_v42 = vld [vmem:[%s12773_s4 + $0x8dc] sm:$0xf0] }
  0xcf   : > { %v8395_v45 = vld [vmem:[%s12773_s4 + $0xedc] sm:$0xf0] }
  0xd0   : > { %v9289_v46 = vld [vmem:[%s12772_s3] sm:$0xff] }
  0xd1   : > { %4118 = vmatpush.bf16.msrb.mxu0 %v6608_v38  ;;  %v7215_v49 = vld [vmem:[%s12773_s4 + $0xb00] sm:$0xf]  ;;  %v9313_v59 = vperm.slane %v9289_v46, 0  ;;  %v9364_v25 = vperm.slane %v9289_v46, 2 }
  0xd2   : > { %4080 = vmatpush.bf16.msra.mxu2 %v6096_v54  ;;  %v7471_v53 = vld [vmem:[%s12773_s4 + $0xd00] sm:$0xf] }
  0xd3   : > { %v8339_v54 = vld [vmem:[%s12773_s4 + $0xd1c] sm:$0xf0] }
  0xd4   : > { %v7472_v55 = vor.u32 %v8339_v54, %v7471_v53  ;;  %v8195_v57 = vld [vmem:[%s12773_s4 + $0x89c] sm:$0xf0] }
  0xd5   : > { %4119 = vmatpush.bf16.msrb.mxu0 %v6576_v50  ;;  %v8275_v50 = vld [vmem:[%s12773_s4 + $0xb1c] sm:$0xf0] }
  0xd6   : > { %4081 = vmatpush.bf16.msra.mxu2 %v6064_v2  ;;  %v7216_v52 = vor.u32 %v8275_v50, %v7215_v49  ;;  %v7663_v58 = vld [vmem:[%s12773_s4 + $0xe80] sm:$0xf]  ;;  %v7184_v2 = vor.u32 %v8267_v1, %v7183_v0  ;;  %v7975_v50 = vld [vmem:[%s12773_s4 + $0x1c4] sm:$0xf] }
  0xd7   : > { %849 = vmatmul.bf16.vlgmr.msrb.gmra.mxu1 %v8978_v24  ;;  %868 = vmatmul.bf16.vlgmr.msrb.gmra.mxu2 %v8978_v24  ;;  %v8387_v61 = vld [vmem:[%s12773_s4 + $0xe9c] sm:$0xf0] }
  0xd8   : > { %887 = vmatmul.bf16.vlgmr.msrb.gmra.mxu3 %v8978_v24  ;;  %906 = vmatmul.bf16.vlgmr.msra.gmra.mxu0 %v8978_v24  ;;  %v5872_v24 = vor.u32 %v7939_v22, %v5871_v21  ;;  %v8411_v21 = vld [vmem:[%s12773_s4 + $0xf5c] sm:$0xf0]  ;;  %v7664_v63 = vor.u32 %v8387_v61, %v7663_v58 }
  0xd9   : > { %4188 = vmatpush.bf16.msra.mxu0 %v7824_v62  ;;  %v7760_v22 = vor.u32 %v8411_v21, %v7759_v19  ;;  %v9319_v62 = vperm.slane %v9289_v46, 3  ;;  %v6863_v7 = vld [vmem:[%s12773_s4 + $0x840] sm:$0xf] }
  0xda   : > { %4060 = vmatpush.bf16.msra.mxu1 %v5872_v24  ;;  %4150 = vmatpush.bf16.msrb.mxu2 %v7312_v14  ;;  %v8291_v24 = vld [vmem:[%s12773_s4 + $0xb9c] sm:$0xf0] }
  0xdb   : > { %v7280_v26 = vor.u32 %v8291_v24, %v7279_v23  ;;  %v7631_v12 = vld [vmem:[%s12773_s4 + $0xe40] sm:$0xf] }
  0xdc   : > { %v7151_v17 = vld [vmem:[%s12773_s4 + $0xa80] sm:$0xf] }
  0xdd   : > { %4189 = vmatpush.bf16.msra.mxu0 %v7792_v10  ;;  %v8259_v18 = vld [vmem:[%s12773_s4 + $0xa9c] sm:$0xf0] }
  0xde   : > { %4061 = vmatpush.bf16.msra.mxu1 %v5840_v35  ;;  %4151 = vmatpush.bf16.msrb.mxu2 %v7280_v26  ;;  %v7247_v35 = vld [vmem:[%s12773_s4 + $0xb40] sm:$0xf]  ;;  %v7152_v23 = vor.u32 %v8259_v18, %v7151_v17  ;;  %v8039_v17 = vld [vmem:[%s12773_s4 + $0x3c4] sm:$0xf] }
  0xdf   : > { %v7248_v38 = vor.u32 %v8283_v36, %v7247_v35  ;;  %v7407_v19 = vld [vmem:[%s12773_s4 + $0xc80] sm:$0xf]  ;;  %v6289_v18 = vld [vmem:[%s12773_s4 + $0x3e0] sm:$0xf0] }
  0xe0   : > { %v8323_v24 = vld [vmem:[%s12773_s4 + $0xc9c] sm:$0xf0] }
  0xe1   : > { %4190 = vmatpush.bf16.msra.mxu0 %v7760_v22  ;;  %v7408_v27 = vor.u32 %v8323_v24, %v7407_v19  ;;  %v8251_v39 = vld [vmem:[%s12773_s4 + $0xa5c] sm:$0xf0]  ;;  %v6292_v19 = vor.u32 %v8039_v17, %v6289_v18  ;;  %v6193_v17 = vld [vmem:[%s12773_s4 + $0x320] sm:$0xf0] }
  0xe2   : > { %4062 = vmatpush.bf16.msra.mxu1 %v5808_v48  ;;  %4152 = vmatpush.bf16.msrb.mxu2 %v7248_v38  ;;  %v7696_v48 = vor.u32 %v8395_v45, %v7695_v43  ;;  %v7119_v38 = vld [vmem:[%s12773_s4 + $0xa40] sm:$0xf]  ;;  %v8079_v18 = vld [vmem:[%s12773_s4 + $0x504] sm:$0xf] }
  0xe3   : > { %v7375_v43 = vld [vmem:[%s12773_s4 + $0xc40] sm:$0xf] }
  0xe4   : > { %v7087_v61 = vld [vmem:[%s12773_s4 + $0xa00] sm:$0xf] }
  0xe5   : > { %v7343_v0 = vld [vmem:[%s12773_s4 + $0xc00] sm:$0xf] }
  0xe6   : > { %4131 = vmatpush.bf16.msrb.mxu1 %v7056_v60  ;;  %4153 = vmatpush.bf16.msrb.mxu2 %v7216_v52  ;;  %v8167_v52 = vld [vmem:[%s12773_s4 + $0x7c4] sm:$0xf] }
  0xe7   : > { %854 = vmatmul.bf16.gmra.mxu1 %v8984_v30  ;;  %873 = vmatmul.bf16.gmra.mxu2 %v8984_v30 }
  0xe8   : > { %892 = vmatmul.bf16.gmra.mxu3 %v8984_v30  ;;  %911 = vmatmul.bf16.gmra.mxu0 %v8984_v30  ;;  %v6415_v30 = vld [vmem:[%s12773_s4 + $0x4c0] sm:$0xf] }
  0xe9   : > { %v6416_v32 = vor.u32 %v8075_v31, %v6415_v30  ;;  %v8211_v30 = vld [vmem:[%s12773_s4 + $0x91c] sm:$0xf0] }
  0xea   : > { %4132 = vmatpush.bf16.msrb.mxu1 %v7024_v8  ;;  %v7727_v31 = vld [vmem:[%s12773_s4 + $0xf00] sm:$0xf]  ;;  %4154 = vmatpush.bf16.msrb.mxu2 %v7184_v2 }
  0xeb   : > { %4097 = vmatpush.bf16.msra.mxu3 %v6416_v32  ;;  %v6960_v32 = vor.u32 %v8211_v30, %v6959_v29  ;;  %v7728_v34 = vor.u32 %v8403_v33, %v7727_v31  ;;  %v8187_v8 = vld [vmem:[%s12773_s4 + $0x85c] sm:$0xf0] }
  0xec   : > { %v6864_v11 = vor.u32 %v8187_v8, %v6863_v7  ;;  %v8179_v29 = vld [vmem:[%s12773_s4 + $0x81c] sm:$0xf0] }
  0xed   : > { %4191 = vmatpush.bf16.msra.mxu0 %v7728_v34  ;;  %v7599_v33 = vld [vmem:[%s12773_s4 + $0xe00] sm:$0xf] }
  0xee   : > { %4133 = vmatpush.bf16.msrb.mxu1 %v6992_v20  ;;  %v9357_v20 = vperm.slane %v9289_v46, 1  ;;  %4155 = vmatpush.bf16.msrb.mxu2 %v7152_v23  ;;  %v8371_v34 = vld [vmem:[%s12773_s4 + $0xe1c] sm:$0xf0] }
  0xef   : > { %4098 = vmatpush.bf16.msra.mxu3 %v6384_v44  ;;  %v6928_v44 = vor.u32 %v8203_v42, %v6927_v41  ;;  %v7600_v37 = vor.u32 %v8371_v34, %v7599_v33  ;;  %v7120_v42 = vor.u32 %v8251_v39, %v7119_v38  ;;  %v8095_v38 = vld [vmem:[%s12773_s4 + $0x584] sm:$0xf] }
  0xf1   : > { %4192 = vmatpush.bf16.msra.mxu0 %v7696_v48 }
  0xf2   : > { %4134 = vmatpush.bf16.msrb.mxu1 %v6960_v32  ;;  %4156 = vmatpush.bf16.msrb.mxu2 %v7120_v42 }
  0xf3   : > { %4099 = vmatpush.bf16.msra.mxu3 %v6352_v56  ;;  %v6895_v56 = vld [vmem:[%s12773_s4 + $0x880] sm:$0xf] }
  0xf4   : > { %v6896_v60 = vor.u32 %v8195_v57, %v6895_v56  ;;  %v6801_v56 = vld [vmem:[%s12773_s4 + $0x7e0] sm:$0xf0] }
  0xf5   : > { %4193 = vmatpush.bf16.msra.mxu0 %v7664_v63  ;;  %v8243_v63 = vld [vmem:[%s12773_s4 + $0xa1c] sm:$0xf0] }
  0xf6   : > { %4135 = vmatpush.bf16.msrb.mxu1 %v6928_v44  ;;  %v8315_v44 = vld [vmem:[%s12773_s4 + $0xc5c] sm:$0xf0] }
  0xf7   : > { %4100 = vmatpush.bf16.msra.mxu3 %v6320_v4  ;;  %v8331_v4 = vld [vmem:[%s12773_s4 + $0xcdc] sm:$0xf0]  ;;  %v7376_v49 = vor.u32 %v8315_v44, %v7375_v43  ;;  %v6513_v43 = vld [vmem:[%s12773_s4 + $0x5a0] sm:$0xf0] }
  0xf8   : > { %v7440_v6 = vor.u32 %v8331_v4, %v7439_v3  ;;  %v7088_v4 = vor.u32 %v8243_v63, %v7087_v61  ;;  %v8087_v63 = vld [vmem:[%s12773_s4 + $0x544] sm:$0xf] }
  0xfa   : > { %4136 = vmatpush.bf16.msrb.mxu1 %v6896_v60  ;;  %v6804_v60 = vor.u32 %v8167_v52, %v6801_v56  ;;  %4157 = vmatpush.bf16.msrb.mxu2 %v7088_v4  ;;  %v8143_v52 = vld [vmem:[%s12773_s4 + $0x704] sm:$0xf] }
  0xfb   : > { %4169 = vmatpush.bf16.msrb.mxu3 %v7568_v16  ;;  %v7632_v16 = vor.u32 %v8379_v13, %v7631_v12  ;;  %v8159_v13 = vld [vmem:[%s12773_s4 + $0x784] sm:$0xf] }
  0xfc   : > { %v8023_v56 = vld [vmem:[%s12773_s4 + $0x344] sm:$0xf] }
  0xfd   : > { %4194 = vmatpush.bf16.msra.mxu0 %v7632_v16 }
  0xfe   : > { %4137 = vmatpush.bf16.msrb.mxu1 %v6864_v11 }
  0xff   : > { %4170 = vmatpush.bf16.msrb.mxu3 %v7536_v28  ;;  %v6831_v28 = vld [vmem:[%s12773_s4 + $0x800] sm:$0xf] }
 0x100   : > { %v6832_v32 = vor.u32 %v8179_v29, %v6831_v28  ;;  %v8151_v28 = vld [vmem:[%s12773_s4 + $0x744] sm:$0xf] }
 0x101   : > { %4195 = vmatpush.bf16.msra.mxu0 %v7600_v37  ;;  %v6257_v37 = vld [vmem:[%s12773_s4 + $0x3a0] sm:$0xf0] }
 0x102   : > { %4138 = vmatpush.bf16.msrb.mxu1 %v6832_v32  ;;  %v6737_v32 = vld [vmem:[%s12773_s4 + $0x760] sm:$0xf0] }
 0x103   : > { %4171 = vmatpush.bf16.msrb.mxu3 %v7504_v40 }
 0x107   : > { %4172 = vmatpush.bf16.msrb.mxu3 %v7472_v55 }
 0x10b   : > { %4173 = vmatpush.bf16.msrb.mxu3 %v7440_v6 }
 0x10f   : > { %4174 = vmatpush.bf16.msrb.mxu3 %v7408_v27  ;;  %v5969_v27 = vld [vmem:[%s12773_s4 + $0x160] sm:$0xf0] }
 0x113   : > { %4175 = vmatpush.bf16.msrb.mxu3 %v7376_v49  ;;  %v5937_v49 = vld [vmem:[%s12773_s4 + $0x120] sm:$0xf0] }
 0x134   : > { %v774_v47 = vpop.f32.mrf.mxu1 }
 0x135   : > { %v831_v51 = vpop.f32.mrf.mxu0  ;;  %v775_v9 = vadd.f32 %v774_v47, %v9313_v59 }
 0x136   : > { %v832_v14 = vadd.f32 %v831_v51, %v9319_v62  ;;  %v6033_v51 = vld [vmem:[%s12773_s4 + $0x1e0] sm:$0xf0] }
 0x137   : > { %v917_v30 = vmax.f32 %v775_v9, 0.0  ;;  %v6036_v55 = vor.u32 %v7975_v50, %v6033_v51  ;;  %v7967_v9 = vld [vmem:[%s12773_s4 + $0x184] sm:$0xf] }
 0x138   : > { %v920_v35 = vmax.f32 %v832_v14, 0.0  ;;  %v6769_v14 = vld [vmem:[%s12773_s4 + $0x7a0] sm:$0xf0] }
 0x139   : > { %v6772_v16 = vor.u32 %v8159_v13, %v6769_v14 }
 0x13a   : > { %v793_v5 = vpop.f32.mrf.mxu2 }
 0x13b   : > { %v812_v10 = vpop.f32.mrf.mxu3  ;;  %v794_v40 = vadd.f32 %v793_v5, %v9357_v20  ;;  %v8307_v5 = vld [vmem:[%s12773_s4 + $0xc1c] sm:$0xf0] }
 0x13c   : > { %v776_v15 = vpop.f32.mrf.mxu1  ;;  %v813_v45 = vadd.f32 %v812_v10, %v9364_v25  ;;  %v7344_v8 = vor.u32 %v8307_v5, %v7343_v0  ;;  %v6001_v10 = vld [vmem:[%s12773_s4 + $0x1a0] sm:$0xf0] }
 0x13d   : > { %v777_v21 = vadd.f32 %v776_v15, %v9313_v59  ;;  %v833_v22 = vpop.f32.mrf.mxu0  ;;  %v918_v1 = vmax.f32 %v794_v40, 0.0  ;;  %v6004_v12 = vor.u32 %v7967_v9, %v6001_v10  ;;  %v6481_v0 = vld [vmem:[%s12773_s4 + $0x560] sm:$0xf0] }
 0x13e   : > { %v834_v26 = vadd.f32 %v833_v22, %v9319_v62  ;;  %v919_v6 = vmax.f32 %v813_v45, 0.0  ;;  %4176 = vmatpush.bf16.msrb.mxu3 %v7344_v8  ;;  %v6545_v22 = vld [vmem:[%s12773_s4 + $0x5e0] sm:$0xf0]  ;;  %v6516_v45 = vor.u32 %v8095_v38, %v6513_v43  ;;  %v6484_v4 = vor.u32 %v8087_v63, %v6481_v0 }
 0x13f   : > { %v925_v31 = vmax.f32 %v777_v21, 0.0  ;;  %v8103_v21 = vld [vmem:[%s12773_s4 + $0x5c4] sm:$0xf] }
 0x140   : > { %v928_v36 = vmax.f32 %v834_v26, 0.0  ;;  %v6548_v24 = vor.u32 %v8103_v21, %v6545_v22  ;;  %v7959_v26 = vld [vmem:[%s12773_s4 + $0x144] sm:$0xf] }
 0x141   : > { %v9386_v41 = vpack.c.bf16 %v925_v31, %v917_v30  ;;  %v5972_v31 = vor.u32 %v7959_v26, %v5969_v27  ;;  %v7943_v5 = vld [vmem:[%s12773_s4 + $0xc4] sm:$0xf] }
 0x142   : > { %v9395_v47 = vpack.c.bf16 %v928_v36, %v920_v35  ;;  %v795_v48 = vpop.f32.mrf.mxu2  ;;  %v6740_v35 = vor.u32 %v8151_v28, %v6737_v32  ;;  %v8031_v36 = vld [vmem:[%s12773_s4 + $0x384] sm:$0xf] }
 0x143   : > { %v796_v53 = vadd.f32 %v795_v48, %v9357_v20  ;;  %v814_v54 = vpop.f32.mrf.mxu3  ;;  %4063 = vmatmul.bf16.vlgmr.msra.gmra.mxu1 %v9386_v41  ;;  %v6260_v42 = vor.u32 %v8031_v36, %v6257_v37  ;;  %v7951_v48 = vld [vmem:[%s12773_s4 + $0x104] sm:$0xf]  ;;  %v9561_v36 = vperm.slane %v9289_v46, 7 }
 0x144   : > { %v815_v57 = vadd.f32 %v814_v54, %v9364_v25  ;;  %4120 = vmatmul.bf16.vlgmr.msrb.gmra.mxu0 %v9395_v47  ;;  %v779_v58 = vpop.f32.mrf.mxu1  ;;  %4207 = vmatpush.bf16.msra.mxu1 %v6036_v55  ;;  %v5940_v51 = vor.u32 %v7951_v48, %v5937_v49  ;;  %v7935_v28 = vld [vmem:[%s12773_s4 + $0x84] sm:$0xf] }
 0x145   : > { %v926_v2 = vmax.f32 %v796_v53, 0.0  ;;  %v836_v3 = vpop.f32.mrf.mxu0  ;;  %4264 = vmatpush.bf16.msrb.mxu0 %v6804_v60  ;;  %v780_v29 = vadd.f32 %v779_v58, %v9313_v59  ;;  %v8007_v38 = vld [vmem:[%s12773_s4 + $0x2c4] sm:$0xf] }
 0x146   : > { %v927_v7 = vmax.f32 %v815_v57, 0.0  ;;  %v837_v33 = vadd.f32 %v836_v3, %v9319_v62  ;;  %v6225_v57 = vld [vmem:[%s12773_s4 + $0x360] sm:$0xf0] }
 0x147   : > { %v9431_v11 = vpack.c.bf16 %v926_v2, %v918_v1  ;;  %v6228_v61 = vor.u32 %v8023_v56, %v6225_v57  ;;  %v6417_v43 = vld [vmem:[%s12773_s4 + $0x4e0] sm:$0xf0] }
 0x148   : > { %v9439_v15 = vpack.c.bf16 %v927_v7, %v919_v6  ;;  %4208 = vmatpush.bf16.msra.mxu1 %v6004_v12  ;;  %v936_v53 = vmax.f32 %v837_v33, 0.0  ;;  %v5905_v6 = vld [vmem:[%s12773_s4 + $0xe0] sm:$0xf0] }
 0x149   : > { %4082 = vmatmul.bf16.vlgmr.msra.gmra.mxu2 %v9431_v11  ;;  %4265 = vmatpush.bf16.msrb.mxu0 %v6772_v16  ;;  %v8135_v7 = vld [vmem:[%s12773_s4 + $0x6c4] sm:$0xf]  ;;  %v5908_v10 = vor.u32 %v7943_v5, %v5905_v6 }
 0x14a   : > { %4101 = vmatmul.bf16.vlgmr.msra.gmra.mxu3 %v9439_v15  ;;  %v798_v23 = vpop.f32.mrf.mxu2  ;;  %4226 = vmatpush.bf16.msra.mxu2 %v6292_v19  ;;  %v6673_v12 = vld [vmem:[%s12773_s4 + $0x6e0] sm:$0xf0] }
 0x14b   : > { %v817_v30 = vpop.f32.mrf.mxu3  ;;  %4245 = vmatpush.bf16.msra.mxu3 %v6548_v24  ;;  %v799_v58 = vadd.f32 %v798_v23, %v9357_v20  ;;  %v6676_v16 = vor.u32 %v8135_v7, %v6673_v12  ;;  %v6449_v23 = vld [vmem:[%s12773_s4 + $0x520] sm:$0xf0] }
 0x14c   : > { %v781_v34 = vpop.f32.mrf.mxu1  ;;  %4209 = vmatpush.bf16.msra.mxu1 %v5972_v31  ;;  %v818_v1 = vadd.f32 %v817_v30, %v9364_v25  ;;  %v6452_v27 = vor.u32 %v8079_v18, %v6449_v23  ;;  %v9550_v31 = vperm.slane %v9289_v46, 4  ;;  %v8127_v33 = vld [vmem:[%s12773_s4 + $0x684] sm:$0xf] }
 0x14d   : > { %v782_v39 = vadd.f32 %v781_v34, %v9313_v59  ;;  %v838_v40 = vpop.f32.mrf.mxu0  ;;  %4266 = vmatpush.bf16.msrb.mxu0 %v6740_v35  ;;  %v933_v59 = vmax.f32 %v780_v29, 0.0  ;;  %v934_v19 = vmax.f32 %v799_v58, 0.0  ;;  %v5873_v29 = vld [vmem:[%s12773_s4 + $0xa0] sm:$0xf0] }
 0x14e   : > { %v839_v44 = vadd.f32 %v838_v40, %v9319_v62  ;;  %4227 = vmatpush.bf16.msra.mxu2 %v6260_v42  ;;  %v6705_v62 = vld [vmem:[%s12773_s4 + $0x720] sm:$0xf0]  ;;  %v935_v24 = vmax.f32 %v818_v1, 0.0  ;;  %v5876_v32 = vor.u32 %v7935_v28, %v5873_v29  ;;  %v9607_v1 = vperm.slane %v9289_v46, 5 }
 0x14f   : > { %v941_v50 = vmax.f32 %v782_v39, 0.0  ;;  %4246 = vmatpush.bf16.msra.mxu3 %v6516_v45  ;;  %v6708_v55 = vor.u32 %v8143_v52, %v6705_v62  ;;  %v6641_v34 = vld [vmem:[%s12773_s4 + $0x6a0] sm:$0xf0] }
 0x150   : > { %v944_v54 = vmax.f32 %v839_v44, 0.0  ;;  %4210 = vmatpush.bf16.msra.mxu1 %v5940_v51  ;;  %v6644_v37 = vor.u32 %v8127_v33, %v6641_v34  ;;  %v6161_v39 = vld [vmem:[%s12773_s4 + $0x2e0] sm:$0xf0] }
 0x151   : > { %v9502_v60 = vpack.c.bf16 %v941_v50, %v933_v59  ;;  %4267 = vmatpush.bf16.msrb.mxu0 %v6708_v55  ;;  %v6164_v40 = vor.u32 %v8007_v38, %v6161_v39  ;;  %v8071_v42 = vld [vmem:[%s12773_s4 + $0x4c4] sm:$0xf] }
 0x152   : > { %v9511_v2 = vpack.c.bf16 %v944_v54, %v936_v53  ;;  %v800_v3 = vpop.f32.mrf.mxu2  ;;  %4228 = vmatpush.bf16.msra.mxu2 %v6228_v61  ;;  %v6420_v45 = vor.u32 %v8071_v42, %v6417_v43  ;;  %v7927_v48 = vld [vmem:[%s12773_s4 + $0x44] sm:$0xf] }
 0x153   : > { %v801_v8 = vadd.f32 %v800_v3, %v9357_v20  ;;  %v819_v9 = vpop.f32.mrf.mxu3  ;;  %4068 = vmatmul.bf16.gmra.mxu1 %v9502_v60  ;;  %4247 = vmatpush.bf16.msra.mxu3 %v6484_v4  ;;  %v8015_v20 = vld [vmem:[%s12773_s4 + $0x304] sm:$0xf] }
 0x154   : > { %v820_v13 = vadd.f32 %v819_v9, %v9364_v25  ;;  %4125 = vmatmul.bf16.gmra.mxu0 %v9511_v2  ;;  %v850_v14 = vpop.f32.mrf.mxu1  ;;  %4211 = vmatpush.bf16.msra.mxu1 %v5908_v10  ;;  %v6196_v22 = vor.u32 %v8015_v20, %v6193_v17  ;;  %v5841_v49 = vld [vmem:[%s12773_s4 + $0x60] sm:$0xf0] }
 0x155   : > { %v942_v21 = vmax.f32 %v801_v8, 0.0  ;;  %v907_v25 = vpop.f32.mrf.mxu0  ;;  %4268 = vmatpush.bf16.msrb.mxu0 %v6676_v16  ;;  %v8119_v59 = vld [vmem:[%s12773_s4 + $0x644] sm:$0xf]  ;;  %v851_v50 = vadd.f32 %v850_v14, %v9550_v31  ;;  %v5844_v52 = vor.u32 %v7927_v48, %v5841_v49  ;;  %v9617_v8 = vperm.slane %v9289_v46, 6 }
 0x156   : > { %v943_v26 = vmax.f32 %v820_v13, 0.0  ;;  %4229 = vmatpush.bf16.msra.mxu2 %v6196_v22  ;;  %v6609_v62 = vld [vmem:[%s12773_s4 + $0x660] sm:$0xf0]  ;;  %v908_v55 = vadd.f32 %v907_v25, %v9561_v36 }
 0x157   : > { %v9547_v30 = vpack.c.bf16 %v942_v21, %v934_v19  ;;  %4248 = vmatpush.bf16.msra.mxu3 %v6452_v27  ;;  %v7999_v53 = vld [vmem:[%s12773_s4 + $0x284] sm:$0xf]  ;;  %v6612_v57 = vor.u32 %v8119_v59, %v6609_v62  ;;  %v921_v14 = vmax.f32 %v851_v50, 0.0 }
 0x158   : > { %v9558_v35 = vpack.c.bf16 %v943_v26, %v935_v24  ;;  %4212 = vmatpush.bf16.msra.mxu1 %v5876_v32  ;;  %v6129_v54 = vld [vmem:[%s12773_s4 + $0x2a0] sm:$0xf0]  ;;  %v924_v18 = vmax.f32 %v908_v55, 0.0 }
 0x159   : > { %4087 = vmatmul.bf16.gmra.mxu2 %v9547_v30  ;;  %4269 = vmatpush.bf16.msrb.mxu0 %v6644_v37  ;;  %v6132_v58 = vor.u32 %v7999_v53, %v6129_v54  ;;  %v8063_v61 = vld [vmem:[%s12773_s4 + $0x484] sm:$0xf] }
 0x15a   : > { %4106 = vmatmul.bf16.gmra.mxu3 %v9558_v35  ;;  %v869_v44 = vpop.f32.mrf.mxu2  ;;  %4230 = vmatpush.bf16.msra.mxu2 %v6164_v40  ;;  %v6385_v63 = vld [vmem:[%s12773_s4 + $0x4a0] sm:$0xf0] }
 0x15b   : > { %v888_v51 = vpop.f32.mrf.mxu3  ;;  %4249 = vmatpush.bf16.msra.mxu3 %v6420_v45  ;;  %v7919_v0 = vld [vmem:[%s12773_s4 + $0x4] sm:$0xf]  ;;  %v6388_v5 = vor.u32 %v8063_v61, %v6385_v63  ;;  %v870_v22 = vadd.f32 %v869_v44, %v9607_v1 }
 0x15c   : > { %v852_v56 = vpop.f32.mrf.mxu1  ;;  %4213 = vmatpush.bf16.msra.mxu1 %v5844_v52  ;;  %v5809_v6 = vld [vmem:[%s12773_s4 + $0x20] sm:$0xf0]  ;;  %v889_v26 = vadd.f32 %v888_v51, %v9617_v8 }
 0x15d   : > { %v853_v3 = vadd.f32 %v852_v56, %v9550_v31  ;;  %v909_v4 = vpop.f32.mrf.mxu0  ;;  %v8111_v7 = vld [vmem:[%s12773_s4 + $0x604] sm:$0xf]  ;;  %4270 = vmatpush.bf16.msrb.mxu0 %v6612_v57  ;;  %v5812_v10 = vor.u32 %v7919_v0, %v5809_v6  ;;  %v922_v49 = vmax.f32 %v870_v22, 0.0 }
 0x15e   : > { %v910_v9 = vadd.f32 %v909_v4, %v9561_v36  ;;  %v6577_v12 = vld [vmem:[%s12773_s4 + $0x620] sm:$0xf0]  ;;  %4231 = vmatpush.bf16.msra.mxu2 %v6132_v58  ;;  %v923_v53 = vmax.f32 %v889_v26, 0.0 }
 0x15f   : > { %v7991_v13 = vld [vmem:[%s12773_s4 + $0x244] sm:$0xf]  ;;  %v929_v16 = vmax.f32 %v853_v3, 0.0  ;;  %v6580_v20 = vor.u32 %v8111_v7, %v6577_v12  ;;  %4250 = vmatpush.bf16.msra.mxu3 %v6388_v5 }
 0x160   : > { %v6097_v46 = vld [vmem:[%s12773_s4 + $0x260] sm:$0xf0]  ;;  %v932_v19 = vmax.f32 %v910_v9, 0.0  ;;  %4214 = vmatpush.bf16.msra.mxu1 %v5812_v10 }
 0x161   : > { %v8055_v17 = vld [vmem:[%s12773_s4 + $0x444] sm:$0xf]  ;;  %v6100_v21 = vor.u32 %v7991_v13, %v6097_v46  ;;  %v9636_v23 = vpack.c.bf16 %v929_v16, %v921_v14  ;;  %4271 = vmatpush.bf16.msrb.mxu0 %v6580_v20 }
 0x162   : > { %v6353_v25 = vld [vmem:[%s12773_s4 + $0x460] sm:$0xf0]  ;;  %v9639_v27 = vpack.c.bf16 %v932_v19, %v924_v18  ;;  %v871_v28 = vpop.f32.mrf.mxu2 }
 0x163   : > { %v6356_v24 = vor.u32 %v8055_v17, %v6353_v25  ;;  %v8231_v29 = vld [vmem:[%s12773_s4 + $0x9c4] sm:$0xf]  ;;  %v872_v34 = vadd.f32 %v871_v28, %v9607_v1  ;;  %v890_v37 = vpop.f32.mrf.mxu3  ;;  %4139 = vmatmul.bf16.vlgmr.msrb.gmra.mxu1 %v9636_v23  ;;  %4232 = vmatpush.bf16.msra.mxu2 %v6100_v21 }
 0x164   : > { %v7057_v32 = vld [vmem:[%s12773_s4 + $0x9e0] sm:$0xf0]  ;;  %v891_v40 = vadd.f32 %v890_v37, %v9617_v8  ;;  %4196 = vmatmul.bf16.vlgmr.msra.gmra.mxu0 %v9639_v27  ;;  %v855_v42 = vpop.f32.mrf.mxu1 }
 0x165   : > { %v8423_v33 = vld [vmem:[%s12773_s4 + $0xfc4] sm:$0xf]  ;;  %v7060_v38 = vor.u32 %v8231_v29, %v7057_v32  ;;  %4251 = vmatpush.bf16.msra.mxu3 %v6356_v24  ;;  %v930_v59 = vmax.f32 %v872_v34, 0.0  ;;  %v912_v50 = vpop.f32.mrf.mxu0  ;;  %v856_v20 = vadd.f32 %v855_v42, %v9550_v31 }
 0x166   : > { %v7825_v39 = vld [vmem:[%s12773_s4 + $0xfe0] sm:$0xf0]  ;;  %v931_v54 = vmax.f32 %v891_v40, 0.0  ;;  %v913_v25 = vadd.f32 %v912_v50, %v9561_v36 }
 0x167   : > { %v7828_v43 = vor.u32 %v8423_v33, %v7825_v39  ;;  %v7983_v44 = vld [vmem:[%s12773_s4 + $0x204] sm:$0xf]  ;;  %4283 = vmatpush.bf16.msrb.mxu1 %v7060_v38  ;;  %v9678_v58 = vpack.c.bf16 %v930_v59, %v922_v49 }
 0x168   : > { %v6065_v45 = vld [vmem:[%s12773_s4 + $0x220] sm:$0xf0]  ;;  %v9683_v0 = vpack.c.bf16 %v931_v54, %v923_v53  ;;  %v940_v59 = vmax.f32 %v913_v25, 0.0 }
 0x169   : > { %v8047_v48 = vld [vmem:[%s12773_s4 + $0x404] sm:$0xf]  ;;  %v6068_v51 = vor.u32 %v7983_v44, %v6065_v45  ;;  %4340 = vmatpush.bf16.msra.mxu0 %v7828_v43  ;;  %4158 = vmatmul.bf16.vlgmr.msrb.gmra.mxu2 %v9678_v58  ;;  %v937_v44 = vmax.f32 %v856_v20, 0.0 }
 0x16a   : > { %v6321_v52 = vld [vmem:[%s12773_s4 + $0x420] sm:$0xf0]  ;;  %4177 = vmatmul.bf16.vlgmr.msrb.gmra.mxu3 %v9683_v0  ;;  %v874_v10 = vpop.f32.mrf.mxu2 }
 0x16b   : > { %v8223_v62 = vld [vmem:[%s12773_s4 + $0x984] sm:$0xf]  ;;  %v6324_v55 = vor.u32 %v8047_v48, %v6321_v52  ;;  %4233 = vmatpush.bf16.msra.mxu2 %v6068_v51  ;;  %v893_v46 = vpop.f32.mrf.mxu3 }
 0x16c   : > { %v7025_v56 = vld [vmem:[%s12773_s4 + $0x9a0] sm:$0xf0]  ;;  %v857_v22 = vpop.f32.mrf.mxu1 }
 0x16d   : > { %v8415_v57 = vld [vmem:[%s12773_s4 + $0xf84] sm:$0xf]  ;;  %v7028_v61 = vor.u32 %v8223_v62, %v7025_v56  ;;  %4252 = vmatpush.bf16.msra.mxu3 %v6324_v55  ;;  %v858_v33 = vadd.f32 %v857_v22, %v9550_v31  ;;  %v914_v34 = vpop.f32.mrf.mxu0  ;;  %v875_v62 = vadd.f32 %v874_v10, %v9607_v1  ;;  %v894_v55 = vadd.f32 %v893_v46, %v9617_v8 }
 0x16e   : > { %v7793_v63 = vld [vmem:[%s12773_s4 + $0xfa0] sm:$0xf0]  ;;  %v915_v40 = vadd.f32 %v914_v34, %v9561_v36 }
 0x16f   : > { %v7796_v3 = vor.u32 %v8415_v57, %v7793_v63  ;;  %v8295_v4 = vld [vmem:[%s12773_s4 + $0xbc4] sm:$0xf]  ;;  %4284 = vmatpush.bf16.msrb.mxu1 %v7028_v61  ;;  %v945_v45 = vmax.f32 %v858_v33, 0.0 }
 0x170   : > { %v7313_v5 = vld [vmem:[%s12773_s4 + $0xbe0] sm:$0xf0]  ;;  %v948_v50 = vmax.f32 %v915_v40, 0.0 }
 0x171   : > { %v7316_v6 = vor.u32 %v8295_v4, %v7313_v5  ;;  %v8359_v7 = vld [vmem:[%s12773_s4 + $0xdc4] sm:$0xf]  ;;  %4341 = vmatpush.bf16.msra.mxu0 %v7796_v3  ;;  %v9752_v53 = vpack.c.bf16 %v945_v45, %v937_v44 }
 0x172   : > { %v7569_v9 = vld [vmem:[%s12773_s4 + $0xde0] sm:$0xf0]  ;;  %v9755_v56 = vpack.c.bf16 %v948_v50, %v940_v59  ;;  %v876_v57 = vpop.f32.mrf.mxu2 }
 0x173   : > { %v7572_v12 = vor.u32 %v8359_v7, %v7569_v9  ;;  %v8215_v13 = vld [vmem:[%s12773_s4 + $0x944] sm:$0xf]  ;;  %4302 = vmatpush.bf16.msrb.mxu2 %v7316_v6  ;;  %v877_v4 = vadd.f32 %v876_v57, %v9607_v1  ;;  %v895_v5 = vpop.f32.mrf.mxu3  ;;  %4144 = vmatmul.bf16.gmra.mxu1 %v9752_v53 }
 0x174   : > { %v6993_v14 = vld [vmem:[%s12773_s4 + $0x960] sm:$0xf0]  ;;  %v896_v9 = vadd.f32 %v895_v5, %v9617_v8  ;;  %4201 = vmatmul.bf16.gmra.mxu0 %v9755_v56 }
 0x175   : > { %v8407_v16 = vld [vmem:[%s12773_s4 + $0xf44] sm:$0xf]  ;;  %v6996_v17 = vor.u32 %v8215_v13, %v6993_v14  ;;  %4321 = vmatpush.bf16.msrb.mxu3 %v7572_v12  ;;  %v938_v14 = vmax.f32 %v875_v62, 0.0 }
 0x176   : > { %v7761_v18 = vld [vmem:[%s12773_s4 + $0xf60] sm:$0xf0] }
 0x177   : > { %v8287_v19 = vld [vmem:[%s12773_s4 + $0xb84] sm:$0xf]  ;;  %v7764_v24 = vor.u32 %v8407_v16, %v7761_v18  ;;  %4285 = vmatpush.bf16.msrb.mxu1 %v6996_v17  ;;  %v946_v16 = vmax.f32 %v877_v4, 0.0  ;;  %v939_v17 = vmax.f32 %v894_v55, 0.0  ;;  %v947_v18 = vmax.f32 %v896_v9, 0.0 }
 0x178   : > { %v7281_v21 = vld [vmem:[%s12773_s4 + $0xba0] sm:$0xf0]  ;;  %v6039_v9 = vld [vmem:[%s12773_s4 + $0x1c8] sm:$0xf] }
 0x179   : > { %v7284_v26 = vor.u32 %v8287_v19, %v7281_v21  ;;  %v8351_v28 = vld [vmem:[%s12773_s4 + $0xd84] sm:$0xf]  ;;  %4342 = vmatpush.bf16.msra.mxu0 %v7764_v24  ;;  %v9794_v22 = vpack.c.bf16 %v946_v16, %v938_v14 }
 0x17a   : > { %v7537_v29 = vld [vmem:[%s12773_s4 + $0xda0] sm:$0xf0] }
 0x17b   : > { %v8207_v32 = vld [vmem:[%s12773_s4 + $0x904] sm:$0xf]  ;;  %v7540_v37 = vor.u32 %v8351_v28, %v7537_v29  ;;  %4303 = vmatpush.bf16.msrb.mxu2 %v7284_v26  ;;  %v9799_v28 = vpack.c.bf16 %v947_v18, %v939_v17  ;;  %v6007_v18 = vld [vmem:[%s12773_s4 + $0x188] sm:$0xf] }
 0x17c   : > { %v6961_v38 = vld [vmem:[%s12773_s4 + $0x920] sm:$0xf0]  ;;  %4163 = vmatmul.bf16.gmra.mxu2 %v9794_v22 }
 0x17d   : > { %v8399_v39 = vld [vmem:[%s12773_s4 + $0xf04] sm:$0xf]  ;;  %v6964_v42 = vor.u32 %v8207_v32, %v6961_v38  ;;  %4322 = vmatpush.bf16.msrb.mxu3 %v7540_v37 }
 0x17e   : > { %v7729_v43 = vld [vmem:[%s12773_s4 + $0xf20] sm:$0xf0]  ;;  %4182 = vmatmul.bf16.gmra.mxu3 %v9799_v28 }
 0x17f   : > { %v8279_v31 = vld [vmem:[%s12773_s4 + $0xb44] sm:$0xf]  ;;  %v7732_v48 = vor.u32 %v8399_v39, %v7729_v43  ;;  %4286 = vmatpush.bf16.msrb.mxu1 %v6964_v42 }
 0x180   : > { %v7249_v49 = vld [vmem:[%s12773_s4 + $0xb60] sm:$0xf0] }
 0x181   : > { %v8343_v36 = vld [vmem:[%s12773_s4 + $0xd44] sm:$0xf]  ;;  %v7252_v51 = vor.u32 %v8279_v31, %v7249_v49  ;;  %4343 = vmatpush.bf16.msra.mxu0 %v7732_v48 }
 0x182   : > { %v7505_v52 = vld [vmem:[%s12773_s4 + $0xd60] sm:$0xf0] }
 0x183   : > { %v7508_v54 = vor.u32 %v8343_v36, %v7505_v52  ;;  %v8199_v61 = vld [vmem:[%s12773_s4 + $0x8c4] sm:$0xf]  ;;  %4304 = vmatpush.bf16.msrb.mxu2 %v7252_v51  ;;  %4215 = vmatmul.bf16.vlgmr.msra.gmra.mxu1 %v9386_v41 }
 0x184   : > { %v6929_v63 = vld [vmem:[%s12773_s4 + $0x8e0] sm:$0xf0]  ;;  %4272 = vmatmul.bf16.vlgmr.msrb.gmra.mxu0 %v9395_v47 }
 0x185   : > { %v8391_v3 = vld [vmem:[%s12773_s4 + $0xec4] sm:$0xf]  ;;  %v6932_v6 = vor.u32 %v8199_v61, %v6929_v63  ;;  %4323 = vmatpush.bf16.msrb.mxu3 %v7508_v54 }
 0x186   : > { %v7697_v7 = vld [vmem:[%s12773_s4 + $0xee0] sm:$0xf0] }
 0x187   : > { %v7700_v10 = vor.u32 %v8391_v3, %v7697_v7  ;;  %v8271_v12 = vld [vmem:[%s12773_s4 + $0xb04] sm:$0xf]  ;;  %4287 = vmatpush.bf16.msrb.mxu1 %v6932_v6 }
 0x188   : > { %v7217_v1 = vld [vmem:[%s12773_s4 + $0xb20] sm:$0xf0] }
 0x189   : > { %v8335_v13 = vld [vmem:[%s12773_s4 + $0xd04] sm:$0xf]  ;;  %v7220_v8 = vor.u32 %v8271_v12, %v7217_v1  ;;  %4344 = vmatpush.bf16.msra.mxu0 %v7700_v10  ;;  %v7980_v10 = vld [vmem:[%s12773_s4 + $0x1e4] sm:$0xf0] }
 0x18a   : > { %v7473_v20 = vld [vmem:[%s12773_s4 + $0xd20] sm:$0xf0]  ;;  %v6807_v12 = vld [vmem:[%s12773_s4 + $0x7c8] sm:$0xf]  ;;  %v6040_v1 = vor.u32 %v7980_v10, %v6039_v9 }
 0x18b   : > { %v8191_v46 = vld [vmem:[%s12773_s4 + $0x884] sm:$0xf]  ;;  %v7476_v19 = vor.u32 %v8335_v13, %v7473_v20  ;;  %4305 = vmatpush.bf16.msrb.mxu2 %v7220_v8  ;;  %v8172_v13 = vld [vmem:[%s12773_s4 + $0x7e4] sm:$0xf0] }
 0x18c   : > { %v6897_v21 = vld [vmem:[%s12773_s4 + $0x8a0] sm:$0xf0]  ;;  %v6808_v14 = vor.u32 %v8172_v13, %v6807_v12  ;;  %4234 = vmatmul.bf16.vlgmr.msra.gmra.mxu2 %v9431_v11  ;;  %v5911_v9 = vld [vmem:[%s12773_s4 + $0xc8] sm:$0xf] }
 0x18d   : > { %v8383_v25 = vld [vmem:[%s12773_s4 + $0xe84] sm:$0xf]  ;;  %v6900_v24 = vor.u32 %v8191_v46, %v6897_v21  ;;  %4324 = vmatpush.bf16.msrb.mxu3 %v7476_v19  ;;  %v7972_v19 = vld [vmem:[%s12773_s4 + $0x1a4] sm:$0xf0] }
 0x18e   : > { %v7665_v26 = vld [vmem:[%s12773_s4 + $0xea0] sm:$0xf0]  ;;  %4253 = vmatmul.bf16.vlgmr.msra.gmra.mxu3 %v9439_v15  ;;  %v7948_v10 = vld [vmem:[%s12773_s4 + $0xe4] sm:$0xf0] }
 0x18f   : > { %v7668_v29 = vor.u32 %v8383_v25, %v7665_v26  ;;  %v8263_v32 = vld [vmem:[%s12773_s4 + $0xac4] sm:$0xf]  ;;  %4288 = vmatpush.bf16.msrb.mxu1 %v6900_v24  ;;  %v6008_v25 = vor.u32 %v7972_v19, %v6007_v18  ;;  %v6775_v24 = vld [vmem:[%s12773_s4 + $0x788] sm:$0xf] }
 0x190   : > { %v7185_v33 = vld [vmem:[%s12773_s4 + $0xae0] sm:$0xf0]  ;;  %v8164_v26 = vld [vmem:[%s12773_s4 + $0x7a4] sm:$0xf0] }
 0x191   : > { %v8327_v34 = vld [vmem:[%s12773_s4 + $0xcc4] sm:$0xf]  ;;  %v7188_v37 = vor.u32 %v8263_v32, %v7185_v33  ;;  %4345 = vmatpush.bf16.msra.mxu0 %v7668_v29  ;;  %v6776_v29 = vor.u32 %v8164_v26, %v6775_v24  ;;  %v6295_v32 = vld [vmem:[%s12773_s4 + $0x3c8] sm:$0xf] }
 0x192   : > { %v7441_v38 = vld [vmem:[%s12773_s4 + $0xce0] sm:$0xf0]  ;;  %v8044_v33 = vld [vmem:[%s12773_s4 + $0x3e4] sm:$0xf0] }
 0x193   : > { %v7444_v39 = vor.u32 %v8327_v34, %v7441_v38  ;;  %v8183_v40 = vld [vmem:[%s12773_s4 + $0x844] sm:$0xf]  ;;  %4306 = vmatpush.bf16.msrb.mxu2 %v7188_v37  ;;  %v6551_v34 = vld [vmem:[%s12773_s4 + $0x5c8] sm:$0xf]  ;;  %v6296_v37 = vor.u32 %v8044_v33, %v6295_v32  ;;  %4220 = vmatmul.bf16.gmra.mxu1 %v9502_v60 }
 0x194   : > { %v6865_v42 = vld [vmem:[%s12773_s4 + $0x860] sm:$0xf0]  ;;  %v8108_v38 = vld [vmem:[%s12773_s4 + $0x5e4] sm:$0xf0]  ;;  %4277 = vmatmul.bf16.gmra.mxu0 %v9511_v2 }
 0x195   : > { %v8375_v43 = vld [vmem:[%s12773_s4 + $0xe44] sm:$0xf]  ;;  %v6868_v31 = vor.u32 %v8183_v40, %v6865_v42  ;;  %4325 = vmatpush.bf16.msrb.mxu3 %v7444_v39  ;;  %v6552_v39 = vor.u32 %v8108_v38, %v6551_v34  ;;  %v5975_v40 = vld [vmem:[%s12773_s4 + $0x148] sm:$0xf] }
 0x196   : > { %v7633_v44 = vld [vmem:[%s12773_s4 + $0xe60] sm:$0xf0]  ;;  %v7964_v42 = vld [vmem:[%s12773_s4 + $0x164] sm:$0xf0] }
 0x197   : > { %v8255_v45 = vld [vmem:[%s12773_s4 + $0xa84] sm:$0xf]  ;;  %v7636_v49 = vor.u32 %v8375_v43, %v7633_v44  ;;  %4289 = vmatpush.bf16.msrb.mxu1 %v6868_v31  ;;  %v6743_v43 = vld [vmem:[%s12773_s4 + $0x748] sm:$0xf]  ;;  %v5976_v31 = vor.u32 %v7964_v42, %v5975_v40 }
 0x198   : > { %v7153_v48 = vld [vmem:[%s12773_s4 + $0xaa0] sm:$0xf0]  ;;  %v8156_v44 = vld [vmem:[%s12773_s4 + $0x764] sm:$0xf0] }
 0x199   : > { %v7156_v36 = vor.u32 %v8255_v45, %v7153_v48  ;;  %v8319_v59 = vld [vmem:[%s12773_s4 + $0xc84] sm:$0xf]  ;;  %4346 = vmatpush.bf16.msra.mxu0 %v7636_v49  ;;  %v6263_v45 = vld [vmem:[%s12773_s4 + $0x388] sm:$0xf]  ;;  %v6744_v49 = vor.u32 %v8156_v44, %v6743_v43 }
 0x19a   : > { %v7409_v50 = vld [vmem:[%s12773_s4 + $0xca0] sm:$0xf0]  ;;  %v8036_v48 = vld [vmem:[%s12773_s4 + $0x3a4] sm:$0xf0] }
 0x19b   : > { %v8175_v51 = vld [vmem:[%s12773_s4 + $0x804] sm:$0xf]  ;;  %v7412_v52 = vor.u32 %v8319_v59, %v7409_v50  ;;  %4307 = vmatpush.bf16.msrb.mxu2 %v7156_v36  ;;  %v6264_v36 = vor.u32 %v8036_v48, %v6263_v45  ;;  %v6519_v59 = vld [vmem:[%s12773_s4 + $0x588] sm:$0xf] }
 0x19c   : > { %v6833_v62 = vld [vmem:[%s12773_s4 + $0x820] sm:$0xf0]  ;;  %v8100_v50 = vld [vmem:[%s12773_s4 + $0x5a4] sm:$0xf0]  ;;  %4239 = vmatmul.bf16.gmra.mxu2 %v9547_v30 }
 0x19d   : > { %v8367_v54 = vld [vmem:[%s12773_s4 + $0xe04] sm:$0xf]  ;;  %v6836_v57 = vor.u32 %v8175_v51, %v6833_v62  ;;  %4326 = vmatpush.bf16.msrb.mxu3 %v7412_v52  ;;  %v5943_v51 = vld [vmem:[%s12773_s4 + $0x108] sm:$0xf]  ;;  %v6520_v52 = vor.u32 %v8100_v50, %v6519_v59 }
 0x19e   : > { %v7601_v55 = vld [vmem:[%s12773_s4 + $0xe20] sm:$0xf0]  ;;  %v7956_v62 = vld [vmem:[%s12773_s4 + $0x124] sm:$0xf0]  ;;  %4258 = vmatmul.bf16.gmra.mxu3 %v9558_v35 }
 0x19f   : > { %v7604_v61 = vor.u32 %v8367_v54, %v7601_v55  ;;  %v8247_v63 = vld [vmem:[%s12773_s4 + $0xa44] sm:$0xf]  ;;  %4290 = vmatpush.bf16.msrb.mxu1 %v6836_v57  ;;  %v6711_v54 = vld [vmem:[%s12773_s4 + $0x708] sm:$0xf]  ;;  %v5944_v57 = vor.u32 %v7956_v62, %v5943_v51 }
 0x1a0   : > { %v7121_v3 = vld [vmem:[%s12773_s4 + $0xa60] sm:$0xf0]  ;;  %v8148_v55 = vld [vmem:[%s12773_s4 + $0x724] sm:$0xf0] }
 0x1a1   : > { %v8311_v4 = vld [vmem:[%s12773_s4 + $0xc44] sm:$0xf]  ;;  %v7124_v5 = vor.u32 %v8247_v63, %v7121_v3  ;;  %4347 = vmatpush.bf16.msra.mxu0 %v7604_v61  ;;  %v6712_v61 = vor.u32 %v8148_v55, %v6711_v54  ;;  %v6231_v63 = vld [vmem:[%s12773_s4 + $0x348] sm:$0xf] }
 0x1a2   : > { %v7377_v6 = vld [vmem:[%s12773_s4 + $0xc60] sm:$0xf0]  ;;  %v8028_v3 = vld [vmem:[%s12773_s4 + $0x364] sm:$0xf0] }
 0x1a3   : > { %v7380_v7 = vor.u32 %v8311_v4, %v7377_v6  ;;  %4308 = vmatpush.bf16.msrb.mxu2 %v7124_v5  ;;  %v8239_v16 = vld [vmem:[%s12773_s4 + $0xa04] sm:$0xf]  ;;  %4359 = vmatpush.bf16.msra.mxu1 %v6040_v1  ;;  %v6487_v4 = vld [vmem:[%s12773_s4 + $0x548] sm:$0xf]  ;;  %v6232_v5 = vor.u32 %v8028_v3, %v6231_v63  ;;  %v5912_v1 = vor.u32 %v7948_v10, %v5911_v9 }
 0x1a4   : > { %v7089_v8 = vld [vmem:[%s12773_s4 + $0xa20] sm:$0xf0]  ;;  %v8092_v6 = vld [vmem:[%s12773_s4 + $0x564] sm:$0xf0]  ;;  %4291 = vmatmul.bf16.vlgmr.msrb.gmra.mxu1 %v9636_v23  ;;  %4348 = vmatmul.bf16.vlgmr.msra.gmra.mxu0 %v9639_v27 }
 0x1a5   : > { %4327 = vmatpush.bf16.msrb.mxu3 %v7380_v7  ;;  %v8303_v20 = vld [vmem:[%s12773_s4 + $0xc04] sm:$0xf]  ;;  %v7092_v46 = vor.u32 %v8239_v16, %v7089_v8  ;;  %4416 = vmatpush.bf16.msrb.mxu0 %v6808_v14  ;;  %v6488_v7 = vor.u32 %v8092_v6, %v6487_v4  ;;  %v6679_v12 = vld [vmem:[%s12773_s4 + $0x6c8] sm:$0xf] }
 0x1a6   : > { %v7345_v17 = vld [vmem:[%s12773_s4 + $0xc20] sm:$0xf0]  ;;  %v8140_v13 = vld [vmem:[%s12773_s4 + $0x6e4] sm:$0xf0] }
 0x1a7   : > { %v7348_v21 = vor.u32 %v8303_v20, %v7345_v17  ;;  %4309 = vmatpush.bf16.msrb.mxu2 %v7092_v46  ;;  %4360 = vmatpush.bf16.msra.mxu1 %v6008_v25  ;;  %v6680_v14 = vor.u32 %v8140_v13, %v6679_v12  ;;  %v6199_v16 = vld [vmem:[%s12773_s4 + $0x308] sm:$0xf] }
 0x1a8   : > { %v8020_v8 = vld [vmem:[%s12773_s4 + $0x324] sm:$0xf0] }
 0x1a9   : > { %4328 = vmatpush.bf16.msrb.mxu3 %v7348_v21  ;;  %4417 = vmatpush.bf16.msrb.mxu0 %v6776_v29  ;;  %v6455_v20 = vld [vmem:[%s12773_s4 + $0x508] sm:$0xf]  ;;  %v6200_v46 = vor.u32 %v8020_v8, %v6199_v16 }
 0x1aa   : > { %v8084_v17 = vld [vmem:[%s12773_s4 + $0x524] sm:$0xf0] }
 0x1ab   : > { %4378 = vmatpush.bf16.msra.mxu2 %v6296_v37  ;;  %4361 = vmatpush.bf16.msra.mxu1 %v5976_v31  ;;  %v5879_v18 = vld [vmem:[%s12773_s4 + $0x88] sm:$0xf]  ;;  %v6456_v21 = vor.u32 %v8084_v17, %v6455_v20 }
 0x1ac   : > { %v7940_v19 = vld [vmem:[%s12773_s4 + $0xa4] sm:$0xf0]  ;;  %4310 = vmatmul.bf16.vlgmr.msrb.gmra.mxu2 %v9678_v58 }
 0x1ad   : > { %4397 = vmatpush.bf16.msra.mxu3 %v6552_v39  ;;  %4418 = vmatpush.bf16.msrb.mxu0 %v6744_v49  ;;  %v5880_v25 = vor.u32 %v7940_v19, %v5879_v18  ;;  %v6647_v24 = vld [vmem:[%s12773_s4 + $0x688] sm:$0xf] }
 0x1ae   : > { %v8132_v26 = vld [vmem:[%s12773_s4 + $0x6a4] sm:$0xf0]  ;;  %4329 = vmatmul.bf16.vlgmr.msrb.gmra.mxu3 %v9683_v0 }
 0x1af   : > { %4379 = vmatpush.bf16.msra.mxu2 %v6264_v36  ;;  %4362 = vmatpush.bf16.msra.mxu1 %v5944_v57  ;;  %v6648_v29 = vor.u32 %v8132_v26, %v6647_v24  ;;  %v6167_v32 = vld [vmem:[%s12773_s4 + $0x2c8] sm:$0xf] }
 0x1b0   : > { %v8012_v33 = vld [vmem:[%s12773_s4 + $0x2e4] sm:$0xf0] }
 0x1b1   : > { %4398 = vmatpush.bf16.msra.mxu3 %v6520_v52  ;;  %4419 = vmatpush.bf16.msrb.mxu0 %v6712_v61  ;;  %v6423_v34 = vld [vmem:[%s12773_s4 + $0x4c8] sm:$0xf]  ;;  %v6168_v37 = vor.u32 %v8012_v33, %v6167_v32 }
 0x1b2   : > { %v8076_v38 = vld [vmem:[%s12773_s4 + $0x4e4] sm:$0xf0] }
 0x1b3   : > { %4380 = vmatpush.bf16.msra.mxu2 %v6232_v5  ;;  %4363 = vmatpush.bf16.msra.mxu1 %v5912_v1  ;;  %v6424_v39 = vor.u32 %v8076_v38, %v6423_v34  ;;  %v5847_v40 = vld [vmem:[%s12773_s4 + $0x48] sm:$0xf] }
 0x1b4   : > { %v7932_v42 = vld [vmem:[%s12773_s4 + $0x64] sm:$0xf0]  ;;  %4296 = vmatmul.bf16.gmra.mxu1 %v9752_v53  ;;  %4353 = vmatmul.bf16.gmra.mxu0 %v9755_v56 }
 0x1b5   : > { %4399 = vmatpush.bf16.msra.mxu3 %v6488_v7  ;;  %4420 = vmatpush.bf16.msrb.mxu0 %v6680_v14  ;;  %v6615_v43 = vld [vmem:[%s12773_s4 + $0x648] sm:$0xf]  ;;  %v5848_v31 = vor.u32 %v7932_v42, %v5847_v40 }
 0x1b6   : > { %v8124_v44 = vld [vmem:[%s12773_s4 + $0x664] sm:$0xf0] }
 0x1b7   : > { %4381 = vmatpush.bf16.msra.mxu2 %v6200_v46  ;;  %4364 = vmatpush.bf16.msra.mxu1 %v5880_v25  ;;  %v6135_v45 = vld [vmem:[%s12773_s4 + $0x288] sm:$0xf]  ;;  %v6616_v49 = vor.u32 %v8124_v44, %v6615_v43 }
 0x1b8   : > { %v8004_v48 = vld [vmem:[%s12773_s4 + $0x2a4] sm:$0xf0] }
 0x1b9   : > { %4400 = vmatpush.bf16.msra.mxu3 %v6456_v21  ;;  %4421 = vmatpush.bf16.msrb.mxu0 %v6648_v29  ;;  %v6136_v36 = vor.u32 %v8004_v48, %v6135_v45  ;;  %v6391_v59 = vld [vmem:[%s12773_s4 + $0x488] sm:$0xf] }
 0x1ba   : > { %v8068_v50 = vld [vmem:[%s12773_s4 + $0x4a4] sm:$0xf0] }
 0x1bb   : > { %4382 = vmatpush.bf16.msra.mxu2 %v6168_v37  ;;  %v5815_v51 = vld [vmem:[%s12773_s4 + $0x8] sm:$0xf]  ;;  %4365 = vmatpush.bf16.msra.mxu1 %v5848_v31  ;;  %v6392_v52 = vor.u32 %v8068_v50, %v6391_v59 }
 0x1bc   : > { %v7924_v62 = vld [vmem:[%s12773_s4 + $0x24] sm:$0xf0]  ;;  %4315 = vmatmul.bf16.gmra.mxu2 %v9794_v22 }
 0x1bd   : > { %4401 = vmatpush.bf16.msra.mxu3 %v6424_v39  ;;  %4422 = vmatpush.bf16.msrb.mxu0 %v6616_v49  ;;  %v5816_v54 = vor.u32 %v7924_v62, %v5815_v51  ;;  %v6583_v55 = vld [vmem:[%s12773_s4 + $0x608] sm:$0xf] }
 0x1be   : > { %v8116_v57 = vld [vmem:[%s12773_s4 + $0x624] sm:$0xf0]  ;;  %4334 = vmatmul.bf16.gmra.mxu3 %v9799_v28 }
 0x1bf   : > { %4383 = vmatpush.bf16.msra.mxu2 %v6136_v36  ;;  %v6584_v61 = vor.u32 %v8116_v57, %v6583_v55  ;;  %v6103_v63 = vld [vmem:[%s12773_s4 + $0x248] sm:$0xf]  ;;  %4366 = vmatpush.bf16.msra.mxu1 %v5816_v54 }
 0x1c0   : > { %v7996_v3 = vld [vmem:[%s12773_s4 + $0x264] sm:$0xf0] }
 0x1c1   : > { %4402 = vmatpush.bf16.msra.mxu3 %v6392_v52  ;;  %v6359_v4 = vld [vmem:[%s12773_s4 + $0x448] sm:$0xf]  ;;  %v6104_v5 = vor.u32 %v7996_v3, %v6103_v63  ;;  %4423 = vmatpush.bf16.msrb.mxu0 %v6584_v61 }
 0x1c2   : > { %v8060_v6 = vld [vmem:[%s12773_s4 + $0x464] sm:$0xf0] }
 0x1c3   : > { %v6360_v7 = vor.u32 %v8060_v6, %v6359_v4  ;;  %v7063_v9 = vld [vmem:[%s12773_s4 + $0x9c8] sm:$0xf]  ;;  %4384 = vmatpush.bf16.msra.mxu2 %v6104_v5 }
 0x1c4   : > { %v8236_v10 = vld [vmem:[%s12773_s4 + $0x9e4] sm:$0xf0]  ;;  %4367 = vmatmul.bf16.vlgmr.msra.gmra.mxu1 %v9386_v41  ;;  %4424 = vmatmul.bf16.vlgmr.msrb.gmra.mxu0 %v9395_v47 }
 0x1c5   : > { %v7831_v12 = vld [vmem:[%s12773_s4 + $0xfc8] sm:$0xf]  ;;  %v7064_v1 = vor.u32 %v8236_v10, %v7063_v9  ;;  %4403 = vmatpush.bf16.msra.mxu3 %v6360_v7 }
 0x1c6   : > { %v8428_v13 = vld [vmem:[%s12773_s4 + $0xfe4] sm:$0xf0] }
 0x1c7   : > { %v7832_v14 = vor.u32 %v8428_v13, %v7831_v12  ;;  %v6071_v16 = vld [vmem:[%s12773_s4 + $0x208] sm:$0xf]  ;;  %4435 = vmatpush.bf16.msrb.mxu1 %v7064_v1 }
 0x1c8   : > { %v7988_v8 = vld [vmem:[%s12773_s4 + $0x224] sm:$0xf0] }
 0x1c9   : > { %v6327_v20 = vld [vmem:[%s12773_s4 + $0x408] sm:$0xf]  ;;  %v6072_v46 = vor.u32 %v7988_v8, %v6071_v16  ;;  %4492 = vmatpush.bf16.msra.mxu0 %v7832_v14 }
 0x1ca   : > { %v8052_v17 = vld [vmem:[%s12773_s4 + $0x424] sm:$0xf0] }
 0x1cb   : > { %v7031_v18 = vld [vmem:[%s12773_s4 + $0x988] sm:$0xf]  ;;  %v6328_v21 = vor.u32 %v8052_v17, %v6327_v20  ;;  %4385 = vmatpush.bf16.msra.mxu2 %v6072_v46 }
 0x1cc   : > { %v8228_v19 = vld [vmem:[%s12773_s4 + $0x9a4] sm:$0xf0] }
 0x1cd   : > { %v7032_v25 = vor.u32 %v8228_v19, %v7031_v18  ;;  %v7799_v24 = vld [vmem:[%s12773_s4 + $0xf88] sm:$0xf]  ;;  %4404 = vmatpush.bf16.msra.mxu3 %v6328_v21 }
 0x1ce   : > { %v8420_v26 = vld [vmem:[%s12773_s4 + $0xfa4] sm:$0xf0]  ;;  %4386 = vmatmul.bf16.vlgmr.msra.gmra.mxu2 %v9431_v11 }
 0x1cf   : > { %v7800_v29 = vor.u32 %v8420_v26, %v7799_v24  ;;  %v7319_v32 = vld [vmem:[%s12773_s4 + $0xbc8] sm:$0xf]  ;;  %4436 = vmatpush.bf16.msrb.mxu1 %v7032_v25 }
 0x1d0   : > { %v8300_v33 = vld [vmem:[%s12773_s4 + $0xbe4] sm:$0xf0]  ;;  %4405 = vmatmul.bf16.vlgmr.msra.gmra.mxu3 %v9439_v15 }
 0x1d1   : > { %v7575_v34 = vld [vmem:[%s12773_s4 + $0xdc8] sm:$0xf]  ;;  %v7320_v37 = vor.u32 %v8300_v33, %v7319_v32  ;;  %4493 = vmatpush.bf16.msra.mxu0 %v7800_v29 }
 0x1d2   : > { %v8364_v38 = vld [vmem:[%s12773_s4 + $0xde4] sm:$0xf0] }
 0x1d3   : > { %v7576_v39 = vor.u32 %v8364_v38, %v7575_v34  ;;  %v6999_v40 = vld [vmem:[%s12773_s4 + $0x948] sm:$0xf]  ;;  %4454 = vmatpush.bf16.msrb.mxu2 %v7320_v37 }
 0x1d4   : > { %v8220_v42 = vld [vmem:[%s12773_s4 + $0x964] sm:$0xf0]  ;;  %4372 = vmatmul.bf16.gmra.mxu1 %v9502_v60  ;;  %4429 = vmatmul.bf16.gmra.mxu0 %v9511_v2 }
 0x1d5   : > { %v7767_v43 = vld [vmem:[%s12773_s4 + $0xf48] sm:$0xf]  ;;  %v7000_v31 = vor.u32 %v8220_v42, %v6999_v40  ;;  %4473 = vmatpush.bf16.msrb.mxu3 %v7576_v39 }
 0x1d6   : > { %v8412_v44 = vld [vmem:[%s12773_s4 + $0xf64] sm:$0xf0] }
 0x1d7   : > { %v7768_v45 = vor.u32 %v8412_v44, %v7767_v43  ;;  %v7287_v48 = vld [vmem:[%s12773_s4 + $0xb88] sm:$0xf]  ;;  %4437 = vmatpush.bf16.msrb.mxu1 %v7000_v31 }
 0x1d8   : > { %v8292_v49 = vld [vmem:[%s12773_s4 + $0xba4] sm:$0xf0] }
 0x1d9   : > { %v7543_v36 = vld [vmem:[%s12773_s4 + $0xd88] sm:$0xf]  ;;  %v7288_v59 = vor.u32 %v8292_v49, %v7287_v48  ;;  %4494 = vmatpush.bf16.msra.mxu0 %v7768_v45 }
 0x1da   : > { %v8356_v50 = vld [vmem:[%s12773_s4 + $0xda4] sm:$0xf0] }
 0x1db   : > { %v7544_v51 = vor.u32 %v8356_v50, %v7543_v36  ;;  %v6967_v52 = vld [vmem:[%s12773_s4 + $0x908] sm:$0xf]  ;;  %4455 = vmatpush.bf16.msrb.mxu2 %v7288_v59 }
 0x1dc   : > { %v8212_v62 = vld [vmem:[%s12773_s4 + $0x924] sm:$0xf0] }
 0x1dd   : > { %v7735_v54 = vld [vmem:[%s12773_s4 + $0xf08] sm:$0xf]  ;;  %v6968_v55 = vor.u32 %v8212_v62, %v6967_v52  ;;  %4474 = vmatpush.bf16.msrb.mxu3 %v7544_v51 }
 0x1de   : > { %v8404_v57 = vld [vmem:[%s12773_s4 + $0xf24] sm:$0xf0]  ;;  %4391 = vmatmul.bf16.gmra.mxu2 %v9547_v30 }
 0x1df   : > { %v7736_v61 = vor.u32 %v8404_v57, %v7735_v54  ;;  %v7255_v63 = vld [vmem:[%s12773_s4 + $0xb48] sm:$0xf]  ;;  %4438 = vmatpush.bf16.msrb.mxu1 %v6968_v55 }
 0x1e0   : > { %v8284_v3 = vld [vmem:[%s12773_s4 + $0xb64] sm:$0xf0]  ;;  %4410 = vmatmul.bf16.gmra.mxu3 %v9558_v35 }
 0x1e1   : > { %v7511_v4 = vld [vmem:[%s12773_s4 + $0xd48] sm:$0xf]  ;;  %v7256_v5 = vor.u32 %v8284_v3, %v7255_v63  ;;  %4495 = vmatpush.bf16.msra.mxu0 %v7736_v61  ;;  %v4064_v61 = vpop.f32.mrf.mxu1 }
 0x1e2   : > { %v8348_v6 = vld [vmem:[%s12773_s4 + $0xd64] sm:$0xf0] }
 0x1e3   : > { %v7512_v7 = vor.u32 %v8348_v6, %v7511_v4  ;;  %v6935_v9 = vld [vmem:[%s12773_s4 + $0x8c8] sm:$0xf]  ;;  %4456 = vmatpush.bf16.msrb.mxu2 %v7256_v5  ;;  %v10260_v6 = vpop.f32.mrf.mxu0 }
 0x1e4   : > { %v8204_v10 = vld [vmem:[%s12773_s4 + $0x8e4] sm:$0xf0] }
 0x1e5   : > { %v7703_v12 = vld [vmem:[%s12773_s4 + $0xec8] sm:$0xf]  ;;  %v6936_v1 = vor.u32 %v8204_v10, %v6935_v9  ;;  %4475 = vmatpush.bf16.msrb.mxu3 %v7512_v7 }
 0x1e6   : > { %v8396_v13 = vld [vmem:[%s12773_s4 + $0xee4] sm:$0xf0] }
 0x1e7   : > { %v7704_v14 = vor.u32 %v8396_v13, %v7703_v12  ;;  %v7223_v16 = vld [vmem:[%s12773_s4 + $0xb08] sm:$0xf]  ;;  %4439 = vmatpush.bf16.msrb.mxu1 %v6936_v1  ;;  %v7976_v12 = vld [vmem:[%s12773_s4 + $0x1cc] sm:$0xf] }
 0x1e8   : > { %v8276_v8 = vld [vmem:[%s12773_s4 + $0xb24] sm:$0xf0]  ;;  %v6041_v1 = vld [vmem:[%s12773_s4 + $0x1e8] sm:$0xf0] }
 0x1e9   : > { %v7479_v20 = vld [vmem:[%s12773_s4 + $0xd08] sm:$0xf]  ;;  %v7224_v46 = vor.u32 %v8276_v8, %v7223_v16  ;;  %4496 = vmatpush.bf16.msra.mxu0 %v7704_v14  ;;  %v8168_v13 = vld [vmem:[%s12773_s4 + $0x7cc] sm:$0xf]  ;;  %v10277_v14 = vld [vmem:[%s12774_s5] sm:$0xff]  ;;  %v6044_v16 = vor.u32 %v7976_v12, %v6041_v1 }
 0x1ea   : > { %v8340_v17 = vld [vmem:[%s12773_s4 + $0xd24] sm:$0xf0]  ;;  %v6809_v8 = vld [vmem:[%s12773_s4 + $0x7e8] sm:$0xf0] }
 0x1eb   : > { %v7480_v18 = vor.u32 %v8340_v17, %v7479_v20  ;;  %v6903_v19 = vld [vmem:[%s12773_s4 + $0x888] sm:$0xf]  ;;  %4457 = vmatpush.bf16.msrb.mxu2 %v7224_v46  ;;  %v6812_v20 = vor.u32 %v8168_v13, %v6809_v8  ;;  %v6713_v13 = vld [vmem:[%s12773_s4 + $0x728] sm:$0xf0] }
 0x1ec   : > { %v8196_v21 = vld [vmem:[%s12773_s4 + $0x8a4] sm:$0xf0] }
 0x1ed   : > { %v7671_v25 = vld [vmem:[%s12773_s4 + $0xe88] sm:$0xf]  ;;  %v6904_v24 = vor.u32 %v8196_v21, %v6903_v19  ;;  %4476 = vmatpush.bf16.msrb.mxu3 %v7480_v18 }
 0x1ee   : > { %v8388_v26 = vld [vmem:[%s12773_s4 + $0xea4] sm:$0xf0] }
 0x1ef   : > { %v7672_v29 = vor.u32 %v8388_v26, %v7671_v25  ;;  %v7191_v32 = vld [vmem:[%s12773_s4 + $0xac8] sm:$0xf]  ;;  %4440 = vmatpush.bf16.msrb.mxu1 %v6904_v24  ;;  %v7968_v24 = vld [vmem:[%s12773_s4 + $0x18c] sm:$0xf] }
 0x1f0   : > { %v8268_v33 = vld [vmem:[%s12773_s4 + $0xae4] sm:$0xf0]  ;;  %v6009_v26 = vld [vmem:[%s12773_s4 + $0x1a8] sm:$0xf0] }
 0x1f1   : > { %v7447_v34 = vld [vmem:[%s12773_s4 + $0xcc8] sm:$0xf]  ;;  %v7192_v37 = vor.u32 %v8268_v33, %v7191_v32  ;;  %4497 = vmatpush.bf16.msra.mxu0 %v7672_v29  ;;  %v8160_v29 = vld [vmem:[%s12773_s4 + $0x78c] sm:$0xf]  ;;  %v10306_v32 = vperm.slane %v10277_v14, 0  ;;  %v6012_v33 = vor.u32 %v7968_v24, %v6009_v26 }
 0x1f2   : > { %v8332_v38 = vld [vmem:[%s12773_s4 + $0xce4] sm:$0xf0]  ;;  %v7944_v26 = vld [vmem:[%s12773_s4 + $0xcc] sm:$0xf] }
 0x1f3   : > { %v7448_v39 = vor.u32 %v8332_v38, %v7447_v34  ;;  %v6871_v40 = vld [vmem:[%s12773_s4 + $0x848] sm:$0xf]  ;;  %4458 = vmatpush.bf16.msrb.mxu2 %v7192_v37  ;;  %v6777_v34 = vld [vmem:[%s12773_s4 + $0x7a8] sm:$0xf0]  ;;  %v4066_v37 = vpop.f32.mrf.mxu1 }
 0x1f4   : > { %v8188_v42 = vld [vmem:[%s12773_s4 + $0x864] sm:$0xf0]  ;;  %v6780_v38 = vor.u32 %v8160_v29, %v6777_v34  ;;  %v5913_v29 = vld [vmem:[%s12773_s4 + $0xe8] sm:$0xf0] }
 0x1f5   : > { %v7639_v43 = vld [vmem:[%s12773_s4 + $0xe48] sm:$0xf]  ;;  %v6872_v31 = vor.u32 %v8188_v42, %v6871_v40  ;;  %4477 = vmatpush.bf16.msrb.mxu3 %v7448_v39  ;;  %v8040_v39 = vld [vmem:[%s12773_s4 + $0x3cc] sm:$0xf]  ;;  %v5916_v34 = vor.u32 %v7944_v26, %v5913_v29 }
 0x1f6   : > { %v8380_v44 = vld [vmem:[%s12773_s4 + $0xe64] sm:$0xf0]  ;;  %v6297_v40 = vld [vmem:[%s12773_s4 + $0x3e8] sm:$0xf0] }
 0x1f7   : > { %v7640_v45 = vor.u32 %v8380_v44, %v7639_v43  ;;  %v7159_v48 = vld [vmem:[%s12773_s4 + $0xa88] sm:$0xf]  ;;  %4441 = vmatpush.bf16.msrb.mxu1 %v6872_v31  ;;  %v8104_v42 = vld [vmem:[%s12773_s4 + $0x5cc] sm:$0xf]  ;;  %v10320_v43 = vpop.f32.mrf.mxu0  ;;  %v6300_v31 = vor.u32 %v8040_v39, %v6297_v40 }
 0x1f8   : > { %v8260_v49 = vld [vmem:[%s12773_s4 + $0xaa4] sm:$0xf0]  ;;  %v6553_v44 = vld [vmem:[%s12773_s4 + $0x5e8] sm:$0xf0] }
 0x1f9   : > { %v7415_v36 = vld [vmem:[%s12773_s4 + $0xc88] sm:$0xf]  ;;  %v7160_v59 = vor.u32 %v8260_v49, %v7159_v48  ;;  %4498 = vmatpush.bf16.msra.mxu0 %v7640_v45  ;;  %v6556_v45 = vor.u32 %v8104_v42, %v6553_v44  ;;  %v7960_v48 = vld [vmem:[%s12773_s4 + $0x14c] sm:$0xf] }
 0x1fa   : > { %v8324_v50 = vld [vmem:[%s12773_s4 + $0xca4] sm:$0xf0]  ;;  %v5977_v49 = vld [vmem:[%s12773_s4 + $0x168] sm:$0xf0] }
 0x1fb   : > { %v7416_v51 = vor.u32 %v8324_v50, %v7415_v36  ;;  %v6839_v52 = vld [vmem:[%s12773_s4 + $0x808] sm:$0xf]  ;;  %4459 = vmatpush.bf16.msrb.mxu2 %v7160_v59  ;;  %v8152_v36 = vld [vmem:[%s12773_s4 + $0x74c] sm:$0xf]  ;;  %v4065_v59 = vadd.f32 %v4064_v61, %v10306_v32  ;;  %v5980_v50 = vor.u32 %v7960_v48, %v5977_v49 }
 0x1fc   : > { %v8180_v62 = vld [vmem:[%s12773_s4 + $0x824] sm:$0xf0]  ;;  %v8016_v42 = vld [vmem:[%s12773_s4 + $0x30c] sm:$0xf] }
 0x1fd   : > { %v7607_v54 = vld [vmem:[%s12773_s4 + $0xe08] sm:$0xf]  ;;  %v6840_v55 = vor.u32 %v8180_v62, %v6839_v52  ;;  %4478 = vmatpush.bf16.msrb.mxu3 %v7416_v51  ;;  %v6745_v51 = vld [vmem:[%s12773_s4 + $0x768] sm:$0xf0]  ;;  %v4083_v52 = vpop.f32.mrf.mxu2 }
 0x1fe   : > { %v8372_v57 = vld [vmem:[%s12773_s4 + $0xe24] sm:$0xf0]  ;;  %v6748_v62 = vor.u32 %v8152_v36, %v6745_v51  ;;  %v4084_v61 = vadd.f32 %v4083_v52, %v4065_v59  ;;  %v8080_v48 = vld [vmem:[%s12773_s4 + $0x50c] sm:$0xf] }
 0x1ff   : > { %v7608_v63 = vor.u32 %v8372_v57, %v7607_v54  ;;  %v7127_v3 = vld [vmem:[%s12773_s4 + $0xa48] sm:$0xf]  ;;  %4442 = vmatpush.bf16.msrb.mxu1 %v6840_v55  ;;  %v8032_v54 = vld [vmem:[%s12773_s4 + $0x38c] sm:$0xf] }
 0x200   : > { %v8252_v4 = vld [vmem:[%s12773_s4 + $0xa64] sm:$0xf0]  ;;  %v6265_v55 = vld [vmem:[%s12773_s4 + $0x3a8] sm:$0xf0] }
 0x201   : > { %v7383_v5 = vld [vmem:[%s12773_s4 + $0xc48] sm:$0xf]  ;;  %v7128_v7 = vor.u32 %v8252_v4, %v7127_v3  ;;  %4499 = vmatpush.bf16.msra.mxu0 %v7608_v63  ;;  %v8096_v57 = vld [vmem:[%s12773_s4 + $0x58c] sm:$0xf]  ;;  %v4102_v63 = vpop.f32.mrf.mxu3  ;;  %v6268_v3 = vor.u32 %v8032_v54, %v6265_v55 }
 0x202   : > { %v8316_v9 = vld [vmem:[%s12773_s4 + $0xc64] sm:$0xf0]  ;;  %v6521_v4 = vld [vmem:[%s12773_s4 + $0x5a8] sm:$0xf0]  ;;  %v4103_v12 = vadd.f32 %v4102_v63, %v4084_v61  ;;  %4443 = vmatmul.bf16.vlgmr.msrb.gmra.mxu1 %v9636_v23 }
 0x203   : > { %v7384_v10 = vor.u32 %v8316_v9, %v7383_v5  ;;  %4460 = vmatpush.bf16.msrb.mxu2 %v7128_v7  ;;  %v7095_v46 = vld [vmem:[%s12773_s4 + $0xa08] sm:$0xf]  ;;  %4511 = vmatpush.bf16.msra.mxu1 %v6044_v16  ;;  %v6524_v5 = vor.u32 %v8096_v57, %v6521_v4  ;;  %v7952_v7 = vld [vmem:[%s12773_s4 + $0x10c] sm:$0xf]  ;;  %v4069_v16 = vpop.f32.mrf.mxu1 }
 0x204   : > { %v8244_v17 = vld [vmem:[%s12773_s4 + $0xa24] sm:$0xf0]  ;;  %v5945_v9 = vld [vmem:[%s12773_s4 + $0x128] sm:$0xf0]  ;;  %4500 = vmatmul.bf16.vlgmr.msra.gmra.mxu0 %v9639_v27 }
 0x205   : > { %4479 = vmatpush.bf16.msrb.mxu3 %v7384_v10  ;;  %v7351_v18 = vld [vmem:[%s12773_s4 + $0xc08] sm:$0xf]  ;;  %v7096_v19 = vor.u32 %v8244_v17, %v7095_v46  ;;  %4568 = vmatpush.bf16.msrb.mxu0 %v6812_v20  ;;  %v8144_v10 = vld [vmem:[%s12773_s4 + $0x70c] sm:$0xf]  ;;  %v5948_v1 = vor.u32 %v7952_v7, %v5945_v9  ;;  %v4085_v39 = vpop.f32.mrf.mxu2 }
 0x206   : > { %v8308_v21 = vld [vmem:[%s12773_s4 + $0xc24] sm:$0xf0]  ;;  %v6716_v8 = vor.u32 %v8144_v10, %v6713_v13  ;;  %v8024_v20 = vld [vmem:[%s12773_s4 + $0x34c] sm:$0xf]  ;;  %v4070_v13 = vadd.f32 %v4069_v16, %v10306_v32 }
 0x207   : > { %v7352_v25 = vor.u32 %v8308_v21, %v7351_v18  ;;  %4461 = vmatpush.bf16.msrb.mxu2 %v7096_v19  ;;  %4512 = vmatpush.bf16.msra.mxu1 %v6012_v33  ;;  %v6233_v46 = vld [vmem:[%s12773_s4 + $0x368] sm:$0xf0]  ;;  %v10373_v18 = vpop.f32.mrf.mxu0  ;;  %v10376_v19 = vadd.f32 %v10260_v6, %v4103_v12  ;;  %v4067_v33 = vadd.f32 %v4066_v37, %v10306_v32 }
 0x208   : > { %v8088_v17 = vld [vmem:[%s12773_s4 + $0x54c] sm:$0xf]  ;;  %v6236_v21 = vor.u32 %v8024_v20, %v6233_v46 }
 0x209   : > { %4480 = vmatpush.bf16.msrb.mxu3 %v7352_v25  ;;  %4569 = vmatpush.bf16.msrb.mxu0 %v6780_v38  ;;  %v6489_v25 = vld [vmem:[%s12773_s4 + $0x568] sm:$0xf0]  ;;  %v4104_v44 = vpop.f32.mrf.mxu3 }
 0x20a   : > { %v6492_v24 = vor.u32 %v8088_v17, %v6489_v25  ;;  %v8136_v6 = vld [vmem:[%s12773_s4 + $0x6cc] sm:$0xf]  ;;  %4462 = vmatmul.bf16.vlgmr.msrb.gmra.mxu2 %v9678_v58 }
 0x20b   : > { %4530 = vmatpush.bf16.msra.mxu2 %v6300_v31  ;;  %4513 = vmatpush.bf16.msra.mxu1 %v5980_v50  ;;  %v6681_v38 = vld [vmem:[%s12773_s4 + $0x6e8] sm:$0xf0]  ;;  %v4086_v31 = vadd.f32 %v4085_v39, %v4067_v33  ;;  %v4071_v55 = vpop.f32.mrf.mxu1 }
 0x20c   : > { %v6684_v40 = vor.u32 %v8136_v6, %v6681_v38  ;;  %v6201_v37 = vld [vmem:[%s12773_s4 + $0x328] sm:$0xf0]  ;;  %4481 = vmatmul.bf16.vlgmr.msrb.gmra.mxu3 %v9683_v0 }
 0x20d   : > { %4549 = vmatpush.bf16.msra.mxu3 %v6556_v45  ;;  %4570 = vmatpush.bf16.msrb.mxu0 %v6748_v62  ;;  %v6204_v45 = vor.u32 %v8016_v42, %v6201_v37  ;;  %v6457_v49 = vld [vmem:[%s12773_s4 + $0x528] sm:$0xf0]  ;;  %v4105_v52 = vadd.f32 %v4104_v44, %v4086_v31  ;;  %v4088_v46 = vpop.f32.mrf.mxu2 }
 0x20e   : > { %v6460_v36 = vor.u32 %v8080_v48, %v6457_v49  ;;  %v7936_v59 = vld [vmem:[%s12773_s4 + $0x8c] sm:$0xf] }
 0x20f   : > { %4531 = vmatpush.bf16.msra.mxu2 %v6268_v3  ;;  %4514 = vmatpush.bf16.msra.mxu1 %v5948_v1  ;;  %v5881_v50 = vld [vmem:[%s12773_s4 + $0xa8] sm:$0xf0]  ;;  %v10429_v4 = vpop.f32.mrf.mxu0 }
 0x210   : > { %v8128_v51 = vld [vmem:[%s12773_s4 + $0x68c] sm:$0xf]  ;;  %v5884_v62 = vor.u32 %v7936_v59, %v5881_v50 }
 0x211   : > { %4550 = vmatpush.bf16.msra.mxu3 %v6524_v5  ;;  %4571 = vmatpush.bf16.msrb.mxu0 %v6716_v8  ;;  %v6649_v54 = vld [vmem:[%s12773_s4 + $0x6a8] sm:$0xf0]  ;;  %v10433_v5 = vadd.f32 %v10320_v43, %v4105_v52  ;;  %v4107_v26 = vpop.f32.mrf.mxu3 }
 0x212   : > { %v6652_v57 = vor.u32 %v8128_v51, %v6649_v54  ;;  %v8008_v61 = vld [vmem:[%s12773_s4 + $0x2cc] sm:$0xf]  ;;  %4448 = vmatmul.bf16.gmra.mxu1 %v9752_v53 }
 0x213   : > { %4532 = vmatpush.bf16.msra.mxu2 %v6236_v21  ;;  %4515 = vmatpush.bf16.msra.mxu1 %v5916_v34  ;;  %v6169_v63 = vld [vmem:[%s12773_s4 + $0x2e8] sm:$0xf0]  ;;  %v4140_v31 = vpop.f32.mrf.mxu1 }
 0x214   : > { %v8072_v3 = vld [vmem:[%s12773_s4 + $0x4cc] sm:$0xf]  ;;  %v6172_v7 = vor.u32 %v8008_v61, %v6169_v63  ;;  %v10483_v49 = vadd.f32 %v4140_v31, %v10376_v19  ;;  %4505 = vmatmul.bf16.gmra.mxu0 %v9755_v56 }
 0x215   : > { %4551 = vmatpush.bf16.msra.mxu3 %v6492_v24  ;;  %4572 = vmatpush.bf16.msrb.mxu0 %v6684_v40  ;;  %v6425_v9 = vld [vmem:[%s12773_s4 + $0x4e8] sm:$0xf0]  ;;  %v4089_v24 = vadd.f32 %v4088_v46, %v4070_v13 }
 0x216   : > { %v6428_v10 = vor.u32 %v8072_v3, %v6425_v9  ;;  %v7928_v12 = vld [vmem:[%s12773_s4 + $0x4c] sm:$0xf]  ;;  %v4090_v3 = vpop.f32.mrf.mxu2 }
 0x217   : > { %4533 = vmatpush.bf16.msra.mxu2 %v6204_v45  ;;  %4516 = vmatpush.bf16.msra.mxu1 %v5884_v62  ;;  %v5849_v1 = vld [vmem:[%s12773_s4 + $0x68] sm:$0xf0]  ;;  %v4108_v40 = vadd.f32 %v4107_v26, %v4089_v24 }
 0x218   : > { %v8120_v43 = vld [vmem:[%s12773_s4 + $0x64c] sm:$0xf]  ;;  %v5852_v8 = vor.u32 %v7928_v12, %v5849_v1 }
 0x219   : > { %4552 = vmatpush.bf16.msra.mxu3 %v6460_v36  ;;  %4573 = vmatpush.bf16.msrb.mxu0 %v6652_v57  ;;  %v6617_v20 = vld [vmem:[%s12773_s4 + $0x668] sm:$0xf0]  ;;  %v10485_v36 = vpop.f32.mrf.mxu0  ;;  %v10488_v59 = vadd.f32 %v10373_v18, %v4108_v40  ;;  %v4072_v57 = vadd.f32 %v4071_v55, %v10306_v32  ;;  %v4109_v12 = vpop.f32.mrf.mxu3 }
 0x21a   : > { %v6620_v17 = vor.u32 %v8120_v43, %v6617_v20  ;;  %v8000_v21 = vld [vmem:[%s12773_s4 + $0x28c] sm:$0xf]  ;;  %4467 = vmatmul.bf16.gmra.mxu2 %v9794_v22 }
 0x21b   : > { %4534 = vmatpush.bf16.msra.mxu2 %v6172_v7  ;;  %v6137_v25 = vld [vmem:[%s12773_s4 + $0x2a8] sm:$0xf0]  ;;  %4517 = vmatpush.bf16.msra.mxu1 %v5852_v8 }
 0x21c   : > { %v8064_v16 = vld [vmem:[%s12773_s4 + $0x48c] sm:$0xf]  ;;  %v6140_v29 = vor.u32 %v8000_v21, %v6137_v25  ;;  %4486 = vmatmul.bf16.gmra.mxu3 %v9799_v28 }
 0x21d   : > { %4553 = vmatpush.bf16.msra.mxu3 %v6428_v10  ;;  %v6393_v6 = vld [vmem:[%s12773_s4 + $0x4a8] sm:$0xf0]  ;;  %4574 = vmatpush.bf16.msrb.mxu0 %v6620_v17  ;;  %v4091_v10 = vadd.f32 %v4090_v3, %v4072_v57 }
 0x21e   : > { %v6396_v33 = vor.u32 %v8064_v16, %v6393_v6  ;;  %v7920_v34 = vld [vmem:[%s12773_s4 + $0xc] sm:$0xf]  ;;  %v4142_v16 = vpop.f32.mrf.mxu1 }
 0x21f   : > { %v5817_v38 = vld [vmem:[%s12773_s4 + $0x28] sm:$0xf0]  ;;  %4535 = vmatpush.bf16.msra.mxu2 %v6140_v29  ;;  %v4110_v17 = vadd.f32 %v4109_v12, %v4091_v10 }
 0x220   : > { %v8112_v39 = vld [vmem:[%s12773_s4 + $0x60c] sm:$0xf]  ;;  %v5820_v42 = vor.u32 %v7920_v34, %v5817_v38 }
 0x221   : > { %v6585_v37 = vld [vmem:[%s12773_s4 + $0x628] sm:$0xf0]  ;;  %4554 = vmatpush.bf16.msra.mxu3 %v6396_v33  ;;  %v10545_v33 = vadd.f32 %v4142_v16, %v10433_v5  ;;  %v10547_v34 = vpop.f32.mrf.mxu0  ;;  %v10551_v38 = vadd.f32 %v10429_v4, %v4110_v17 }
 0x222   : > { %v6588_v44 = vor.u32 %v8112_v39, %v6585_v37  ;;  %v7992_v45 = vld [vmem:[%s12773_s4 + $0x24c] sm:$0xf]  ;;  %4518 = vmatpush.bf16.msra.mxu1 %v5820_v42 }
 0x223   : > { %v6105_v48 = vld [vmem:[%s12773_s4 + $0x268] sm:$0xf0] }
 0x224   : > { %v6108_v50 = vor.u32 %v7992_v45, %v6105_v48  ;;  %v8056_v51 = vld [vmem:[%s12773_s4 + $0x44c] sm:$0xf]  ;;  %4575 = vmatpush.bf16.msrb.mxu0 %v6588_v44  ;;  %v4159_v45 = vpop.f32.mrf.mxu2 }
 0x225   : > { %v6361_v52 = vld [vmem:[%s12773_s4 + $0x468] sm:$0xf0]  ;;  %4519 = vmatmul.bf16.vlgmr.msra.gmra.mxu1 %v9386_v41 }
 0x226   : > { %v6364_v62 = vor.u32 %v8056_v51, %v6361_v52  ;;  %v8232_v19 = vld [vmem:[%s12773_s4 + $0x9cc] sm:$0xf]  ;;  %4536 = vmatpush.bf16.msra.mxu2 %v6108_v50 }
 0x227   : > { %v7065_v18 = vld [vmem:[%s12773_s4 + $0x9e8] sm:$0xf0]  ;;  %4576 = vmatmul.bf16.vlgmr.msrb.gmra.mxu0 %v9395_v47 }
 0x228   : > { %v8424_v54 = vld [vmem:[%s12773_s4 + $0xfcc] sm:$0xf]  ;;  %v7068_v61 = vor.u32 %v8232_v19, %v7065_v18  ;;  %4555 = vmatpush.bf16.msra.mxu3 %v6364_v62  ;;  %v4160_v62 = vadd.f32 %v4159_v45, %v10483_v49  ;;  %v4178_v19 = vpop.f32.mrf.mxu3 }
 0x229   : > { %v7833_v63 = vld [vmem:[%s12773_s4 + $0xfe8] sm:$0xf0] }
 0x22a   : > { %v7836_v7 = vor.u32 %v8424_v54, %v7833_v63  ;;  %v7984_v9 = vld [vmem:[%s12773_s4 + $0x20c] sm:$0xf]  ;;  %4587 = vmatpush.bf16.msrb.mxu1 %v7068_v61  ;;  %v4179_v3 = vadd.f32 %v4178_v19, %v4160_v62 }
 0x22b   : > { %v6073_v32 = vld [vmem:[%s12773_s4 + $0x228] sm:$0xf0] }
 0x22c   : > { %v8048_v55 = vld [vmem:[%s12773_s4 + $0x40c] sm:$0xf]  ;;  %v6076_v1 = vor.u32 %v7984_v9, %v6073_v32  ;;  %4644 = vmatpush.bf16.msra.mxu0 %v7836_v7  ;;  %v4145_v32 = vpop.f32.mrf.mxu1 }
 0x22d   : > { %v6329_v43 = vld [vmem:[%s12773_s4 + $0x428] sm:$0xf0] }
 0x22e   : > { %v6332_v13 = vor.u32 %v8048_v55, %v6329_v43  ;;  %v8224_v8 = vld [vmem:[%s12773_s4 + $0x98c] sm:$0xf]  ;;  %4537 = vmatpush.bf16.msra.mxu2 %v6076_v1  ;;  %v10604_v43 = vadd.f32 %v10485_v36, %v4179_v3 }
 0x22f   : > { %v7033_v20 = vld [vmem:[%s12773_s4 + $0x9a8] sm:$0xf0] }
 0x230   : > { %v8416_v46 = vld [vmem:[%s12773_s4 + $0xf8c] sm:$0xf]  ;;  %v7036_v21 = vor.u32 %v8224_v8, %v7033_v20  ;;  %4556 = vmatpush.bf16.msra.mxu3 %v6332_v13  ;;  %v10607_v13 = vadd.f32 %v4145_v32, %v10488_v59  ;;  %v10609_v8 = vpop.f32.mrf.mxu0 }
 0x231   : > { %v7801_v25 = vld [vmem:[%s12773_s4 + $0xfa8] sm:$0xf0]  ;;  %4538 = vmatmul.bf16.vlgmr.msra.gmra.mxu2 %v9431_v11 }
 0x232   : > { %v7804_v24 = vor.u32 %v8416_v46, %v7801_v25  ;;  %v8296_v26 = vld [vmem:[%s12773_s4 + $0xbcc] sm:$0xf]  ;;  %4588 = vmatpush.bf16.msrb.mxu1 %v7036_v21 }
 0x233   : > { %v7321_v29 = vld [vmem:[%s12773_s4 + $0xbe8] sm:$0xf0]  ;;  %4557 = vmatmul.bf16.vlgmr.msra.gmra.mxu3 %v9439_v15 }
 0x234   : > { %v8360_v6 = vld [vmem:[%s12773_s4 + $0xdcc] sm:$0xf]  ;;  %v7324_v39 = vor.u32 %v8296_v26, %v7321_v29  ;;  %4645 = vmatpush.bf16.msra.mxu0 %v7804_v24  ;;  %v4161_v24 = vpop.f32.mrf.mxu2 }
 0x235   : > { %v7577_v40 = vld [vmem:[%s12773_s4 + $0xde8] sm:$0xf0]  ;;  %4524 = vmatmul.bf16.gmra.mxu1 %v9502_v60 }
 0x236   : > { %v7580_v42 = vor.u32 %v8360_v6, %v7577_v40  ;;  %v8216_v5 = vld [vmem:[%s12773_s4 + $0x94c] sm:$0xf]  ;;  %4606 = vmatpush.bf16.msrb.mxu2 %v7324_v39  ;;  %v4162_v40 = vadd.f32 %v4161_v24, %v10545_v33 }
 0x237   : > { %v7001_v37 = vld [vmem:[%s12773_s4 + $0x968] sm:$0xf0]  ;;  %4581 = vmatmul.bf16.gmra.mxu0 %v9511_v2 }
 0x238   : > { %v8408_v4 = vld [vmem:[%s12773_s4 + $0xf4c] sm:$0xf]  ;;  %v7004_v31 = vor.u32 %v8216_v5, %v7001_v37  ;;  %4625 = vmatpush.bf16.msrb.mxu3 %v7580_v42  ;;  %v4180_v42 = vpop.f32.mrf.mxu3 }
 0x239   : > { %v7769_v44 = vld [vmem:[%s12773_s4 + $0xf68] sm:$0xf0]  ;;  %v4181_v45 = vadd.f32 %v4180_v42, %v4162_v40 }
 0x23a   : > { %v7772_v48 = vor.u32 %v8408_v4, %v7769_v44  ;;  %v8288_v50 = vld [vmem:[%s12773_s4 + $0xb8c] sm:$0xf]  ;;  %4589 = vmatpush.bf16.msrb.mxu1 %v7004_v31 }
 0x23b   : > { %v7289_v51 = vld [vmem:[%s12773_s4 + $0xba8] sm:$0xf0] }
 0x23c   : > { %v8352_v52 = vld [vmem:[%s12773_s4 + $0xd8c] sm:$0xf]  ;;  %v7292_v18 = vor.u32 %v8288_v50, %v7289_v51  ;;  %4646 = vmatpush.bf16.msra.mxu0 %v7772_v48  ;;  %v4147_v51 = vpop.f32.mrf.mxu1 }
 0x23d   : > { %v7545_v54 = vld [vmem:[%s12773_s4 + $0xda8] sm:$0xf0] }
 0x23e   : > { %v7548_v57 = vor.u32 %v8352_v52, %v7545_v54  ;;  %v8208_v61 = vld [vmem:[%s12773_s4 + $0x90c] sm:$0xf]  ;;  %4607 = vmatpush.bf16.msrb.mxu2 %v7292_v18  ;;  %v10663_v54 = vadd.f32 %v10547_v34, %v4181_v45  ;;  %v6047_v45 = vld [vmem:[%s12773_s4 + $0x1d0] sm:$0xf] }
 0x23f   : > { %v6969_v63 = vld [vmem:[%s12773_s4 + $0x928] sm:$0xf0] }
 0x240   : > { %v8400_v49 = vld [vmem:[%s12773_s4 + $0xf0c] sm:$0xf]  ;;  %v6972_v7 = vor.u32 %v8208_v61, %v6969_v63  ;;  %4626 = vmatpush.bf16.msrb.mxu3 %v7548_v57  ;;  %v4148_v57 = vadd.f32 %v4147_v51, %v10551_v38  ;;  %v10666_v61 = vpop.f32.mrf.mxu0  ;;  %v8173_v51 = vld [vmem:[%s12773_s4 + $0x7ec] sm:$0xf0] }
 0x241   : > { %v7737_v9 = vld [vmem:[%s12773_s4 + $0xf28] sm:$0xf0]  ;;  %4543 = vmatmul.bf16.gmra.mxu2 %v9547_v30 }
 0x242   : > { %v7740_v55 = vor.u32 %v8400_v49, %v7737_v9  ;;  %v8280_v10 = vld [vmem:[%s12773_s4 + $0xb4c] sm:$0xf]  ;;  %4590 = vmatpush.bf16.msrb.mxu1 %v6972_v7 }
 0x243   : > { %v7257_v12 = vld [vmem:[%s12773_s4 + $0xb68] sm:$0xf0]  ;;  %4562 = vmatmul.bf16.gmra.mxu3 %v9558_v35 }
 0x244   : > { %v8344_v1 = vld [vmem:[%s12773_s4 + $0xd4c] sm:$0xf]  ;;  %v7260_v20 = vor.u32 %v8280_v10, %v7257_v12  ;;  %4647 = vmatpush.bf16.msra.mxu0 %v7740_v55  ;;  %v4164_v55 = vpop.f32.mrf.mxu2 }
 0x245   : > { %v7513_v46 = vld [vmem:[%s12773_s4 + $0xd68] sm:$0xf0] }
 0x246   : > { %v7516_v17 = vor.u32 %v8344_v1, %v7513_v46  ;;  %v8200_v21 = vld [vmem:[%s12773_s4 + $0x8cc] sm:$0xf]  ;;  %4608 = vmatpush.bf16.msrb.mxu2 %v7260_v20  ;;  %v4165_v46 = vadd.f32 %v4164_v55, %v10607_v13  ;;  %v10763_v55 = vperm.slane %v10277_v14, 1  ;;  %v6559_v14 = vld [vmem:[%s12773_s4 + $0x5d0] sm:$0xf] }
 0x247   : > { %v6937_v36 = vld [vmem:[%s12773_s4 + $0x8e8] sm:$0xf0] }
 0x248   : > { %v8392_v59 = vld [vmem:[%s12773_s4 + $0xecc] sm:$0xf]  ;;  %v6940_v25 = vor.u32 %v8200_v21, %v6937_v36  ;;  %4627 = vmatpush.bf16.msrb.mxu3 %v7516_v17  ;;  %v4183_v17 = vpop.f32.mrf.mxu3 }
 0x249   : > { %v7705_v16 = vld [vmem:[%s12773_s4 + $0xee8] sm:$0xf0]  ;;  %v4184_v24 = vadd.f32 %v4183_v17, %v4165_v46  ;;  %v6303_v17 = vld [vmem:[%s12773_s4 + $0x3d0] sm:$0xf] }
 0x24a   : > { %v7708_v26 = vor.u32 %v8392_v59, %v7705_v16  ;;  %v8272_v29 = vld [vmem:[%s12773_s4 + $0xb0c] sm:$0xf]  ;;  %4591 = vmatpush.bf16.msrb.mxu1 %v6940_v25 }
 0x24b   : > { %v7225_v6 = vld [vmem:[%s12773_s4 + $0xb28] sm:$0xf0] }
 0x24c   : > { %v8336_v39 = vld [vmem:[%s12773_s4 + $0xd0c] sm:$0xf]  ;;  %v7228_v5 = vor.u32 %v8272_v29, %v7225_v6  ;;  %4648 = vmatpush.bf16.msra.mxu0 %v7708_v26  ;;  %v4216_v6 = vpop.f32.mrf.mxu1 }
 0x24d   : > { %v7481_v37 = vld [vmem:[%s12773_s4 + $0xd28] sm:$0xf0] }
 0x24e   : > { %v7484_v4 = vor.u32 %v8336_v39, %v7481_v37  ;;  %v8192_v31 = vld [vmem:[%s12773_s4 + $0x88c] sm:$0xf]  ;;  %4609 = vmatpush.bf16.msrb.mxu2 %v7228_v5  ;;  %v10720_v37 = vadd.f32 %v10609_v8, %v4184_v24  ;;  %v6815_v8 = vld [vmem:[%s12773_s4 + $0x7d0] sm:$0xf] }
 0x24f   : > { %v6905_v44 = vld [vmem:[%s12773_s4 + $0x8a8] sm:$0xf0]  ;;  %v5983_v24 = vld [vmem:[%s12773_s4 + $0x150] sm:$0xf] }
 0x250   : > { %v8384_v33 = vld [vmem:[%s12773_s4 + $0xe8c] sm:$0xf]  ;;  %v6908_v48 = vor.u32 %v8192_v31, %v6905_v44  ;;  %4628 = vmatpush.bf16.msrb.mxu3 %v7484_v4  ;;  %v10722_v4 = vpop.f32.mrf.mxu0 }
 0x251   : > { %v7673_v50 = vld [vmem:[%s12773_s4 + $0xea8] sm:$0xf0] }
 0x252   : > { %v7676_v52 = vor.u32 %v8384_v33, %v7673_v50  ;;  %v8264_v62 = vld [vmem:[%s12773_s4 + $0xacc] sm:$0xf]  ;;  %4592 = vmatpush.bf16.msrb.mxu1 %v6908_v48  ;;  %v7981_v48 = vld [vmem:[%s12773_s4 + $0x1ec] sm:$0xf0] }
 0x253   : > { %v7193_v19 = vld [vmem:[%s12773_s4 + $0xae8] sm:$0xf0]  ;;  %v6048_v50 = vor.u32 %v7981_v48, %v6047_v45 }
 0x254   : > { %v8328_v18 = vld [vmem:[%s12773_s4 + $0xccc] sm:$0xf]  ;;  %v7196_v63 = vor.u32 %v8264_v62, %v7193_v19  ;;  %4649 = vmatpush.bf16.msra.mxu0 %v7676_v52  ;;  %v4166_v52 = vpop.f32.mrf.mxu2  ;;  %v6816_v62 = vor.u32 %v8173_v51, %v6815_v8  ;;  %v8101_v8 = vld [vmem:[%s12773_s4 + $0x5ac] sm:$0xf0] }
 0x255   : > { %v7449_v49 = vld [vmem:[%s12773_s4 + $0xce8] sm:$0xf0]  ;;  %v5951_v51 = vld [vmem:[%s12773_s4 + $0x110] sm:$0xf] }
 0x256   : > { %v7452_v3 = vor.u32 %v8328_v18, %v7449_v49  ;;  %v8184_v34 = vld [vmem:[%s12773_s4 + $0x84c] sm:$0xf]  ;;  %4610 = vmatpush.bf16.msrb.mxu2 %v7196_v63  ;;  %v4167_v49 = vadd.f32 %v4166_v52, %v4148_v57  ;;  %v6783_v57 = vld [vmem:[%s12773_s4 + $0x790] sm:$0xf] }
 0x257   : > { %v6873_v38 = vld [vmem:[%s12773_s4 + $0x868] sm:$0xf0]  ;;  %v7957_v52 = vld [vmem:[%s12773_s4 + $0x12c] sm:$0xf0] }
 0x258   : > { %v8376_v7 = vld [vmem:[%s12773_s4 + $0xe4c] sm:$0xf]  ;;  %v6876_v9 = vor.u32 %v8184_v34, %v6873_v38  ;;  %4629 = vmatpush.bf16.msrb.mxu3 %v7452_v3  ;;  %v4185_v3 = vpop.f32.mrf.mxu3 }
 0x259   : > { %v7641_v32 = vld [vmem:[%s12773_s4 + $0xe68] sm:$0xf0] }
 0x25a   : > { %v7644_v10 = vor.u32 %v8376_v7, %v7641_v32  ;;  %v8256_v12 = vld [vmem:[%s12773_s4 + $0xa8c] sm:$0xf]  ;;  %4593 = vmatpush.bf16.msrb.mxu1 %v6876_v9  ;;  %v6015_v9 = vld [vmem:[%s12773_s4 + $0x190] sm:$0xf] }
 0x25b   : > { %v7161_v1 = vld [vmem:[%s12773_s4 + $0xaa8] sm:$0xf0]  ;;  %v7973_v32 = vld [vmem:[%s12773_s4 + $0x1ac] sm:$0xf0] }
 0x25c   : > { %v8320_v20 = vld [vmem:[%s12773_s4 + $0xc8c] sm:$0xf]  ;;  %v7164_v21 = vor.u32 %v8256_v12, %v7161_v1  ;;  %4650 = vmatpush.bf16.msra.mxu0 %v7644_v10  ;;  %v4186_v10 = vadd.f32 %v4185_v3, %v4167_v49  ;;  %v6016_v12 = vor.u32 %v7973_v32, %v6015_v9  ;;  %v8165_v1 = vld [vmem:[%s12773_s4 + $0x7ac] sm:$0xf0] }
 0x25d   : > { %v7417_v36 = vld [vmem:[%s12773_s4 + $0xca8] sm:$0xf0]  ;;  %v6784_v46 = vor.u32 %v8165_v1, %v6783_v57  ;;  %v5919_v1 = vld [vmem:[%s12773_s4 + $0xd0] sm:$0xf] }
 0x25e   : > { %v7420_v59 = vor.u32 %v8320_v20, %v7417_v36  ;;  %v8176_v25 = vld [vmem:[%s12773_s4 + $0x80c] sm:$0xf]  ;;  %4611 = vmatpush.bf16.msrb.mxu2 %v7164_v21  ;;  %v4218_v20 = vpop.f32.mrf.mxu1  ;;  %v8045_v21 = vld [vmem:[%s12773_s4 + $0x3ec] sm:$0xf0]  ;;  %v10778_v36 = vadd.f32 %v10666_v61, %v4186_v10 }
 0x25f   : > { %v6841_v16 = vld [vmem:[%s12773_s4 + $0x828] sm:$0xf0]  ;;  %v7965_v61 = vld [vmem:[%s12773_s4 + $0x16c] sm:$0xf0] }
 0x260   : > { %v8368_v13 = vld [vmem:[%s12773_s4 + $0xe0c] sm:$0xf]  ;;  %v6844_v26 = vor.u32 %v8176_v25, %v6841_v16  ;;  %4630 = vmatpush.bf16.msrb.mxu3 %v7420_v59  ;;  %v10780_v59 = vpop.f32.mrf.mxu0  ;;  %v6304_v25 = vor.u32 %v8045_v21, %v6303_v17  ;;  %v8109_v16 = vld [vmem:[%s12773_s4 + $0x5ec] sm:$0xf0]  ;;  %v4254_v45 = vpop.f32.mrf.mxu3  ;;  %v4219_v17 = vadd.f32 %v4218_v20, %v10763_v55 }
 0x261   : > { %v7609_v29 = vld [vmem:[%s12773_s4 + $0xe28] sm:$0xf0]  ;;  %v8093_v10 = vld [vmem:[%s12773_s4 + $0x56c] sm:$0xf0] }
 0x262   : > { %v7612_v39 = vor.u32 %v8368_v13, %v7609_v29  ;;  %v8248_v40 = vld [vmem:[%s12773_s4 + $0xa4c] sm:$0xf]  ;;  %4594 = vmatpush.bf16.msrb.mxu1 %v6844_v26  ;;  %v6560_v13 = vor.u32 %v8109_v16, %v6559_v14  ;;  %v6751_v26 = vld [vmem:[%s12773_s4 + $0x750] sm:$0xf]  ;;  %v4217_v29 = vadd.f32 %v4216_v6, %v10763_v55 }
 0x263   : > { %v7129_v42 = vld [vmem:[%s12773_s4 + $0xa68] sm:$0xf0]  ;;  %v6527_v6 = vld [vmem:[%s12773_s4 + $0x590] sm:$0xf] }
 0x264   : > { %v8312_v5 = vld [vmem:[%s12773_s4 + $0xc4c] sm:$0xf]  ;;  %v7132_v31 = vor.u32 %v8248_v40, %v7129_v42  ;;  %4651 = vmatpush.bf16.msra.mxu0 %v7612_v39  ;;  %v5984_v39 = vor.u32 %v7965_v61, %v5983_v24  ;;  %v8157_v40 = vld [vmem:[%s12773_s4 + $0x76c] sm:$0xf0]  ;;  %v4235_v42 = vpop.f32.mrf.mxu2 }
 0x265   : > { %v7385_v44 = vld [vmem:[%s12773_s4 + $0xc68] sm:$0xf0]  ;;  %v8141_v14 = vld [vmem:[%s12773_s4 + $0x6ec] sm:$0xf0]  ;;  %4595 = vmatmul.bf16.vlgmr.msrb.gmra.mxu1 %v9636_v23 }
 0x266   : > { %v7388_v33 = vor.u32 %v8312_v5, %v7385_v44  ;;  %4612 = vmatpush.bf16.msrb.mxu2 %v7132_v31  ;;  %v8240_v19 = vld [vmem:[%s12773_s4 + $0xa0c] sm:$0xf]  ;;  %4663 = vmatpush.bf16.msra.mxu1 %v6048_v50  ;;  %v6752_v5 = vor.u32 %v8157_v40, %v6751_v26  ;;  %v6271_v31 = vld [vmem:[%s12773_s4 + $0x390] sm:$0xf]  ;;  %v6528_v50 = vor.u32 %v8101_v8, %v6527_v6  ;;  %v4221_v49 = vpop.f32.mrf.mxu1 }
 0x267   : > { %v7097_v18 = vld [vmem:[%s12773_s4 + $0xa28] sm:$0xf0]  ;;  %v8037_v44 = vld [vmem:[%s12773_s4 + $0x3ac] sm:$0xf0]  ;;  %4652 = vmatmul.bf16.vlgmr.msra.gmra.mxu0 %v9639_v27 }
 0x268   : > { %4631 = vmatpush.bf16.msrb.mxu3 %v7388_v33  ;;  %v8304_v63 = vld [vmem:[%s12773_s4 + $0xc0c] sm:$0xf]  ;;  %v7100_v34 = vor.u32 %v8240_v19, %v7097_v18  ;;  %4720 = vmatpush.bf16.msrb.mxu0 %v6816_v62  ;;  %v4236_v33 = vadd.f32 %v4235_v42, %v4217_v29  ;;  %v6272_v48 = vor.u32 %v8037_v44, %v6271_v31  ;;  %v6719_v62 = vld [vmem:[%s12773_s4 + $0x710] sm:$0xf]  ;;  %v10833_v9 = vpop.f32.mrf.mxu0  ;;  %v4256_v26 = vpop.f32.mrf.mxu3 }
 0x269   : > { %v7353_v38 = vld [vmem:[%s12773_s4 + $0xc28] sm:$0xf0]  ;;  %v5952_v18 = vor.u32 %v7957_v52, %v5951_v51  ;;  %v8021_v20 = vld [vmem:[%s12773_s4 + $0x32c] sm:$0xf0] }
 0x26a   : > { %v7356_v7 = vor.u32 %v8304_v63, %v7353_v38  ;;  %4613 = vmatpush.bf16.msrb.mxu2 %v7100_v34  ;;  %4664 = vmatpush.bf16.msra.mxu1 %v6016_v12  ;;  %v4255_v19 = vadd.f32 %v4254_v45, %v4236_v33  ;;  %v8149_v63 = vld [vmem:[%s12773_s4 + $0x72c] sm:$0xf0] }
 0x26b   : > { %v6720_v3 = vor.u32 %v8149_v63, %v6719_v62  ;;  %v6239_v34 = vld [vmem:[%s12773_s4 + $0x350] sm:$0xf] }
 0x26c   : > { %4632 = vmatpush.bf16.msrb.mxu3 %v7356_v7  ;;  %4721 = vmatpush.bf16.msrb.mxu0 %v6784_v46  ;;  %v8029_v38 = vld [vmem:[%s12773_s4 + $0x36c] sm:$0xf0]  ;;  %v10836_v32 = vadd.f32 %v10722_v4, %v4255_v19 }
 0x26d   : > { %v6495_v7 = vld [vmem:[%s12773_s4 + $0x550] sm:$0xf]  ;;  %v6240_v57 = vor.u32 %v8029_v38, %v6239_v34  ;;  %v4222_v38 = vadd.f32 %v4221_v49, %v10763_v55  ;;  %4614 = vmatmul.bf16.vlgmr.msrb.gmra.mxu2 %v9678_v58 }
 0x26e   : > { %4682 = vmatpush.bf16.msra.mxu2 %v6304_v25  ;;  %4665 = vmatpush.bf16.msra.mxu1 %v5984_v39  ;;  %v6496_v12 = vor.u32 %v8093_v10, %v6495_v7  ;;  %v7949_v46 = vld [vmem:[%s12773_s4 + $0xec] sm:$0xf0]  ;;  %v4237_v25 = vpop.f32.mrf.mxu2  ;;  %v4223_v45 = vpop.f32.mrf.mxu1 }
 0x26f   : > { %v6687_v4 = vld [vmem:[%s12773_s4 + $0x6d0] sm:$0xf]  ;;  %v5920_v21 = vor.u32 %v7949_v46, %v5919_v1  ;;  %v4238_v61 = vadd.f32 %v4237_v25, %v4219_v17  ;;  %4633 = vmatmul.bf16.vlgmr.msrb.gmra.mxu3 %v9683_v0 }
 0x270   : > { %4701 = vmatpush.bf16.msra.mxu3 %v6560_v13  ;;  %4722 = vmatpush.bf16.msrb.mxu0 %v6752_v5  ;;  %v6688_v16 = vor.u32 %v8141_v14, %v6687_v4  ;;  %v6207_v13 = vld [vmem:[%s12773_s4 + $0x310] sm:$0xf]  ;;  %v10889_v52 = vpop.f32.mrf.mxu0  ;;  %v4259_v17 = vpop.f32.mrf.mxu3 }
 0x271   : > { %v6463_v24 = vld [vmem:[%s12773_s4 + $0x510] sm:$0xf]  ;;  %v6208_v29 = vor.u32 %v8021_v20, %v6207_v13  ;;  %v4257_v44 = vadd.f32 %v4256_v26, %v4238_v61 }
 0x272   : > { %4683 = vmatpush.bf16.msra.mxu2 %v6272_v48  ;;  %4666 = vmatpush.bf16.msra.mxu1 %v5952_v18  ;;  %v8085_v39 = vld [vmem:[%s12773_s4 + $0x52c] sm:$0xf0] }
 0x273   : > { %v6464_v40 = vor.u32 %v8085_v39, %v6463_v24  ;;  %v5887_v42 = vld [vmem:[%s12773_s4 + $0x90] sm:$0xf]  ;;  %v10893_v62 = vadd.f32 %v10780_v59, %v4257_v44 }
 0x274   : > { %4702 = vmatpush.bf16.msra.mxu3 %v6528_v50  ;;  %4723 = vmatpush.bf16.msrb.mxu0 %v6720_v3  ;;  %v7941_v5 = vld [vmem:[%s12773_s4 + $0xac] sm:$0xf0] }
 0x275   : > { %v6655_v31 = vld [vmem:[%s12773_s4 + $0x690] sm:$0xf]  ;;  %v5888_v6 = vor.u32 %v7941_v5, %v5887_v42  ;;  %4600 = vmatmul.bf16.gmra.mxu1 %v9752_v53 }
 0x276   : > { %4684 = vmatpush.bf16.msra.mxu2 %v6240_v57  ;;  %4667 = vmatpush.bf16.msra.mxu1 %v5920_v21  ;;  %v8133_v33 = vld [vmem:[%s12773_s4 + $0x6ac] sm:$0xf0]  ;;  %v4240_v10 = vpop.f32.mrf.mxu2 }
 0x277   : > { %v6656_v48 = vor.u32 %v8133_v33, %v6655_v31  ;;  %v6175_v8 = vld [vmem:[%s12773_s4 + $0x2d0] sm:$0xf]  ;;  %v4241_v4 = vadd.f32 %v4240_v10, %v4222_v38  ;;  %4657 = vmatmul.bf16.gmra.mxu0 %v9755_v56 }
 0x278   : > { %4703 = vmatpush.bf16.msra.mxu3 %v6496_v12  ;;  %4724 = vmatpush.bf16.msrb.mxu0 %v6688_v16  ;;  %v8013_v50 = vld [vmem:[%s12773_s4 + $0x2ec] sm:$0xf0]  ;;  %v10945_v31 = vpop.f32.mrf.mxu0  ;;  %v4261_v38 = vpop.f32.mrf.mxu3 }
 0x279   : > { %v6431_v51 = vld [vmem:[%s12773_s4 + $0x4d0] sm:$0xf]  ;;  %v6176_v19 = vor.u32 %v8013_v50, %v6175_v8  ;;  %v4260_v24 = vadd.f32 %v4259_v17, %v4241_v4 }
 0x27a   : > { %4685 = vmatpush.bf16.msra.mxu2 %v6208_v29  ;;  %4668 = vmatpush.bf16.msra.mxu1 %v5888_v6  ;;  %v8077_v18 = vld [vmem:[%s12773_s4 + $0x4ec] sm:$0xf0]  ;;  %v4292_v29 = vpop.f32.mrf.mxu1 }
 0x27b   : > { %v6432_v63 = vor.u32 %v8077_v18, %v6431_v51  ;;  %v5855_v3 = vld [vmem:[%s12773_s4 + $0x50] sm:$0xf]  ;;  %v10943_v5 = vadd.f32 %v4292_v29, %v10836_v32  ;;  %v10948_v44 = vadd.f32 %v10833_v9, %v4260_v24  ;;  %v4224_v51 = vadd.f32 %v4223_v45, %v10763_v55 }
 0x27c   : > { %4704 = vmatpush.bf16.msra.mxu3 %v6464_v40  ;;  %4725 = vmatpush.bf16.msrb.mxu0 %v6656_v48  ;;  %v7933_v34 = vld [vmem:[%s12773_s4 + $0x6c] sm:$0xf0] }
 0x27d   : > { %v6623_v59 = vld [vmem:[%s12773_s4 + $0x650] sm:$0xf]  ;;  %v5856_v7 = vor.u32 %v7933_v34, %v5855_v3  ;;  %4619 = vmatmul.bf16.gmra.mxu2 %v9794_v22 }
 0x27e   : > { %4686 = vmatpush.bf16.msra.mxu2 %v6176_v19  ;;  %v8125_v57 = vld [vmem:[%s12773_s4 + $0x66c] sm:$0xf0] }
 0x27f   : > { %v6624_v12 = vor.u32 %v8125_v57, %v6623_v59  ;;  %v6143_v1 = vld [vmem:[%s12773_s4 + $0x290] sm:$0xf]  ;;  %4669 = vmatpush.bf16.msra.mxu1 %v5856_v7  ;;  %4638 = vmatmul.bf16.gmra.mxu3 %v9799_v28 }
 0x280   : > { %4705 = vmatpush.bf16.msra.mxu3 %v6432_v63  ;;  %v8005_v46 = vld [vmem:[%s12773_s4 + $0x2ac] sm:$0xf0]  ;;  %v4242_v63 = vpop.f32.mrf.mxu2  ;;  %v11007_v24 = vpop.f32.mrf.mxu0 }
 0x281   : > { %v6399_v49 = vld [vmem:[%s12773_s4 + $0x490] sm:$0xf]  ;;  %v6144_v21 = vor.u32 %v8005_v46, %v6143_v1  ;;  %4726 = vmatpush.bf16.msrb.mxu0 %v6624_v12  ;;  %v4243_v59 = vadd.f32 %v4242_v63, %v4224_v51 }
 0x282   : > { %v8069_v14 = vld [vmem:[%s12773_s4 + $0x4ac] sm:$0xf0] }
 0x283   : > { %v6400_v25 = vor.u32 %v8069_v14, %v6399_v49  ;;  %v5823_v16 = vld [vmem:[%s12773_s4 + $0x10] sm:$0xf]  ;;  %4687 = vmatpush.bf16.msra.mxu2 %v6144_v21  ;;  %v4262_v49 = vadd.f32 %v4261_v38, %v4243_v59  ;;  %v4294_v21 = vpop.f32.mrf.mxu1 }
 0x284   : > { %v7925_v13 = vld [vmem:[%s12773_s4 + $0x2c] sm:$0xf0] }
 0x285   : > { %v6591_v20 = vld [vmem:[%s12773_s4 + $0x610] sm:$0xf]  ;;  %v5824_v61 = vor.u32 %v7925_v13, %v5823_v16  ;;  %4706 = vmatpush.bf16.msra.mxu3 %v6400_v25 }
 0x286   : > { %v8117_v26 = vld [vmem:[%s12773_s4 + $0x62c] sm:$0xf0] }
 0x287   : > { %v6592_v39 = vor.u32 %v8117_v26, %v6591_v20  ;;  %v6111_v40 = vld [vmem:[%s12773_s4 + $0x250] sm:$0xf]  ;;  %4670 = vmatpush.bf16.msra.mxu1 %v5824_v61  ;;  %v11005_v20 = vadd.f32 %v4294_v21, %v10893_v62  ;;  %v11011_v61 = vadd.f32 %v10889_v52, %v4262_v49 }
 0x288   : > { %v7997_v42 = vld [vmem:[%s12773_s4 + $0x26c] sm:$0xf0]  ;;  %v11079_v21 = vpop.f32.mrf.mxu0 }
 0x289   : > { %v6112_v6 = vor.u32 %v7997_v42, %v6111_v40  ;;  %v6367_v33 = vld [vmem:[%s12773_s4 + $0x450] sm:$0xf]  ;;  %4727 = vmatpush.bf16.msrb.mxu0 %v6592_v39  ;;  %v11029_v42 = vld [vmem:[%s12775_s6] sm:$0xff] }
 0x28a   : > { %v8061_v48 = vld [vmem:[%s12773_s4 + $0x46c] sm:$0xf0]  ;;  %v11058_v59 = vperm.slane %v11029_v42, 0  ;;  %4671 = vmatmul.bf16.vlgmr.msra.gmra.mxu1 %v9386_v41 }
 0x28b   : > { %v6368_v8 = vor.u32 %v8061_v48, %v6367_v33  ;;  %v7071_v32 = vld [vmem:[%s12773_s4 + $0x9d0] sm:$0xf]  ;;  %4688 = vmatpush.bf16.msra.mxu2 %v6112_v6  ;;  %v4311_v48 = vpop.f32.mrf.mxu2 }
 0x28c   : > { %v8237_v9 = vld [vmem:[%s12773_s4 + $0x9ec] sm:$0xf0]  ;;  %v4312_v51 = vadd.f32 %v4311_v48, %v10943_v5  ;;  %4728 = vmatmul.bf16.vlgmr.msrb.gmra.mxu0 %v9395_v47 }
 0x28d   : > { %v7839_v50 = vld [vmem:[%s12773_s4 + $0xfd0] sm:$0xf]  ;;  %v7072_v19 = vor.u32 %v8237_v9, %v7071_v32  ;;  %4707 = vmatpush.bf16.msra.mxu3 %v6368_v8 }
 0x28e   : > { %v8429_v18 = vld [vmem:[%s12773_s4 + $0xfec] sm:$0xf0] }
 0x28f   : > { %v7840_v3 = vor.u32 %v8429_v18, %v7839_v50  ;;  %v6079_v34 = vld [vmem:[%s12773_s4 + $0x210] sm:$0xf]  ;;  %4739 = vmatpush.bf16.msrb.mxu1 %v7072_v19  ;;  %v4330_v19 = vpop.f32.mrf.mxu3 }
 0x290   : > { %v7989_v55 = vld [vmem:[%s12773_s4 + $0x22c] sm:$0xf0]  ;;  %v4331_v38 = vadd.f32 %v4330_v19, %v4312_v51 }
 0x291   : > { %v6335_v45 = vld [vmem:[%s12773_s4 + $0x410] sm:$0xf]  ;;  %v6080_v7 = vor.u32 %v7989_v55, %v6079_v34  ;;  %4796 = vmatpush.bf16.msra.mxu0 %v7840_v3 }
 0x292   : > { %v8053_v57 = vld [vmem:[%s12773_s4 + $0x42c] sm:$0xf0]  ;;  %v4350_v49 = vadd.f32 %v10945_v31, %v4331_v38 }
 0x293   : > { %v6336_v10 = vor.u32 %v8053_v57, %v6335_v45  ;;  %v7039_v12 = vld [vmem:[%s12773_s4 + $0x990] sm:$0xf]  ;;  %4689 = vmatpush.bf16.msra.mxu2 %v6080_v7  ;;  %v5271_v45 = vmax.f32 %v10604_v43, 0.0 }
 0x294   : > { %v8229_v1 = vld [vmem:[%s12773_s4 + $0x9ac] sm:$0xf0] }
 0x295   : > { %v7807_v46 = vld [vmem:[%s12773_s4 + $0xf90] sm:$0xf]  ;;  %v7040_v4 = vor.u32 %v8229_v1, %v7039_v12  ;;  %4708 = vmatpush.bf16.msra.mxu3 %v6336_v10  ;;  %v4297_v10 = vpop.f32.mrf.mxu1  ;;  %v5321_v48 = vmul.f32 %v11058_v59, %v5271_v45 }
 0x296   : > { %v8421_v17 = vld [vmem:[%s12773_s4 + $0xfac] sm:$0xf0]  ;;  %4690 = vmatmul.bf16.vlgmr.msra.gmra.mxu2 %v9431_v11 }
 0x297   : > { %v7808_v14 = vor.u32 %v8421_v17, %v7807_v46  ;;  %v7327_v25 = vld [vmem:[%s12773_s4 + $0xbd0] sm:$0xf]  ;;  %4740 = vmatpush.bf16.msrb.mxu1 %v7040_v4  ;;  %v11074_v4 = vperm.slane %v11029_v42, 1  ;;  %v11077_v17 = vadd.f32 %v4297_v10, %v10948_v44 }
 0x298   : > { %v8301_v16 = vld [vmem:[%s12773_s4 + $0xbec] sm:$0xf0]  ;;  %4709 = vmatmul.bf16.vlgmr.msra.gmra.mxu3 %v9439_v15 }
 0x299   : > { %v7583_v13 = vld [vmem:[%s12773_s4 + $0xdd0] sm:$0xf]  ;;  %v7328_v26 = vor.u32 %v8301_v16, %v7327_v25  ;;  %4797 = vmatpush.bf16.msra.mxu0 %v7808_v14 }
 0x29a   : > { %v8365_v29 = vld [vmem:[%s12773_s4 + $0xdec] sm:$0xf0]  ;;  %4676 = vmatmul.bf16.gmra.mxu1 %v9502_v60 }
 0x29b   : > { %v7584_v39 = vor.u32 %v8365_v29, %v7583_v13  ;;  %v7007_v62 = vld [vmem:[%s12773_s4 + $0x950] sm:$0xf]  ;;  %4758 = vmatpush.bf16.msrb.mxu2 %v7328_v26  ;;  %v5272_v26 = vmax.f32 %v4350_v49, 0.0 }
 0x29c   : > { %v8221_v40 = vld [vmem:[%s12773_s4 + $0x96c] sm:$0xf0]  ;;  %4733 = vmatmul.bf16.gmra.mxu0 %v9511_v2 }
 0x29d   : > { %v7775_v52 = vld [vmem:[%s12773_s4 + $0xf50] sm:$0xf]  ;;  %v7008_v6 = vor.u32 %v8221_v40, %v7007_v62  ;;  %4777 = vmatpush.bf16.msrb.mxu3 %v7584_v39  ;;  %v4313_v62 = vpop.f32.mrf.mxu2  ;;  %v4299_v45 = vpop.f32.mrf.mxu1 }
 0x29e   : > { %v8413_v33 = vld [vmem:[%s12773_s4 + $0xf6c] sm:$0xf0] }
 0x29f   : > { %v7776_v8 = vor.u32 %v8413_v33, %v7775_v52  ;;  %v7295_v32 = vld [vmem:[%s12773_s4 + $0xb90] sm:$0xf]  ;;  %4741 = vmatpush.bf16.msrb.mxu1 %v7008_v6 }
 0x2a0   : > { %v8293_v9 = vld [vmem:[%s12773_s4 + $0xbac] sm:$0xf0] }
 0x2a1   : > { %v7551_v50 = vld [vmem:[%s12773_s4 + $0xd90] sm:$0xf]  ;;  %v7296_v18 = vor.u32 %v8293_v9, %v7295_v32  ;;  %4798 = vmatpush.bf16.msra.mxu0 %v7776_v8  ;;  %v5322_v8 = vmul.f32 %v11074_v4, %v5272_v26  ;;  %v4314_v32 = vadd.f32 %v4313_v62, %v11005_v20  ;;  %v4332_v9 = vpop.f32.mrf.mxu3 }
 0x2a2   : > { %v8357_v63 = vld [vmem:[%s12773_s4 + $0xdac] sm:$0xf0] }
 0x2a3   : > { %v7552_v3 = vor.u32 %v8357_v63, %v7551_v50  ;;  %v6975_v34 = vld [vmem:[%s12773_s4 + $0x910] sm:$0xf]  ;;  %4759 = vmatpush.bf16.msrb.mxu2 %v7296_v18 }
 0x2a4   : > { %v8213_v55 = vld [vmem:[%s12773_s4 + $0x92c] sm:$0xf0] }
 0x2a5   : > { %v7743_v5 = vld [vmem:[%s12773_s4 + $0xf10] sm:$0xf]  ;;  %v6976_v7 = vor.u32 %v8213_v55, %v6975_v34  ;;  %4778 = vmatpush.bf16.msrb.mxu3 %v7552_v3  ;;  %v11122_v3 = vadd.f32 %v5322_v8, %v5321_v48  ;;  %v4333_v34 = vadd.f32 %v4332_v9, %v4314_v32 }
 0x2a6   : > { %v8405_v57 = vld [vmem:[%s12773_s4 + $0xf2c] sm:$0xf0]  ;;  %4695 = vmatmul.bf16.gmra.mxu2 %v9547_v30 }
 0x2a7   : > { %v7744_v12 = vor.u32 %v8405_v57, %v7743_v5  ;;  %v7263_v1 = vld [vmem:[%s12773_s4 + $0xb50] sm:$0xf]  ;;  %4742 = vmatpush.bf16.msrb.mxu1 %v6976_v7 }
 0x2a8   : > { %v8285_v43 = vld [vmem:[%s12773_s4 + $0xb6c] sm:$0xf0]  ;;  %4714 = vmatmul.bf16.gmra.mxu3 %v9558_v35 }
 0x2a9   : > { %v7519_v46 = vld [vmem:[%s12773_s4 + $0xd50] sm:$0xf]  ;;  %v7264_v14 = vor.u32 %v8285_v43, %v7263_v1  ;;  %4799 = vmatpush.bf16.msra.mxu0 %v7744_v12  ;;  %v5279_v12 = vmax.f32 %v10663_v54, 0.0  ;;  %v4352_v1 = vadd.f32 %v11007_v24, %v4333_v34  ;;  %v11139_v43 = vadd.f32 %v4299_v45, %v11011_v61 }
 0x2aa   : > { %v8349_v25 = vld [vmem:[%s12773_s4 + $0xd6c] sm:$0xf0] }
 0x2ab   : > { %v7520_v16 = vor.u32 %v8349_v25, %v7519_v46  ;;  %v6943_v31 = vld [vmem:[%s12773_s4 + $0x8d0] sm:$0xf]  ;;  %4760 = vmatpush.bf16.msrb.mxu2 %v7264_v14  ;;  %v11141_v46 = vpop.f32.mrf.mxu0 }
 0x2ac   : > { %v8205_v13 = vld [vmem:[%s12773_s4 + $0x8ec] sm:$0xf0] }
 0x2ad   : > { %v7711_v44 = vld [vmem:[%s12773_s4 + $0xed0] sm:$0xf]  ;;  %v6944_v29 = vor.u32 %v8205_v13, %v6943_v31  ;;  %4779 = vmatpush.bf16.msrb.mxu3 %v7520_v16  ;;  %v5280_v16 = vmax.f32 %v4352_v1, 0.0 }
 0x2ae   : > { %v8397_v39 = vld [vmem:[%s12773_s4 + $0xeec] sm:$0xf0] }
 0x2af   : > { %v7712_v40 = vor.u32 %v8397_v39, %v7711_v44  ;;  %v7231_v52 = vld [vmem:[%s12773_s4 + $0xb10] sm:$0xf]  ;;  %4743 = vmatpush.bf16.msrb.mxu1 %v6944_v29  ;;  %v4316_v44 = vpop.f32.mrf.mxu2 }
 0x2b0   : > { %v8277_v6 = vld [vmem:[%s12773_s4 + $0xb2c] sm:$0xf0] }
 0x2b1   : > { %v7487_v33 = vld [vmem:[%s12773_s4 + $0xd10] sm:$0xf]  ;;  %v7232_v50 = vor.u32 %v8277_v6, %v7231_v52  ;;  %4800 = vmatpush.bf16.msra.mxu0 %v7712_v40  ;;  %v5329_v40 = vmul.f32 %v11058_v59, %v5279_v12  ;;  %v5330_v52 = vmul.f32 %v11074_v4, %v5280_v16  ;;  %v4317_v6 = vadd.f32 %v4316_v44, %v11077_v17 }
 0x2b2   : > { %v8341_v51 = vld [vmem:[%s12773_s4 + $0xd2c] sm:$0xf0] }
 0x2b3   : > { %v7488_v19 = vor.u32 %v8341_v51, %v7487_v33  ;;  %v6911_v18 = vld [vmem:[%s12773_s4 + $0x890] sm:$0xf]  ;;  %4761 = vmatpush.bf16.msrb.mxu2 %v7232_v50  ;;  %v4335_v33 = vpop.f32.mrf.mxu3  ;;  %v11184_v51 = vadd.f32 %v5330_v52, %v5329_v40 }
 0x2b4   : > { %v8197_v63 = vld [vmem:[%s12773_s4 + $0x8ac] sm:$0xf0] }
 0x2b5   : > { %v7679_v20 = vld [vmem:[%s12773_s4 + $0xe90] sm:$0xf]  ;;  %v6912_v55 = vor.u32 %v8197_v63, %v6911_v18  ;;  %4780 = vmatpush.bf16.msrb.mxu3 %v7488_v19  ;;  %v4336_v19 = vadd.f32 %v4335_v33, %v4317_v6  ;;  %v7969_v6 = vld [vmem:[%s12773_s4 + $0x194] sm:$0xf] }
 0x2b6   : > { %v8389_v5 = vld [vmem:[%s12773_s4 + $0xeac] sm:$0xf0]  ;;  %v6017_v33 = vld [vmem:[%s12773_s4 + $0x1b0] sm:$0xf0] }
 0x2b7   : > { %v7680_v38 = vor.u32 %v8389_v5, %v7679_v20  ;;  %v7199_v7 = vld [vmem:[%s12773_s4 + $0xad0] sm:$0xf]  ;;  %4744 = vmatpush.bf16.msrb.mxu1 %v6912_v55  ;;  %v11189_v20 = vpop.f32.mrf.mxu1 }
 0x2b8   : > { %v8269_v57 = vld [vmem:[%s12773_s4 + $0xaec] sm:$0xf0] }
 0x2b9   : > { %v7455_v10 = vld [vmem:[%s12773_s4 + $0xcd0] sm:$0xf]  ;;  %v7200_v49 = vor.u32 %v8269_v57, %v7199_v7  ;;  %4801 = vmatpush.bf16.msra.mxu0 %v7680_v38  ;;  %v5287_v38 = vmax.f32 %v10720_v37, 0.0  ;;  %v4355_v7 = vadd.f32 %v11079_v21, %v4336_v19  ;;  %v11202_v57 = vpop.f32.mrf.mxu0  ;;  %v6049_v37 = vld [vmem:[%s12773_s4 + $0x1f0] sm:$0xf0] }
 0x2ba   : > { %v8333_v14 = vld [vmem:[%s12773_s4 + $0xcec] sm:$0xf0]  ;;  %v8169_v21 = vld [vmem:[%s12773_s4 + $0x7d4] sm:$0xf] }
 0x2bb   : > { %v7456_v25 = vor.u32 %v8333_v14, %v7455_v10  ;;  %v6879_v54 = vld [vmem:[%s12773_s4 + $0x850] sm:$0xf]  ;;  %4762 = vmatpush.bf16.msrb.mxu2 %v7200_v49  ;;  %v7977_v49 = vld [vmem:[%s12773_s4 + $0x1d4] sm:$0xf]  ;;  %v5288_v14 = vmax.f32 %v4355_v7, 0.0  ;;  %v5337_v44 = vmul.f32 %v11058_v59, %v5287_v38 }
 0x2bc   : > { %v8189_v24 = vld [vmem:[%s12773_s4 + $0x86c] sm:$0xf0] }
 0x2bd   : > { %v7647_v61 = vld [vmem:[%s12773_s4 + $0xe50] sm:$0xf]  ;;  %v6880_v31 = vor.u32 %v8189_v24, %v6879_v54  ;;  %4781 = vmatpush.bf16.msrb.mxu3 %v7456_v25  ;;  %v6052_v25 = vor.u32 %v7977_v49, %v6049_v37  ;;  %v6817_v54 = vld [vmem:[%s12773_s4 + $0x7f0] sm:$0xf0]  ;;  %v4318_v24 = vpop.f32.mrf.mxu2 }
 0x2be   : > { %v8381_v13 = vld [vmem:[%s12773_s4 + $0xe6c] sm:$0xf0] }
 0x2bf   : > { %v7648_v26 = vor.u32 %v8381_v13, %v7647_v61  ;;  %v7167_v29 = vld [vmem:[%s12773_s4 + $0xa90] sm:$0xf]  ;;  %4745 = vmatpush.bf16.msrb.mxu1 %v6880_v31  ;;  %v6820_v61 = vor.u32 %v8169_v21, %v6817_v54  ;;  %v11258_v19 = vpop.f32.mrf.mxu1 }
 0x2c0   : > { %v8261_v39 = vld [vmem:[%s12773_s4 + $0xaac] sm:$0xf0] }
 0x2c1   : > { %v7423_v62 = vld [vmem:[%s12773_s4 + $0xc90] sm:$0xf]  ;;  %v7168_v48 = vor.u32 %v8261_v39, %v7167_v29  ;;  %4802 = vmatpush.bf16.msra.mxu0 %v7648_v26  ;;  %v5338_v26 = vmul.f32 %v11074_v4, %v5288_v14  ;;  %v4319_v29 = vadd.f32 %v4318_v24, %v11139_v43  ;;  %v4337_v39 = vpop.f32.mrf.mxu3  ;;  %v8161_v43 = vld [vmem:[%s12773_s4 + $0x794] sm:$0xf]  ;;  %v11271_v38 = vpop.f32.mrf.mxu0 }
 0x2c2   : > { %v8325_v8 = vld [vmem:[%s12773_s4 + $0xcac] sm:$0xf0]  ;;  %v6753_v14 = vld [vmem:[%s12773_s4 + $0x770] sm:$0xf0] }
 0x2c3   : > { %v7424_v32 = vor.u32 %v8325_v8, %v7423_v62  ;;  %v6847_v9 = vld [vmem:[%s12773_s4 + $0x810] sm:$0xf]  ;;  %4763 = vmatpush.bf16.msrb.mxu2 %v7168_v48  ;;  %v11245_v48 = vadd.f32 %v5338_v26, %v5337_v44  ;;  %v11250_v8 = vld [vmem:[%s12774_s5] sm:$0xff]  ;;  %v8033_v24 = vld [vmem:[%s12773_s4 + $0x394] sm:$0xf] }
 0x2c4   : > { %v8181_v50 = vld [vmem:[%s12773_s4 + $0x82c] sm:$0xf0] }
 0x2c5   : > { %v7615_v17 = vld [vmem:[%s12773_s4 + $0xe10] sm:$0xf]  ;;  %v6848_v18 = vor.u32 %v8181_v50, %v6847_v9  ;;  %4782 = vmatpush.bf16.msrb.mxu3 %v7424_v32  ;;  %v11253_v32 = vperm.slane %v11250_v8, 2  ;;  %v4338_v9 = vadd.f32 %v4337_v39, %v4319_v29  ;;  %v6020_v50 = vor.u32 %v7969_v6, %v6017_v33  ;;  %v6529_v29 = vld [vmem:[%s12773_s4 + $0x5b0] sm:$0xf0] }
 0x2c6   : > { %v8373_v63 = vld [vmem:[%s12773_s4 + $0xe2c] sm:$0xf0]  ;;  %v6721_v33 = vld [vmem:[%s12773_s4 + $0x730] sm:$0xf0] }
 0x2c7   : > { %v7616_v34 = vor.u32 %v8373_v63, %v7615_v17  ;;  %v7135_v55 = vld [vmem:[%s12773_s4 + $0xa50] sm:$0xf]  ;;  %4746 = vmatpush.bf16.msrb.mxu1 %v6848_v18  ;;  %v6785_v17 = vld [vmem:[%s12773_s4 + $0x7b0] sm:$0xf0]  ;;  %v4369_v49 = vadd.f32 %v11189_v20, %v11253_v32 }
 0x2c8   : > { %v8253_v5 = vld [vmem:[%s12773_s4 + $0xa6c] sm:$0xf0]  ;;  %v6788_v18 = vor.u32 %v8161_v43, %v6785_v17  ;;  %v8041_v63 = vld [vmem:[%s12773_s4 + $0x3d4] sm:$0xf]  ;;  %v4373_v43 = vpop.f32.mrf.mxu1 }
 0x2c9   : > { %v7391_v45 = vld [vmem:[%s12773_s4 + $0xc50] sm:$0xf]  ;;  %v7136_v10 = vor.u32 %v8253_v5, %v7135_v55  ;;  %4803 = vmatpush.bf16.msra.mxu0 %v7616_v34  ;;  %v6305_v34 = vld [vmem:[%s12773_s4 + $0x3f0] sm:$0xf0]  ;;  %v5295_v5 = vmax.f32 %v10778_v36, 0.0  ;;  %v4406_v44 = vpop.f32.mrf.mxu3 }
 0x2ca   : > { %v8317_v12 = vld [vmem:[%s12773_s4 + $0xc6c] sm:$0xf0]  ;;  %v8105_v55 = vld [vmem:[%s12773_s4 + $0x5d4] sm:$0xf]  ;;  %v6308_v7 = vor.u32 %v8041_v63, %v6305_v34  ;;  %v11329_v63 = vpop.f32.mrf.mxu0  ;;  %4747 = vmatmul.bf16.vlgmr.msrb.gmra.mxu1 %v9636_v23 }
 0x2cb   : > { %v7392_v1 = vor.u32 %v8317_v12, %v7391_v45  ;;  %4764 = vmatpush.bf16.msrb.mxu2 %v7136_v10  ;;  %v7103_v16 = vld [vmem:[%s12773_s4 + $0xa10] sm:$0xf]  ;;  %4815 = vmatpush.bf16.msra.mxu1 %v6052_v25  ;;  %v4357_v45 = vadd.f32 %v11141_v46, %v4338_v9  ;;  %v6561_v10 = vld [vmem:[%s12773_s4 + $0x5f0] sm:$0xf0]  ;;  %v4387_v25 = vpop.f32.mrf.mxu2 }
 0x2cc   : > { %v8245_v31 = vld [vmem:[%s12773_s4 + $0xa2c] sm:$0xf0]  ;;  %v6564_v12 = vor.u32 %v8105_v55, %v6561_v10  ;;  %v7961_v36 = vld [vmem:[%s12773_s4 + $0x154] sm:$0xf]  ;;  %4804 = vmatmul.bf16.vlgmr.msra.gmra.mxu0 %v9639_v27 }
 0x2cd   : > { %4783 = vmatpush.bf16.msrb.mxu3 %v7392_v1  ;;  %v7359_v13 = vld [vmem:[%s12773_s4 + $0xc10] sm:$0xf]  ;;  %v7104_v62 = vor.u32 %v8245_v31, %v7103_v16  ;;  %4872 = vmatpush.bf16.msrb.mxu0 %v6820_v61  ;;  %v5985_v46 = vld [vmem:[%s12773_s4 + $0x170] sm:$0xf0]  ;;  %v5296_v37 = vmax.f32 %v4357_v45, 0.0  ;;  %v5345_v16 = vmul.f32 %v11058_v59, %v5295_v5 }
 0x2ce   : > { %v8309_v40 = vld [vmem:[%s12773_s4 + $0xc2c] sm:$0xf0]  ;;  %v8153_v1 = vld [vmem:[%s12773_s4 + $0x754] sm:$0xf]  ;;  %v5988_v21 = vor.u32 %v7961_v36, %v5985_v46 }
 0x2cf   : > { %v7360_v52 = vor.u32 %v8309_v40, %v7359_v13  ;;  %4765 = vmatpush.bf16.msrb.mxu2 %v7104_v62  ;;  %4816 = vmatpush.bf16.msra.mxu1 %v6020_v50  ;;  %v6756_v54 = vor.u32 %v8153_v1, %v6753_v14  ;;  %v6273_v61 = vld [vmem:[%s12773_s4 + $0x3b0] sm:$0xf0]  ;;  %v5346_v31 = vmul.f32 %v11074_v4, %v5296_v37 }
 0x2d0   : > { %v8097_v20 = vld [vmem:[%s12773_s4 + $0x594] sm:$0xf]  ;;  %v4388_v13 = vadd.f32 %v4387_v25, %v4369_v49  ;;  %v6276_v26 = vor.u32 %v8033_v24, %v6273_v61 }
 0x2d1   : > { %4784 = vmatpush.bf16.msrb.mxu3 %v7360_v52  ;;  %4873 = vmatpush.bf16.msrb.mxu0 %v6788_v18  ;;  %v6532_v39 = vor.u32 %v8097_v20, %v6529_v29  ;;  %v7953_v62 = vld [vmem:[%s12773_s4 + $0x114] sm:$0xf]  ;;  %v11315_v40 = vadd.f32 %v5346_v31, %v5345_v16  ;;  %v4408_v25 = vpop.f32.mrf.mxu3  ;;  %v4375_v29 = vpop.f32.mrf.mxu1 }
 0x2d2   : > { %v5953_v59 = vld [vmem:[%s12773_s4 + $0x130] sm:$0xf0]  ;;  %v4407_v52 = vadd.f32 %v4406_v44, %v4388_v13  ;;  %4766 = vmatmul.bf16.vlgmr.msrb.gmra.mxu2 %v9678_v58 }
 0x2d3   : > { %4834 = vmatpush.bf16.msra.mxu2 %v6308_v7  ;;  %4817 = vmatpush.bf16.msra.mxu1 %v5988_v21  ;;  %v8145_v4 = vld [vmem:[%s12773_s4 + $0x714] sm:$0xf]  ;;  %v5956_v6 = vor.u32 %v7953_v62, %v5953_v59  ;;  %v4389_v1 = vpop.f32.mrf.mxu2 }
 0x2d4   : > { %v6724_v9 = vor.u32 %v8145_v4, %v6721_v33  ;;  %v8025_v50 = vld [vmem:[%s12773_s4 + $0x354] sm:$0xf]  ;;  %v11332_v34 = vadd.f32 %v11202_v57, %v4407_v52  ;;  %v11386_v52 = vpop.f32.mrf.mxu0  ;;  %4785 = vmatmul.bf16.vlgmr.msrb.gmra.mxu3 %v9683_v0 }
 0x2d5   : > { %4853 = vmatpush.bf16.msra.mxu3 %v6564_v12  ;;  %4874 = vmatpush.bf16.msrb.mxu0 %v6756_v54  ;;  %v6241_v17 = vld [vmem:[%s12773_s4 + $0x370] sm:$0xf0]  ;;  %v4371_v12 = vadd.f32 %v11258_v19, %v11253_v32 }
 0x2d6   : > { %v8089_v18 = vld [vmem:[%s12773_s4 + $0x554] sm:$0xf]  ;;  %v6244_v55 = vor.u32 %v8025_v50, %v6241_v17 }
 0x2d7   : > { %4835 = vmatpush.bf16.msra.mxu2 %v6276_v26  ;;  %4818 = vmatpush.bf16.msra.mxu1 %v5956_v6  ;;  %v6497_v5 = vld [vmem:[%s12773_s4 + $0x570] sm:$0xf0]  ;;  %v4390_v14 = vadd.f32 %v4389_v1, %v4371_v12 }
 0x2d8   : > { %v6500_v45 = vor.u32 %v8089_v18, %v6497_v5  ;;  %v7945_v7 = vld [vmem:[%s12773_s4 + $0xd4] sm:$0xf] }
 0x2d9   : > { %4854 = vmatpush.bf16.msra.mxu3 %v6532_v39  ;;  %4875 = vmatpush.bf16.msrb.mxu0 %v6724_v9  ;;  %v5921_v10 = vld [vmem:[%s12773_s4 + $0xf0] sm:$0xf0]  ;;  %v4409_v13 = vadd.f32 %v4408_v25, %v4390_v14 }
 0x2da   : > { %v8137_v57 = vld [vmem:[%s12773_s4 + $0x6d4] sm:$0xf]  ;;  %v5924_v36 = vor.u32 %v7945_v7, %v5921_v10  ;;  %4752 = vmatmul.bf16.gmra.mxu1 %v9752_v53 }
 0x2db   : > { %4836 = vmatpush.bf16.msra.mxu2 %v6244_v55  ;;  %v6689_v46 = vld [vmem:[%s12773_s4 + $0x6f0] sm:$0xf0]  ;;  %v11390_v6 = vadd.f32 %v11271_v38, %v4409_v13  ;;  %v4374_v55 = vadd.f32 %v4373_v43, %v11253_v32  ;;  %v4392_v7 = vpop.f32.mrf.mxu2 }
 0x2dc   : > { %v6692_v49 = vor.u32 %v8137_v57, %v6689_v46  ;;  %v8017_v37 = vld [vmem:[%s12773_s4 + $0x314] sm:$0xf]  ;;  %4819 = vmatpush.bf16.msra.mxu1 %v5924_v36  ;;  %v4411_v46 = vpop.f32.mrf.mxu3  ;;  %4809 = vmatmul.bf16.gmra.mxu0 %v9755_v56 }
 0x2dd   : > { %4855 = vmatpush.bf16.msra.mxu3 %v6500_v45  ;;  %v6209_v19 = vld [vmem:[%s12773_s4 + $0x330] sm:$0xf0]  ;;  %v4393_v36 = vadd.f32 %v4392_v7, %v4374_v55 }
 0x2de   : > { %v8081_v21 = vld [vmem:[%s12773_s4 + $0x514] sm:$0xf]  ;;  %v6212_v54 = vor.u32 %v8017_v37, %v6209_v19  ;;  %4876 = vmatpush.bf16.msrb.mxu0 %v6692_v49 }
 0x2df   : > { %v6465_v24 = vld [vmem:[%s12773_s4 + $0x530] sm:$0xf0]  ;;  %v4412_v25 = vadd.f32 %v4411_v46, %v4393_v36 }
 0x2e0   : > { %v6468_v61 = vor.u32 %v8081_v21, %v6465_v24  ;;  %v7937_v20 = vld [vmem:[%s12773_s4 + $0x94] sm:$0xf]  ;;  %4837 = vmatpush.bf16.msra.mxu2 %v6212_v54 }
 0x2e1   : > { %v5889_v16 = vld [vmem:[%s12773_s4 + $0xb0] sm:$0xf0] }
 0x2e2   : > { %v8129_v31 = vld [vmem:[%s12773_s4 + $0x694] sm:$0xf]  ;;  %v5892_v44 = vor.u32 %v7937_v20, %v5889_v16  ;;  %4856 = vmatpush.bf16.msra.mxu3 %v6468_v61  ;;  %v4444_v61 = vpop.f32.mrf.mxu1  ;;  %4771 = vmatmul.bf16.gmra.mxu2 %v9794_v22 }
 0x2e3   : > { %v6657_v26 = vld [vmem:[%s12773_s4 + $0x6b0] sm:$0xf0]  ;;  %v11440_v13 = vadd.f32 %v4444_v61, %v11332_v34 }
 0x2e4   : > { %v6660_v39 = vor.u32 %v8129_v31, %v6657_v26  ;;  %v8009_v62 = vld [vmem:[%s12773_s4 + $0x2d4] sm:$0xf]  ;;  %4820 = vmatpush.bf16.msra.mxu1 %v5892_v44  ;;  %v11442_v44 = vpop.f32.mrf.mxu0  ;;  %v11445_v26 = vadd.f32 %v11329_v63, %v4412_v25  ;;  %4790 = vmatmul.bf16.gmra.mxu3 %v9799_v28 }
 0x2e5   : > { %v6177_v59 = vld [vmem:[%s12773_s4 + $0x2f0] sm:$0xf0] }
 0x2e6   : > { %v8073_v4 = vld [vmem:[%s12773_s4 + $0x4d4] sm:$0xf]  ;;  %v6180_v33 = vor.u32 %v8009_v62, %v6177_v59  ;;  %4877 = vmatpush.bf16.msrb.mxu0 %v6660_v39 }
 0x2e7   : > { %v6433_v9 = vld [vmem:[%s12773_s4 + $0x4f0] sm:$0xf0] }
 0x2e8   : > { %v6436_v50 = vor.u32 %v8073_v4, %v6433_v9  ;;  %v7929_v17 = vld [vmem:[%s12773_s4 + $0x54] sm:$0xf]  ;;  %4838 = vmatpush.bf16.msra.mxu2 %v6180_v33  ;;  %v4376_v9 = vadd.f32 %v4375_v29, %v11253_v32 }
 0x2e9   : > { %v5857_v18 = vld [vmem:[%s12773_s4 + $0x70] sm:$0xf0] }
 0x2ea   : > { %v8121_v38 = vld [vmem:[%s12773_s4 + $0x654] sm:$0xf]  ;;  %v5860_v5 = vor.u32 %v7929_v17, %v5857_v18  ;;  %4857 = vmatpush.bf16.msra.mxu3 %v6436_v50  ;;  %v4394_v18 = vpop.f32.mrf.mxu2 }
 0x2eb   : > { %v6625_v45 = vld [vmem:[%s12773_s4 + $0x670] sm:$0xf0] }
 0x2ec   : > { %v6628_v10 = vor.u32 %v8121_v38, %v6625_v45  ;;  %v8001_v57 = vld [vmem:[%s12773_s4 + $0x294] sm:$0xf]  ;;  %4821 = vmatpush.bf16.msra.mxu1 %v5860_v5  ;;  %v4395_v5 = vadd.f32 %v4394_v18, %v4376_v9  ;;  %v4413_v45 = vpop.f32.mrf.mxu3 }
 0x2ed   : > { %v6145_v12 = vld [vmem:[%s12773_s4 + $0x2b0] sm:$0xf0] }
 0x2ee   : > { %v8065_v43 = vld [vmem:[%s12773_s4 + $0x494] sm:$0xf]  ;;  %v6148_v1 = vor.u32 %v8001_v57, %v6145_v12  ;;  %4878 = vmatpush.bf16.msrb.mxu0 %v6628_v10  ;;  %v4414_v46 = vadd.f32 %v4413_v45, %v4395_v5 }
 0x2ef   : > { %v6401_v49 = vld [vmem:[%s12773_s4 + $0x4b0] sm:$0xf0] }
 0x2f0   : > { %v6404_v37 = vor.u32 %v8065_v43, %v6401_v49  ;;  %v7921_v19 = vld [vmem:[%s12773_s4 + $0x14] sm:$0xf]  ;;  %4839 = vmatpush.bf16.msra.mxu2 %v6148_v1  ;;  %v11508_v61 = vadd.f32 %v11386_v52, %v4414_v46 }
 0x2f1   : > { %v5825_v21 = vld [vmem:[%s12773_s4 + $0x30] sm:$0xf0] }
 0x2f2   : > { %v8113_v14 = vld [vmem:[%s12773_s4 + $0x614] sm:$0xf]  ;;  %v5828_v54 = vor.u32 %v7921_v19, %v5825_v21  ;;  %4858 = vmatpush.bf16.msra.mxu3 %v6404_v37  ;;  %v4446_v37 = vpop.f32.mrf.mxu1 }
 0x2f3   : > { %v6593_v24 = vld [vmem:[%s12773_s4 + $0x630] sm:$0xf0] }
 0x2f4   : > { %v6596_v20 = vor.u32 %v8113_v14, %v6593_v24  ;;  %v7993_v16 = vld [vmem:[%s12773_s4 + $0x254] sm:$0xf]  ;;  %4822 = vmatpush.bf16.msra.mxu1 %v5828_v54  ;;  %v11502_v54 = vadd.f32 %v4446_v37, %v11390_v6  ;;  %v11504_v24 = vpop.f32.mrf.mxu0 }
 0x2f5   : > { %v6113_v31 = vld [vmem:[%s12773_s4 + $0x270] sm:$0xf0] }
 0x2f6   : > { %v6116_v39 = vor.u32 %v7993_v16, %v6113_v31  ;;  %v8057_v62 = vld [vmem:[%s12773_s4 + $0x454] sm:$0xf]  ;;  %4879 = vmatpush.bf16.msrb.mxu0 %v6596_v20 }
 0x2f7   : > { %v6369_v59 = vld [vmem:[%s12773_s4 + $0x470] sm:$0xf0]  ;;  %4823 = vmatmul.bf16.vlgmr.msra.gmra.mxu1 %v9386_v41 }
 0x2f8   : > { %v6372_v4 = vor.u32 %v8057_v62, %v6369_v59  ;;  %v8233_v34 = vld [vmem:[%s12773_s4 + $0x9d4] sm:$0xf]  ;;  %4840 = vmatpush.bf16.msra.mxu2 %v6116_v39 }
 0x2f9   : > { %v7073_v63 = vld [vmem:[%s12773_s4 + $0x9f0] sm:$0xf0]  ;;  %4880 = vmatmul.bf16.vlgmr.msrb.gmra.mxu0 %v9395_v47 }
 0x2fa   : > { %v8425_v33 = vld [vmem:[%s12773_s4 + $0xfd4] sm:$0xf]  ;;  %v7076_v50 = vor.u32 %v8233_v34, %v7073_v63  ;;  %4859 = vmatpush.bf16.msra.mxu3 %v6372_v4  ;;  %v4463_v4 = vpop.f32.mrf.mxu2 }
 0x2fb   : > { %v7841_v17 = vld [vmem:[%s12773_s4 + $0xff0] sm:$0xf0] }
 0x2fc   : > { %v7844_v38 = vor.u32 %v8425_v33, %v7841_v17  ;;  %v7985_v55 = vld [vmem:[%s12773_s4 + $0x214] sm:$0xf]  ;;  %4891 = vmatpush.bf16.msrb.mxu1 %v7076_v50  ;;  %v4464_v50 = vadd.f32 %v4463_v4, %v11440_v13  ;;  %v4482_v17 = vpop.f32.mrf.mxu3  ;;  %v11567_v37 = vpop.f32.mrf.mxu0 }
 0x2fd   : > { %v6081_v32 = vld [vmem:[%s12773_s4 + $0x230] sm:$0xf0] }
 0x2fe   : > { %v8049_v29 = vld [vmem:[%s12773_s4 + $0x414] sm:$0xf]  ;;  %v6084_v7 = vor.u32 %v7985_v55, %v6081_v32  ;;  %4948 = vmatpush.bf16.msra.mxu0 %v7844_v38  ;;  %v4483_v5 = vadd.f32 %v4482_v17, %v4464_v50 }
 0x2ff   : > { %v6337_v10 = vld [vmem:[%s12773_s4 + $0x430] sm:$0xf0] }
 0x300   : > { %v6340_v57 = vor.u32 %v8049_v29, %v6337_v10  ;;  %v8225_v12 = vld [vmem:[%s12773_s4 + $0x994] sm:$0xf]  ;;  %4841 = vmatpush.bf16.msra.mxu2 %v6084_v7  ;;  %v4449_v10 = vpop.f32.mrf.mxu1  ;;  %v4502_v46 = vadd.f32 %v11442_v44, %v4483_v5 }
 0x301   : > { %v7041_v43 = vld [vmem:[%s12773_s4 + $0x9b0] sm:$0xf0] }
 0x302   : > { %v8417_v36 = vld [vmem:[%s12773_s4 + $0xf94] sm:$0xf]  ;;  %v7044_v1 = vor.u32 %v8225_v12, %v7041_v43  ;;  %4860 = vmatpush.bf16.msra.mxu3 %v6340_v57 }
 0x303   : > { %v7809_v49 = vld [vmem:[%s12773_s4 + $0xfb0] sm:$0xf0]  ;;  %4842 = vmatmul.bf16.vlgmr.msra.gmra.mxu2 %v9431_v11 }
 0x304   : > { %v7812_v19 = vor.u32 %v8417_v36, %v7809_v49  ;;  %v8297_v21 = vld [vmem:[%s12773_s4 + $0xbd4] sm:$0xf]  ;;  %4892 = vmatpush.bf16.msrb.mxu1 %v7044_v1  ;;  %v11562_v1 = vperm.slane %v11029_v42, 2  ;;  %v11565_v49 = vadd.f32 %v4449_v10, %v11445_v26 }
 0x305   : > { %v7329_v14 = vld [vmem:[%s12773_s4 + $0xbf0] sm:$0xf0]  ;;  %4861 = vmatmul.bf16.vlgmr.msra.gmra.mxu3 %v9439_v15 }
 0x306   : > { %v8361_v25 = vld [vmem:[%s12773_s4 + $0xdd4] sm:$0xf]  ;;  %v7332_v20 = vor.u32 %v8297_v21, %v7329_v14  ;;  %4949 = vmatpush.bf16.msra.mxu0 %v7812_v19 }
 0x307   : > { %v7585_v16 = vld [vmem:[%s12773_s4 + $0xdf0] sm:$0xf0]  ;;  %4828 = vmatmul.bf16.gmra.mxu1 %v9502_v60 }
 0x308   : > { %v7588_v31 = vor.u32 %v8361_v25, %v7585_v16  ;;  %v8217_v6 = vld [vmem:[%s12773_s4 + $0x954] sm:$0xf]  ;;  %4910 = vmatpush.bf16.msrb.mxu2 %v7332_v20  ;;  %v5273_v25 = vmax.f32 %v4502_v46, 0.0 }
 0x309   : > { %v7009_v39 = vld [vmem:[%s12773_s4 + $0x970] sm:$0xf0]  ;;  %4885 = vmatmul.bf16.gmra.mxu0 %v9511_v2 }
 0x30a   : > { %v8409_v52 = vld [vmem:[%s12773_s4 + $0xf54] sm:$0xf]  ;;  %v7012_v62 = vor.u32 %v8217_v6, %v7009_v39  ;;  %4929 = vmatpush.bf16.msrb.mxu3 %v7588_v31  ;;  %v4465_v31 = vpop.f32.mrf.mxu2 }
 0x30b   : > { %v7777_v59 = vld [vmem:[%s12773_s4 + $0xf70] sm:$0xf0]  ;;  %v4466_v4 = vadd.f32 %v4465_v31, %v11502_v54 }
 0x30c   : > { %v7780_v34 = vor.u32 %v8409_v52, %v7777_v59  ;;  %v8289_v63 = vld [vmem:[%s12773_s4 + $0xb94] sm:$0xf]  ;;  %4893 = vmatpush.bf16.msrb.mxu1 %v7012_v62  ;;  %v5323_v59 = vmul.f32 %v11562_v1, %v5273_v25 }
 0x30d   : > { %v7297_v33 = vld [vmem:[%s12773_s4 + $0xbb0] sm:$0xf0] }
 0x30e   : > { %v8353_v9 = vld [vmem:[%s12773_s4 + $0xd94] sm:$0xf]  ;;  %v7300_v18 = vor.u32 %v8289_v63, %v7297_v33  ;;  %4950 = vmatpush.bf16.msra.mxu0 %v7780_v34  ;;  %v4484_v34 = vpop.f32.mrf.mxu3 }
 0x30f   : > { %v7553_v38 = vld [vmem:[%s12773_s4 + $0xdb0] sm:$0xf0] }
 0x310   : > { %v7556_v55 = vor.u32 %v8353_v9, %v7553_v38  ;;  %v8209_v32 = vld [vmem:[%s12773_s4 + $0x914] sm:$0xf]  ;;  %4911 = vmatpush.bf16.msrb.mxu2 %v7300_v18  ;;  %v11610_v18 = vadd.f32 %v11122_v3, %v5323_v59  ;;  %v4485_v38 = vadd.f32 %v4484_v34, %v4466_v4 }
 0x311   : > { %v6977_v29 = vld [vmem:[%s12773_s4 + $0x930] sm:$0xf0] }
 0x312   : > { %v8401_v13 = vld [vmem:[%s12773_s4 + $0xf14] sm:$0xf]  ;;  %v6980_v45 = vor.u32 %v8209_v32, %v6977_v29  ;;  %4930 = vmatpush.bf16.msrb.mxu3 %v7556_v55  ;;  %v4451_v29 = vpop.f32.mrf.mxu1 }
 0x313   : > { %v7745_v7 = vld [vmem:[%s12773_s4 + $0xf30] sm:$0xf0]  ;;  %v11626_v10 = vadd.f32 %v4451_v29, %v11508_v61  ;;  %4847 = vmatmul.bf16.gmra.mxu2 %v9547_v30 }
 0x314   : > { %v7748_v57 = vor.u32 %v8401_v13, %v7745_v7  ;;  %v8281_v12 = vld [vmem:[%s12773_s4 + $0xb54] sm:$0xf]  ;;  %4894 = vmatpush.bf16.msrb.mxu1 %v6980_v45  ;;  %v4504_v7 = vadd.f32 %v11504_v24, %v4485_v38 }
 0x315   : > { %v7265_v43 = vld [vmem:[%s12773_s4 + $0xb70] sm:$0xf0]  ;;  %4866 = vmatmul.bf16.gmra.mxu3 %v9558_v35 }
 0x316   : > { %v8345_v36 = vld [vmem:[%s12773_s4 + $0xd54] sm:$0xf]  ;;  %v7268_v19 = vor.u32 %v8281_v12, %v7265_v43  ;;  %4951 = vmatpush.bf16.msra.mxu0 %v7748_v57  ;;  %v11628_v57 = vpop.f32.mrf.mxu0 }
 0x317   : > { %v7521_v21 = vld [vmem:[%s12773_s4 + $0xd70] sm:$0xf0] }
 0x318   : > { %v7524_v14 = vor.u32 %v8345_v36, %v7521_v21  ;;  %v8201_v44 = vld [vmem:[%s12773_s4 + $0x8d4] sm:$0xf]  ;;  %4912 = vmatpush.bf16.msrb.mxu2 %v7268_v19  ;;  %v5281_v19 = vmax.f32 %v4504_v7, 0.0 }
 0x319   : > { %v6945_v42 = vld [vmem:[%s12773_s4 + $0x8f0] sm:$0xf0] }
 0x31a   : > { %v8393_v26 = vld [vmem:[%s12773_s4 + $0xed4] sm:$0xf]  ;;  %v6948_v20 = vor.u32 %v8201_v44, %v6945_v42  ;;  %4931 = vmatpush.bf16.msrb.mxu3 %v7524_v14  ;;  %v4468_v44 = vpop.f32.mrf.mxu2 }
 0x31b   : > { %v7713_v16 = vld [vmem:[%s12773_s4 + $0xef0] sm:$0xf0]  ;;  %v4469_v31 = vadd.f32 %v4468_v44, %v11565_v49 }
 0x31c   : > { %v7716_v6 = vor.u32 %v8393_v26, %v7713_v16  ;;  %v8273_v39 = vld [vmem:[%s12773_s4 + $0xb14] sm:$0xf]  ;;  %4895 = vmatpush.bf16.msrb.mxu1 %v6948_v20  ;;  %v5331_v16 = vmul.f32 %v11562_v1, %v5281_v19 }
 0x31d   : > { %v7233_v52 = vld [vmem:[%s12773_s4 + $0xb30] sm:$0xf0] }
 0x31e   : > { %v8337_v62 = vld [vmem:[%s12773_s4 + $0xd14] sm:$0xf]  ;;  %v7236_v63 = vor.u32 %v8273_v39, %v7233_v52  ;;  %4952 = vmatpush.bf16.msra.mxu0 %v7716_v6  ;;  %v4487_v6 = vpop.f32.mrf.mxu3  ;;  %v11671_v34 = vadd.f32 %v11184_v51, %v5331_v16  ;;  %v7974_v16 = vld [vmem:[%s12773_s4 + $0x1b4] sm:$0xf0] }
 0x31f   : > { %v7489_v33 = vld [vmem:[%s12773_s4 + $0xd30] sm:$0xf0] }
 0x320   : > { %v7492_v9 = vor.u32 %v8337_v62, %v7489_v33  ;;  %v8193_v50 = vld [vmem:[%s12773_s4 + $0x894] sm:$0xf]  ;;  %4913 = vmatpush.bf16.msrb.mxu2 %v7236_v63  ;;  %v4488_v63 = vadd.f32 %v4487_v6, %v4469_v31  ;;  %v11734_v6 = vperm.slane %v11250_v8, 3  ;;  %v6567_v8 = vld [vmem:[%s12773_s4 + $0x5d8] sm:$0xf] }
 0x321   : > { %v6913_v17 = vld [vmem:[%s12773_s4 + $0x8b0] sm:$0xf0] }
 0x322   : > { %v8385_v54 = vld [vmem:[%s12773_s4 + $0xe94] sm:$0xf]  ;;  %v6916_v55 = vor.u32 %v8193_v50, %v6913_v17  ;;  %4932 = vmatpush.bf16.msrb.mxu3 %v7492_v9  ;;  %v11676_v50 = vpop.f32.mrf.mxu1 }
 0x323   : > { %v7681_v32 = vld [vmem:[%s12773_s4 + $0xeb0] sm:$0xf0] }
 0x324   : > { %v7684_v13 = vor.u32 %v8385_v54, %v7681_v32  ;;  %v8265_v5 = vld [vmem:[%s12773_s4 + $0xad4] sm:$0xf]  ;;  %4896 = vmatpush.bf16.msrb.mxu1 %v6916_v55  ;;  %v4507_v55 = vadd.f32 %v11567_v37, %v4488_v63  ;;  %v11688_v32 = vpop.f32.mrf.mxu0  ;;  %v6823_v37 = vld [vmem:[%s12773_s4 + $0x7d8] sm:$0xf] }
 0x325   : > { %v7201_v45 = vld [vmem:[%s12773_s4 + $0xaf0] sm:$0xf0] }
 0x326   : > { %v8329_v3 = vld [vmem:[%s12773_s4 + $0xcd4] sm:$0xf]  ;;  %v7204_v12 = vor.u32 %v8265_v5, %v7201_v45  ;;  %4953 = vmatpush.bf16.msra.mxu0 %v7684_v13  ;;  %v6055_v45 = vld [vmem:[%s12773_s4 + $0x1d8] sm:$0xf]  ;;  %v5289_v7 = vmax.f32 %v4507_v55, 0.0  ;;  %v4489_v44 = vpop.f32.mrf.mxu3  ;;  %v4521_v55 = vadd.f32 %v11676_v50, %v11734_v6 }
 0x327   : > { %v7457_v43 = vld [vmem:[%s12773_s4 + $0xcf0] sm:$0xf0]  ;;  %v6535_v50 = vld [vmem:[%s12773_s4 + $0x598] sm:$0xf] }
 0x328   : > { %v7460_v36 = vor.u32 %v8329_v3, %v7457_v43  ;;  %v8185_v24 = vld [vmem:[%s12773_s4 + $0x854] sm:$0xf]  ;;  %4914 = vmatpush.bf16.msrb.mxu2 %v7204_v12  ;;  %v7982_v3 = vld [vmem:[%s12773_s4 + $0x1f4] sm:$0xf0] }
 0x329   : > { %v6881_v61 = vld [vmem:[%s12773_s4 + $0x870] sm:$0xf0]  ;;  %v6056_v12 = vor.u32 %v7982_v3, %v6055_v45  ;;  %v8174_v43 = vld [vmem:[%s12773_s4 + $0x7f4] sm:$0xf0] }
 0x32a   : > { %v8377_v46 = vld [vmem:[%s12773_s4 + $0xe54] sm:$0xf]  ;;  %v6884_v21 = vor.u32 %v8185_v24, %v6881_v61  ;;  %4933 = vmatpush.bf16.msrb.mxu3 %v7460_v36  ;;  %v4470_v36 = vpop.f32.mrf.mxu2  ;;  %v6824_v24 = vor.u32 %v8174_v43, %v6823_v37  ;;  %v6279_v37 = vld [vmem:[%s12773_s4 + $0x398] sm:$0xf] }
 0x32b   : > { %v7649_v14 = vld [vmem:[%s12773_s4 + $0xe70] sm:$0xf0] }
 0x32c   : > { %v7652_v42 = vor.u32 %v8377_v46, %v7649_v14  ;;  %v8257_v26 = vld [vmem:[%s12773_s4 + $0xa94] sm:$0xf]  ;;  %4897 = vmatpush.bf16.msrb.mxu1 %v6884_v21  ;;  %v5339_v21 = vmul.f32 %v11562_v1, %v5289_v7  ;;  %v4471_v14 = vadd.f32 %v4470_v36, %v11626_v10  ;;  %v6791_v10 = vld [vmem:[%s12773_s4 + $0x798] sm:$0xf] }
 0x32d   : > { %v7169_v25 = vld [vmem:[%s12773_s4 + $0xab0] sm:$0xf0]  ;;  %v8038_v7 = vld [vmem:[%s12773_s4 + $0x3b4] sm:$0xf0] }
 0x32e   : > { %v8321_v20 = vld [vmem:[%s12773_s4 + $0xc94] sm:$0xf]  ;;  %v7172_v39 = vor.u32 %v8257_v26, %v7169_v25  ;;  %4954 = vmatpush.bf16.msra.mxu0 %v7652_v42  ;;  %v11731_v31 = vadd.f32 %v11245_v48, %v5339_v21  ;;  %v8046_v48 = vld [vmem:[%s12773_s4 + $0x3f4] sm:$0xf0]  ;;  %v4558_v36 = vpop.f32.mrf.mxu3 }
 0x32f   : > { %v7425_v52 = vld [vmem:[%s12773_s4 + $0xcb0] sm:$0xf0]  ;;  %v7958_v21 = vld [vmem:[%s12773_s4 + $0x134] sm:$0xf0] }
 0x330   : > { %v7428_v62 = vor.u32 %v8321_v20, %v7425_v52  ;;  %v8177_v59 = vld [vmem:[%s12773_s4 + $0x814] sm:$0xf]  ;;  %4915 = vmatpush.bf16.msrb.mxu2 %v7172_v39  ;;  %v6023_v20 = vld [vmem:[%s12773_s4 + $0x198] sm:$0xf]  ;;  %v4490_v39 = vadd.f32 %v4489_v44, %v4471_v14 }
 0x331   : > { %v6849_v4 = vld [vmem:[%s12773_s4 + $0x830] sm:$0xf0]  ;;  %v6024_v52 = vor.u32 %v7974_v16, %v6023_v20  ;;  %v6247_v16 = vld [vmem:[%s12773_s4 + $0x358] sm:$0xf] }
 0x332   : > { %v8369_v49 = vld [vmem:[%s12773_s4 + $0xe14] sm:$0xf]  ;;  %v6852_v33 = vor.u32 %v8177_v59, %v6849_v4  ;;  %4934 = vmatpush.bf16.msrb.mxu3 %v7428_v62  ;;  %v8166_v62 = vld [vmem:[%s12773_s4 + $0x7b4] sm:$0xf0]  ;;  %v4522_v59 = vpop.f32.mrf.mxu1  ;;  %v4509_v63 = vadd.f32 %v11628_v57, %v4490_v39  ;;  %v4539_v45 = vpop.f32.mrf.mxu2 }
 0x333   : > { %v7617_v9 = vld [vmem:[%s12773_s4 + $0xe30] sm:$0xf0]  ;;  %v6792_v4 = vor.u32 %v8166_v62, %v6791_v10  ;;  %v7966_v57 = vld [vmem:[%s12773_s4 + $0x174] sm:$0xf0]  ;;  %v4540_v43 = vadd.f32 %v4539_v45, %v4521_v55 }
 0x334   : > { %v7620_v17 = vor.u32 %v8369_v49, %v7617_v9  ;;  %v8249_v54 = vld [vmem:[%s12773_s4 + $0xa54] sm:$0xf]  ;;  %4898 = vmatpush.bf16.msrb.mxu1 %v6852_v33  ;;  %v6311_v49 = vld [vmem:[%s12773_s4 + $0x3d8] sm:$0xf]  ;;  %v11749_v33 = vpop.f32.mrf.mxu0 }
 0x335   : > { %v7137_v51 = vld [vmem:[%s12773_s4 + $0xa70] sm:$0xf0]  ;;  %v6312_v9 = vor.u32 %v8046_v48, %v6311_v49  ;;  %v4559_v44 = vadd.f32 %v4558_v36, %v4540_v43  ;;  %v8030_v10 = vld [vmem:[%s12773_s4 + $0x374] sm:$0xf0] }
 0x336   : > { %v8313_v38 = vld [vmem:[%s12773_s4 + $0xc54] sm:$0xf]  ;;  %v7140_v29 = vor.u32 %v8249_v54, %v7137_v51  ;;  %4955 = vmatpush.bf16.msra.mxu0 %v7620_v17  ;;  %v8110_v17 = vld [vmem:[%s12773_s4 + $0x5f4] sm:$0xf0]  ;;  %v6248_v62 = vor.u32 %v8030_v10, %v6247_v16 }
 0x337   : > { %v7393_v13 = vld [vmem:[%s12773_s4 + $0xc70] sm:$0xf0]  ;;  %v6568_v54 = vor.u32 %v8110_v17, %v6567_v8  ;;  %v5991_v51 = vld [vmem:[%s12773_s4 + $0x158] sm:$0xf]  ;;  %4899 = vmatmul.bf16.vlgmr.msrb.gmra.mxu1 %v9636_v23 }
 0x338   : > { %v7396_v5 = vor.u32 %v8313_v38, %v7393_v13  ;;  %4916 = vmatpush.bf16.msrb.mxu2 %v7140_v29  ;;  %v8241_v61 = vld [vmem:[%s12773_s4 + $0xa14] sm:$0xf]  ;;  %4967 = vmatpush.bf16.msra.mxu1 %v6056_v12  ;;  %v6759_v38 = vld [vmem:[%s12773_s4 + $0x758] sm:$0xf]  ;;  %v5297_v29 = vmax.f32 %v4509_v63, 0.0  ;;  %v5992_v13 = vor.u32 %v7966_v57, %v5991_v51  ;;  %v4523_v63 = vadd.f32 %v4522_v59, %v11734_v6 }
 0x339   : > { %v7105_v46 = vld [vmem:[%s12773_s4 + $0xa30] sm:$0xf0]  ;;  %v5927_v48 = vld [vmem:[%s12773_s4 + $0xd8] sm:$0xf]  ;;  %4956 = vmatmul.bf16.vlgmr.msra.gmra.mxu0 %v9639_v27 }
 0x33a   : > { %4935 = vmatpush.bf16.msrb.mxu3 %v7396_v5  ;;  %v8305_v19 = vld [vmem:[%s12773_s4 + $0xc14] sm:$0xf]  ;;  %v7108_v42 = vor.u32 %v8241_v61, %v7105_v46  ;;  %5024 = vmatpush.bf16.msrb.mxu0 %v6824_v24  ;;  %v8158_v5 = vld [vmem:[%s12773_s4 + $0x774] sm:$0xf0]  ;;  %v5347_v12 = vmul.f32 %v11562_v1, %v5297_v29  ;;  %v6280_v24 = vor.u32 %v8038_v7, %v6279_v37  ;;  %v4560_v29 = vpop.f32.mrf.mxu3 }
 0x33b   : > { %v7361_v26 = vld [vmem:[%s12773_s4 + $0xc30] sm:$0xf0]  ;;  %v6760_v3 = vor.u32 %v8158_v5, %v6759_v38  ;;  %v8102_v61 = vld [vmem:[%s12773_s4 + $0x5b4] sm:$0xf0] }
 0x33c   : > { %v7364_v25 = vor.u32 %v8305_v19, %v7361_v26  ;;  %4917 = vmatpush.bf16.msrb.mxu2 %v7108_v42  ;;  %4968 = vmatpush.bf16.msra.mxu1 %v6024_v52  ;;  %v6536_v46 = vor.u32 %v8102_v61, %v6535_v50  ;;  %v5959_v19 = vld [vmem:[%s12773_s4 + $0x118] sm:$0xf]  ;;  %v11793_v14 = vadd.f32 %v11315_v40, %v5347_v12  ;;  %v11807_v39 = vpop.f32.mrf.mxu0 }
 0x33d   : > { %v6727_v1 = vld [vmem:[%s12773_s4 + $0x718] sm:$0xf]  ;;  %v5960_v42 = vor.u32 %v7958_v21, %v5959_v19  ;;  %v11810_v52 = vadd.f32 %v11688_v32, %v4559_v44 }
 0x33e   : > { %4936 = vmatpush.bf16.msrb.mxu3 %v7364_v25  ;;  %5025 = vmatpush.bf16.msrb.mxu0 %v6792_v4  ;;  %v8150_v26 = vld [vmem:[%s12773_s4 + $0x734] sm:$0xf0]  ;;  %v4525_v25 = vpop.f32.mrf.mxu1 }
 0x33f   : > { %v6728_v20 = vor.u32 %v8150_v26, %v6727_v1  ;;  %v6503_v40 = vld [vmem:[%s12773_s4 + $0x558] sm:$0xf]  ;;  %v4526_v10 = vadd.f32 %v4525_v25, %v11734_v6  ;;  %4918 = vmatmul.bf16.vlgmr.msrb.gmra.mxu2 %v9678_v58 }
 0x340   : > { %4986 = vmatpush.bf16.msra.mxu2 %v6312_v9  ;;  %4969 = vmatpush.bf16.msra.mxu1 %v5992_v13  ;;  %v8094_v4 = vld [vmem:[%s12773_s4 + $0x574] sm:$0xf0] }
 0x341   : > { %v6504_v49 = vor.u32 %v8094_v4, %v6503_v40  ;;  %v7950_v8 = vld [vmem:[%s12773_s4 + $0xf4] sm:$0xf0]  ;;  %4937 = vmatmul.bf16.vlgmr.msrb.gmra.mxu3 %v9683_v0 }
 0x342   : > { %5005 = vmatpush.bf16.msra.mxu3 %v6568_v54  ;;  %5026 = vmatpush.bf16.msrb.mxu0 %v6760_v3  ;;  %v6695_v32 = vld [vmem:[%s12773_s4 + $0x6d8] sm:$0xf]  ;;  %v5928_v9 = vor.u32 %v7950_v8, %v5927_v48  ;;  %v4541_v54 = vpop.f32.mrf.mxu2 }
 0x343   : > { %v8142_v17 = vld [vmem:[%s12773_s4 + $0x6f4] sm:$0xf0]  ;;  %v4542_v55 = vadd.f32 %v4541_v54, %v4523_v63  ;;  %v4563_v63 = vpop.f32.mrf.mxu3 }
 0x344   : > { %4987 = vmatpush.bf16.msra.mxu2 %v6280_v24  ;;  %4970 = vmatpush.bf16.msra.mxu1 %v5960_v42  ;;  %v6696_v51 = vor.u32 %v8142_v17, %v6695_v32  ;;  %v6215_v57 = vld [vmem:[%s12773_s4 + $0x318] sm:$0xf]  ;;  %v11863_v21 = vpop.f32.mrf.mxu0 }
 0x345   : > { %v8022_v59 = vld [vmem:[%s12773_s4 + $0x334] sm:$0xf0]  ;;  %v4561_v50 = vadd.f32 %v4560_v29, %v4542_v55 }
 0x346   : > { %5006 = vmatpush.bf16.msra.mxu3 %v6536_v46  ;;  %5027 = vmatpush.bf16.msrb.mxu0 %v6728_v20  ;;  %v6471_v38 = vld [vmem:[%s12773_s4 + $0x518] sm:$0xf]  ;;  %v6216_v13 = vor.u32 %v8022_v59, %v6215_v57  ;;  %v4527_v36 = vpop.f32.mrf.mxu1 }
 0x347   : > { %v8086_v5 = vld [vmem:[%s12773_s4 + $0x534] sm:$0xf0]  ;;  %v11867_v1 = vadd.f32 %v11749_v33, %v4561_v50  ;;  %4904 = vmatmul.bf16.gmra.mxu1 %v9752_v53 }
 0x348   : > { %4988 = vmatpush.bf16.msra.mxu2 %v6248_v62  ;;  %4971 = vmatpush.bf16.msra.mxu1 %v5928_v9  ;;  %v6472_v45 = vor.u32 %v8086_v5, %v6471_v38  ;;  %v5895_v3 = vld [vmem:[%s12773_s4 + $0x98] sm:$0xf] }
 0x349   : > { %v7942_v37 = vld [vmem:[%s12773_s4 + $0xb4] sm:$0xf0]  ;;  %4961 = vmatmul.bf16.gmra.mxu0 %v9755_v56 }
 0x34a   : > { %5007 = vmatpush.bf16.msra.mxu3 %v6504_v49  ;;  %5028 = vmatpush.bf16.msrb.mxu0 %v6696_v51  ;;  %v6663_v7 = vld [vmem:[%s12773_s4 + $0x698] sm:$0xf]  ;;  %v5896_v12 = vor.u32 %v7942_v37, %v5895_v3  ;;  %v4544_v4 = vpop.f32.mrf.mxu2 }
 0x34b   : > { %v8134_v43 = vld [vmem:[%s12773_s4 + $0x6b4] sm:$0xf0]  ;;  %v4545_v32 = vadd.f32 %v4544_v4, %v4526_v10  ;;  %v4565_v10 = vpop.f32.mrf.mxu3 }
 0x34c   : > { %4989 = vmatpush.bf16.msra.mxu2 %v6216_v13  ;;  %v6664_v24 = vor.u32 %v8134_v43, %v6663_v7  ;;  %v6183_v61 = vld [vmem:[%s12773_s4 + $0x2d8] sm:$0xf]  ;;  %4972 = vmatpush.bf16.msra.mxu1 %v5896_v12  ;;  %v11919_v7 = vpop.f32.mrf.mxu0 }
 0x34d   : > { %v8014_v46 = vld [vmem:[%s12773_s4 + $0x2f4] sm:$0xf0]  ;;  %v4564_v38 = vadd.f32 %v4563_v63, %v4545_v32 }
 0x34e   : > { %5008 = vmatpush.bf16.msra.mxu3 %v6472_v45  ;;  %v6439_v19 = vld [vmem:[%s12773_s4 + $0x4d8] sm:$0xf]  ;;  %v6184_v44 = vor.u32 %v8014_v46, %v6183_v61  ;;  %5029 = vmatpush.bf16.msrb.mxu0 %v6664_v24  ;;  %v4596_v13 = vpop.f32.mrf.mxu1 }
 0x34f   : > { %v8078_v42 = vld [vmem:[%s12773_s4 + $0x4f4] sm:$0xf0]  ;;  %v11917_v37 = vadd.f32 %v4596_v13, %v11810_v52  ;;  %v11922_v50 = vadd.f32 %v11807_v39, %v4564_v38  ;;  %4923 = vmatmul.bf16.gmra.mxu2 %v9794_v22 }
 0x350   : > { %v6440_v26 = vor.u32 %v8078_v42, %v6439_v19  ;;  %v5863_v20 = vld [vmem:[%s12773_s4 + $0x58] sm:$0xf]  ;;  %4990 = vmatpush.bf16.msra.mxu2 %v6184_v44  ;;  %v4528_v19 = vadd.f32 %v4527_v36, %v11734_v6 }
 0x351   : > { %v7934_v16 = vld [vmem:[%s12773_s4 + $0x74] sm:$0xf0]  ;;  %4942 = vmatmul.bf16.gmra.mxu3 %v9799_v28 }
 0x352   : > { %v6631_v33 = vld [vmem:[%s12773_s4 + $0x658] sm:$0xf]  ;;  %v5864_v40 = vor.u32 %v7934_v16, %v5863_v20  ;;  %5009 = vmatpush.bf16.msra.mxu3 %v6440_v26  ;;  %v4546_v26 = vpop.f32.mrf.mxu2 }
 0x353   : > { %v8126_v62 = vld [vmem:[%s12773_s4 + $0x674] sm:$0xf0] }
 0x354   : > { %v6632_v49 = vor.u32 %v8126_v62, %v6631_v33  ;;  %v6151_v48 = vld [vmem:[%s12773_s4 + $0x298] sm:$0xf]  ;;  %4973 = vmatpush.bf16.msra.mxu1 %v5864_v40  ;;  %v4547_v33 = vadd.f32 %v4546_v26, %v4528_v19  ;;  %v11981_v38 = vpop.f32.mrf.mxu0  ;;  %v4634_v19 = vpop.f32.mrf.mxu3 }
 0x355   : > { %v8006_v8 = vld [vmem:[%s12773_s4 + $0x2b4] sm:$0xf0] }
 0x356   : > { %v6407_v25 = vld [vmem:[%s12773_s4 + $0x498] sm:$0xf]  ;;  %v6152_v9 = vor.u32 %v8006_v8, %v6151_v48  ;;  %5030 = vmatpush.bf16.msrb.mxu0 %v6632_v49 }
 0x357   : > { %v8070_v17 = vld [vmem:[%s12773_s4 + $0x4b4] sm:$0xf0] }
 0x358   : > { %v6408_v54 = vor.u32 %v8070_v17, %v6407_v25  ;;  %v5831_v51 = vld [vmem:[%s12773_s4 + $0x18] sm:$0xf]  ;;  %4991 = vmatpush.bf16.msra.mxu2 %v6152_v9  ;;  %v4566_v25 = vadd.f32 %v4565_v10, %v4547_v33  ;;  %v4598_v9 = vpop.f32.mrf.mxu1 }
 0x359   : > { %v7926_v57 = vld [vmem:[%s12773_s4 + $0x34] sm:$0xf0] }
 0x35a   : > { %v6599_v59 = vld [vmem:[%s12773_s4 + $0x618] sm:$0xf]  ;;  %v5832_v55 = vor.u32 %v7926_v57, %v5831_v51  ;;  %5010 = vmatpush.bf16.msra.mxu3 %v6408_v54 }
 0x35b   : > { %v8118_v29 = vld [vmem:[%s12773_s4 + $0x634] sm:$0xf0] }
 0x35c   : > { %v6600_v5 = vor.u32 %v8118_v29, %v6599_v59  ;;  %v6119_v45 = vld [vmem:[%s12773_s4 + $0x258] sm:$0xf]  ;;  %4974 = vmatpush.bf16.msra.mxu1 %v5832_v55  ;;  %v11979_v59 = vadd.f32 %v4598_v9, %v11867_v1  ;;  %v11985_v55 = vadd.f32 %v11863_v21, %v4566_v25 }
 0x35d   : > { %v7998_v3 = vld [vmem:[%s12773_s4 + $0x274] sm:$0xf0] }
 0x35e   : > { %v6120_v12 = vor.u32 %v7998_v3, %v6119_v45  ;;  %v6375_v43 = vld [vmem:[%s12773_s4 + $0x458] sm:$0xf]  ;;  %5031 = vmatpush.bf16.msrb.mxu0 %v6600_v5 }
 0x35f   : > { %v8062_v24 = vld [vmem:[%s12773_s4 + $0x474] sm:$0xf0]  ;;  %4975 = vmatmul.bf16.vlgmr.msra.gmra.mxu1 %v9386_v41 }
 0x360   : > { %v6376_v61 = vor.u32 %v8062_v24, %v6375_v43  ;;  %v7079_v52 = vld [vmem:[%s12773_s4 + $0x9d8] sm:$0xf]  ;;  %4992 = vmatpush.bf16.msra.mxu2 %v6120_v12  ;;  %v4615_v43 = vpop.f32.mrf.mxu2  ;;  %v4601_v10 = vpop.f32.mrf.mxu1 }
 0x361   : > { %v8238_v39 = vld [vmem:[%s12773_s4 + $0x9f4] sm:$0xf0]  ;;  %5032 = vmatmul.bf16.vlgmr.msrb.gmra.mxu0 %v9395_v47 }
 0x362   : > { %v7847_v46 = vld [vmem:[%s12773_s4 + $0xfd8] sm:$0xf]  ;;  %v7080_v44 = vor.u32 %v8238_v39, %v7079_v52  ;;  %5011 = vmatpush.bf16.msra.mxu3 %v6376_v61 }
 0x363   : > { %v8430_v42 = vld [vmem:[%s12773_s4 + $0xff4] sm:$0xf0] }
 0x364   : > { %v7848_v20 = vor.u32 %v8430_v42, %v7847_v46  ;;  %v6087_v16 = vld [vmem:[%s12773_s4 + $0x218] sm:$0xf]  ;;  %5043 = vmatpush.bf16.msrb.mxu1 %v7080_v44  ;;  %v4616_v46 = vadd.f32 %v4615_v43, %v11917_v37 }
 0x365   : > { %v7990_v6 = vld [vmem:[%s12773_s4 + $0x234] sm:$0xf0] }
 0x366   : > { %v6343_v36 = vld [vmem:[%s12773_s4 + $0x418] sm:$0xf]  ;;  %v6088_v40 = vor.u32 %v7990_v6, %v6087_v16  ;;  %5100 = vmatpush.bf16.msra.mxu0 %v7848_v20  ;;  %v4635_v6 = vadd.f32 %v4634_v19, %v4616_v46 }
 0x367   : > { %v8054_v62 = vld [vmem:[%s12773_s4 + $0x434] sm:$0xf0] }
 0x368   : > { %v6344_v4 = vor.u32 %v8054_v62, %v6343_v36  ;;  %v7047_v49 = vld [vmem:[%s12773_s4 + $0x998] sm:$0xf]  ;;  %4993 = vmatpush.bf16.msra.mxu2 %v6088_v40 }
 0x369   : > { %v8230_v48 = vld [vmem:[%s12773_s4 + $0x9b4] sm:$0xf0] }
 0x36a   : > { %v7815_v8 = vld [vmem:[%s12773_s4 + $0xf98] sm:$0xf]  ;;  %v7048_v32 = vor.u32 %v8230_v48, %v7047_v49  ;;  %5012 = vmatpush.bf16.msra.mxu3 %v6344_v4  ;;  %v4654_v48 = vadd.f32 %v11919_v7, %v4635_v6 }
 0x36b   : > { %v8422_v63 = vld [vmem:[%s12773_s4 + $0xfb4] sm:$0xf0]  ;;  %4994 = vmatmul.bf16.vlgmr.msra.gmra.mxu2 %v9431_v11 }
 0x36c   : > { %v7816_v17 = vor.u32 %v8422_v63, %v7815_v8  ;;  %v7335_v54 = vld [vmem:[%s12773_s4 + $0xbd8] sm:$0xf]  ;;  %5044 = vmatpush.bf16.msrb.mxu1 %v7048_v32  ;;  %v12041_v8 = vld [vmem:[%s12775_s6] sm:$0xff]  ;;  %v12047_v32 = vadd.f32 %v4601_v10, %v11922_v50  ;;  %v12049_v63 = vpop.f32.mrf.mxu0 }
 0x36d   : > { %v8302_v51 = vld [vmem:[%s12773_s4 + $0xbf4] sm:$0xf0]  ;;  %v12044_v25 = vperm.slane %v12041_v8, 3  ;;  %5013 = vmatmul.bf16.vlgmr.msra.gmra.mxu3 %v9439_v15 }
 0x36e   : > { %v7591_v57 = vld [vmem:[%s12773_s4 + $0xdd8] sm:$0xf]  ;;  %v7336_v29 = vor.u32 %v8302_v51, %v7335_v54  ;;  %5101 = vmatpush.bf16.msra.mxu0 %v7816_v17 }
 0x36f   : > { %v8366_v13 = vld [vmem:[%s12773_s4 + $0xdf4] sm:$0xf0]  ;;  %4980 = vmatmul.bf16.gmra.mxu1 %v9502_v60 }
 0x370   : > { %v7592_v5 = vor.u32 %v8366_v13, %v7591_v57  ;;  %v7015_v1 = vld [vmem:[%s12773_s4 + $0x958] sm:$0xf]  ;;  %5062 = vmatpush.bf16.msrb.mxu2 %v7336_v29  ;;  %v5274_v57 = vmax.f32 %v4654_v48, 0.0 }
 0x371   : > { %v8222_v45 = vld [vmem:[%s12773_s4 + $0x974] sm:$0xf0]  ;;  %5037 = vmatmul.bf16.gmra.mxu0 %v9511_v2 }
 0x372   : > { %v7783_v21 = vld [vmem:[%s12773_s4 + $0xf58] sm:$0xf]  ;;  %v7016_v3 = vor.u32 %v8222_v45, %v7015_v1  ;;  %5081 = vmatpush.bf16.msrb.mxu3 %v7592_v5  ;;  %v4617_v5 = vpop.f32.mrf.mxu2 }
 0x373   : > { %v8414_v12 = vld [vmem:[%s12773_s4 + $0xf74] sm:$0xf0]  ;;  %v4618_v43 = vadd.f32 %v4617_v5, %v11979_v59 }
 0x374   : > { %v7784_v24 = vor.u32 %v8414_v12, %v7783_v21  ;;  %v7303_v61 = vld [vmem:[%s12773_s4 + $0xb98] sm:$0xf]  ;;  %5045 = vmatpush.bf16.msrb.mxu1 %v7016_v3  ;;  %v5324_v12 = vmul.f32 %v12044_v25, %v5274_v57 }
 0x375   : > { %v8294_v52 = vld [vmem:[%s12773_s4 + $0xbb4] sm:$0xf0] }
 0x376   : > { %v7559_v39 = vld [vmem:[%s12773_s4 + $0xd98] sm:$0xf]  ;;  %v7304_v44 = vor.u32 %v8294_v52, %v7303_v61  ;;  %5102 = vmatpush.bf16.msra.mxu0 %v7784_v24  ;;  %v4636_v24 = vpop.f32.mrf.mxu3 }
 0x377   : > { %v8358_v42 = vld [vmem:[%s12773_s4 + $0xdb4] sm:$0xf0] }
 0x378   : > { %v7560_v26 = vor.u32 %v8358_v42, %v7559_v39  ;;  %v6983_v20 = vld [vmem:[%s12773_s4 + $0x918] sm:$0xf]  ;;  %5063 = vmatpush.bf16.msrb.mxu2 %v7304_v44  ;;  %v12092_v44 = vadd.f32 %v11610_v18, %v5324_v12  ;;  %v4637_v42 = vadd.f32 %v4636_v24, %v4618_v43 }
 0x379   : > { %v8214_v16 = vld [vmem:[%s12773_s4 + $0x934] sm:$0xf0] }
 0x37a   : > { %v7751_v37 = vld [vmem:[%s12773_s4 + $0xf18] sm:$0xf]  ;;  %v6984_v36 = vor.u32 %v8214_v16, %v6983_v20  ;;  %5082 = vmatpush.bf16.msrb.mxu3 %v7560_v26  ;;  %v4603_v16 = vpop.f32.mrf.mxu1 }
 0x37b   : > { %v8406_v33 = vld [vmem:[%s12773_s4 + $0xf34] sm:$0xf0]  ;;  %v12108_v10 = vadd.f32 %v4603_v16, %v11985_v55  ;;  %4999 = vmatmul.bf16.gmra.mxu2 %v9547_v30 }
 0x37c   : > { %v7752_v40 = vor.u32 %v8406_v33, %v7751_v37  ;;  %v7271_v62 = vld [vmem:[%s12773_s4 + $0xb58] sm:$0xf]  ;;  %5046 = vmatpush.bf16.msrb.mxu1 %v6984_v36  ;;  %v4656_v33 = vadd.f32 %v11981_v38, %v4637_v42 }
 0x37d   : > { %v8286_v4 = vld [vmem:[%s12773_s4 + $0xb74] sm:$0xf0]  ;;  %5018 = vmatmul.bf16.gmra.mxu3 %v9558_v35 }
 0x37e   : > { %v7527_v49 = vld [vmem:[%s12773_s4 + $0xd58] sm:$0xf]  ;;  %v7272_v9 = vor.u32 %v8286_v4, %v7271_v62  ;;  %5103 = vmatpush.bf16.msra.mxu0 %v7752_v40  ;;  %v12110_v40 = vpop.f32.mrf.mxu0 }
 0x37f   : > { %v8350_v17 = vld [vmem:[%s12773_s4 + $0xd74] sm:$0xf0] }
 0x380   : > { %v7528_v7 = vor.u32 %v8350_v17, %v7527_v49  ;;  %v6951_v54 = vld [vmem:[%s12773_s4 + $0x8d8] sm:$0xf]  ;;  %5064 = vmatpush.bf16.msrb.mxu2 %v7272_v9  ;;  %v5282_v9 = vmax.f32 %v4656_v33, 0.0 }
 0x381   : > { %v8206_v51 = vld [vmem:[%s12773_s4 + $0x8f4] sm:$0xf0] }
 0x382   : > { %v7719_v50 = vld [vmem:[%s12773_s4 + $0xed8] sm:$0xf]  ;;  %v6952_v29 = vor.u32 %v8206_v51, %v6951_v54  ;;  %5083 = vmatpush.bf16.msrb.mxu3 %v7528_v7  ;;  %v4620_v54 = vpop.f32.mrf.mxu2 }
 0x383   : > { %v8398_v13 = vld [vmem:[%s12773_s4 + $0xef4] sm:$0xf0]  ;;  %v4621_v5 = vadd.f32 %v4620_v54, %v12047_v32 }
 0x384   : > { %v7720_v1 = vor.u32 %v8398_v13, %v7719_v50  ;;  %v7239_v45 = vld [vmem:[%s12773_s4 + $0xb18] sm:$0xf]  ;;  %5047 = vmatpush.bf16.msrb.mxu1 %v6952_v29  ;;  %v5332_v13 = vmul.f32 %v12044_v25, %v5282_v9 }
 0x385   : > { %v8278_v21 = vld [vmem:[%s12773_s4 + $0xb34] sm:$0xf0] }
 0x386   : > { %v7495_v3 = vld [vmem:[%s12773_s4 + $0xd18] sm:$0xf]  ;;  %v7240_v61 = vor.u32 %v8278_v21, %v7239_v45  ;;  %5104 = vmatpush.bf16.msra.mxu0 %v7720_v1  ;;  %v4639_v1 = vpop.f32.mrf.mxu3  ;;  %v12153_v24 = vadd.f32 %v11671_v34, %v5332_v13  ;;  %v6025_v13 = vld [vmem:[%s12773_s4 + $0x1b8] sm:$0xf0] }
 0x387   : > { %v8342_v52 = vld [vmem:[%s12773_s4 + $0xd34] sm:$0xf0] }
 0x388   : > { %v7496_v39 = vor.u32 %v8342_v52, %v7495_v3  ;;  %v6919_v46 = vld [vmem:[%s12773_s4 + $0x898] sm:$0xf]  ;;  %5065 = vmatpush.bf16.msrb.mxu2 %v7240_v61  ;;  %v4640_v61 = vadd.f32 %v4639_v1, %v4621_v5  ;;  %v12218_v1 = vld [vmem:[%s12774_s5] sm:$0xff] }
 0x389   : > { %v8198_v19 = vld [vmem:[%s12773_s4 + $0x8b4] sm:$0xf0] }
 0x38a   : > { %v7687_v59 = vld [vmem:[%s12773_s4 + $0xe98] sm:$0xf]  ;;  %v6920_v26 = vor.u32 %v8198_v19, %v6919_v46  ;;  %5084 = vmatpush.bf16.msrb.mxu3 %v7496_v39  ;;  %v12158_v46 = vpop.f32.mrf.mxu1 }
 0x38b   : > { %v8390_v20 = vld [vmem:[%s12773_s4 + $0xeb4] sm:$0xf0] }
 0x38c   : > { %v7688_v37 = vor.u32 %v8390_v20, %v7687_v59  ;;  %v7207_v6 = vld [vmem:[%s12773_s4 + $0xad8] sm:$0xf]  ;;  %5048 = vmatpush.bf16.msrb.mxu1 %v6920_v26  ;;  %v4659_v26 = vadd.f32 %v12049_v63, %v4640_v61  ;;  %v12170_v20 = vpop.f32.mrf.mxu0  ;;  %v8170_v63 = vld [vmem:[%s12773_s4 + $0x7dc] sm:$0xf] }
 0x38d   : > { %v8270_v36 = vld [vmem:[%s12773_s4 + $0xaf4] sm:$0xf0]  ;;  %v6313_v61 = vld [vmem:[%s12773_s4 + $0x3f8] sm:$0xf0] }
 0x38e   : > { %v7463_v18 = vld [vmem:[%s12773_s4 + $0xcd8] sm:$0xf]  ;;  %v7208_v62 = vor.u32 %v8270_v36, %v7207_v6  ;;  %5105 = vmatpush.bf16.msra.mxu0 %v7688_v37  ;;  %v7978_v36 = vld [vmem:[%s12773_s4 + $0x1dc] sm:$0xf]  ;;  %v5290_v33 = vmax.f32 %v4659_v26, 0.0  ;;  %v4641_v54 = vpop.f32.mrf.mxu3 }
 0x38f   : > { %v8334_v4 = vld [vmem:[%s12773_s4 + $0xcf4] sm:$0xf0]  ;;  %v7962_v26 = vld [vmem:[%s12773_s4 + $0x15c] sm:$0xf] }
 0x390   : > { %v7464_v49 = vor.u32 %v8334_v4, %v7463_v18  ;;  %v6887_v38 = vld [vmem:[%s12773_s4 + $0x858] sm:$0xf]  ;;  %5066 = vmatpush.bf16.msrb.mxu2 %v7208_v62  ;;  %v6057_v18 = vld [vmem:[%s12773_s4 + $0x1f8] sm:$0xf0] }
 0x391   : > { %v8190_v55 = vld [vmem:[%s12773_s4 + $0x874] sm:$0xf0]  ;;  %v6060_v62 = vor.u32 %v7978_v36, %v6057_v18  ;;  %v6825_v4 = vld [vmem:[%s12773_s4 + $0x7f8] sm:$0xf0] }
 0x392   : > { %v7655_v48 = vld [vmem:[%s12773_s4 + $0xe58] sm:$0xf]  ;;  %v6888_v17 = vor.u32 %v8190_v55, %v6887_v38  ;;  %5085 = vmatpush.bf16.msrb.mxu3 %v7464_v49  ;;  %v4622_v49 = vpop.f32.mrf.mxu2  ;;  %v6828_v38 = vor.u32 %v8170_v63, %v6825_v4  ;;  %v6761_v18 = vld [vmem:[%s12773_s4 + $0x778] sm:$0xf0] }
 0x393   : > { %v8382_v7 = vld [vmem:[%s12773_s4 + $0xe74] sm:$0xf0]  ;;  %v6281_v4 = vld [vmem:[%s12773_s4 + $0x3b8] sm:$0xf0] }
 0x394   : > { %v7656_v51 = vor.u32 %v8382_v7, %v7655_v48  ;;  %v7175_v50 = vld [vmem:[%s12773_s4 + $0xa98] sm:$0xf]  ;;  %5049 = vmatpush.bf16.msrb.mxu1 %v6888_v17  ;;  %v5340_v17 = vmul.f32 %v12044_v25, %v5290_v33  ;;  %v4623_v7 = vadd.f32 %v4622_v49, %v12108_v10  ;;  %v8162_v10 = vld [vmem:[%s12773_s4 + $0x79c] sm:$0xf] }
 0x395   : > { %v8262_v57 = vld [vmem:[%s12773_s4 + $0xab4] sm:$0xf0] }
 0x396   : > { %v7431_v29 = vld [vmem:[%s12773_s4 + $0xc98] sm:$0xf]  ;;  %v7176_v45 = vor.u32 %v8262_v57, %v7175_v50  ;;  %5106 = vmatpush.bf16.msra.mxu0 %v7656_v51  ;;  %v12213_v5 = vadd.f32 %v11731_v31, %v5340_v17  ;;  %v8042_v31 = vld [vmem:[%s12773_s4 + $0x3dc] sm:$0xf] }
 0x397   : > { %v8326_v21 = vld [vmem:[%s12773_s4 + $0xcb4] sm:$0xf0] }
 0x398   : > { %v7432_v3 = vor.u32 %v8326_v21, %v7431_v29  ;;  %v6855_v12 = vld [vmem:[%s12773_s4 + $0x818] sm:$0xf]  ;;  %5067 = vmatpush.bf16.msrb.mxu2 %v7176_v45  ;;  %v7970_v29 = vld [vmem:[%s12773_s4 + $0x19c] sm:$0xf]  ;;  %v12221_v45 = vperm.slane %v12218_v1, 4  ;;  %v4642_v21 = vadd.f32 %v4641_v54, %v4623_v7 }
 0x399   : > { %v8182_v43 = vld [vmem:[%s12773_s4 + $0x834] sm:$0xf0]  ;;  %v7954_v7 = vld [vmem:[%s12773_s4 + $0x11c] sm:$0xf] }
 0x39a   : > { %v7623_v32 = vld [vmem:[%s12773_s4 + $0xe18] sm:$0xf]  ;;  %v6856_v52 = vor.u32 %v8182_v43, %v6855_v12  ;;  %5086 = vmatpush.bf16.msrb.mxu3 %v7432_v3  ;;  %v6028_v3 = vor.u32 %v7970_v29, %v6025_v13  ;;  %v6793_v12 = vld [vmem:[%s12773_s4 + $0x7b8] sm:$0xf0]  ;;  %v4674_v43 = vpop.f32.mrf.mxu1  ;;  %v4691_v63 = vpop.f32.mrf.mxu2 }
 0x39b   : > { %v8374_v39 = vld [vmem:[%s12773_s4 + $0xe34] sm:$0xf0]  ;;  %v5961_v54 = vld [vmem:[%s12773_s4 + $0x138] sm:$0xf0] }
 0x39c   : > { %v7624_v19 = vor.u32 %v8374_v39, %v7623_v32  ;;  %v7143_v59 = vld [vmem:[%s12773_s4 + $0xa58] sm:$0xf]  ;;  %5050 = vmatpush.bf16.msrb.mxu1 %v6856_v52  ;;  %v6796_v32 = vor.u32 %v8162_v10, %v6793_v12  ;;  %v8106_v52 = vld [vmem:[%s12773_s4 + $0x5dc] sm:$0xf]  ;;  %v4661_v39 = vadd.f32 %v12110_v40, %v4642_v21 }
 0x39d   : > { %v8254_v34 = vld [vmem:[%s12773_s4 + $0xa74] sm:$0xf0]  ;;  %v5993_v40 = vld [vmem:[%s12773_s4 + $0x178] sm:$0xf0] }
 0x39e   : > { %v7399_v42 = vld [vmem:[%s12773_s4 + $0xc58] sm:$0xf]  ;;  %v7144_v16 = vor.u32 %v8254_v34, %v7143_v59  ;;  %5107 = vmatpush.bf16.msra.mxu0 %v7624_v19  ;;  %v12236_v19 = vpop.f32.mrf.mxu0  ;;  %v6316_v59 = vor.u32 %v8042_v31, %v6313_v61  ;;  %v6569_v34 = vld [vmem:[%s12773_s4 + $0x5f8] sm:$0xf0]  ;;  %v5996_v36 = vor.u32 %v7962_v26, %v5993_v40 }
 0x39f   : > { %v8318_v37 = vld [vmem:[%s12773_s4 + $0xc74] sm:$0xf0]  ;;  %v6729_v29 = vld [vmem:[%s12773_s4 + $0x738] sm:$0xf0]  ;;  %5051 = vmatmul.bf16.vlgmr.msrb.gmra.mxu1 %v9636_v23 }
 0x3a0   : > { %v7400_v6 = vor.u32 %v8318_v37, %v7399_v42  ;;  %5068 = vmatpush.bf16.msrb.mxu2 %v7144_v16  ;;  %v7111_v55 = vld [vmem:[%s12773_s4 + $0xa18] sm:$0xf]  ;;  %5119 = vmatpush.bf16.msra.mxu1 %v6060_v62  ;;  %v6572_v42 = vor.u32 %v8106_v52, %v6569_v34  ;;  %v8154_v16 = vld [vmem:[%s12773_s4 + $0x75c] sm:$0xf]  ;;  %v4673_v37 = vadd.f32 %v12158_v46, %v12221_v45 }
 0x3a1   : > { %v8246_v48 = vld [vmem:[%s12773_s4 + $0xa34] sm:$0xf0]  ;;  %v6764_v33 = vor.u32 %v8154_v16, %v6761_v18  ;;  %v8034_v62 = vld [vmem:[%s12773_s4 + $0x39c] sm:$0xf]  ;;  %v4675_v34 = vadd.f32 %v4674_v43, %v12221_v45  ;;  %5108 = vmatmul.bf16.vlgmr.msra.gmra.mxu0 %v9639_v27 }
 0x3a2   : > { %5087 = vmatpush.bf16.msrb.mxu3 %v7400_v6  ;;  %v7367_v9 = vld [vmem:[%s12773_s4 + $0xc18] sm:$0xf]  ;;  %v7112_v51 = vor.u32 %v8246_v48, %v7111_v55  ;;  %5176 = vmatpush.bf16.msrb.mxu0 %v6828_v38  ;;  %v5298_v6 = vmax.f32 %v4661_v39, 0.0  ;;  %v8098_v46 = vld [vmem:[%s12773_s4 + $0x59c] sm:$0xf]  ;;  %v4692_v38 = vadd.f32 %v4691_v63, %v4673_v37  ;;  %v4710_v55 = vpop.f32.mrf.mxu3  ;;  %v6284_v48 = vor.u32 %v8034_v62, %v6281_v4  ;;  %v4677_v13 = vpop.f32.mrf.mxu1 }
 0x3a3   : > { %v8310_v50 = vld [vmem:[%s12773_s4 + $0xc34] sm:$0xf0]  ;;  %v8026_v21 = vld [vmem:[%s12773_s4 + $0x35c] sm:$0xf]  ;;  %v4693_v40 = vpop.f32.mrf.mxu2 }
 0x3a4   : > { %v7368_v57 = vor.u32 %v8310_v50, %v7367_v9  ;;  %5069 = vmatpush.bf16.msrb.mxu2 %v7112_v51  ;;  %5120 = vmatpush.bf16.msra.mxu1 %v6028_v3  ;;  %v5348_v49 = vmul.f32 %v12044_v25, %v5298_v6  ;;  %v6537_v9 = vld [vmem:[%s12773_s4 + $0x5b8] sm:$0xf0]  ;;  %v4711_v50 = vadd.f32 %v4710_v55, %v4692_v38 }
 0x3a5   : > { %v6540_v17 = vor.u32 %v8098_v46, %v6537_v9  ;;  %v8146_v25 = vld [vmem:[%s12773_s4 + $0x71c] sm:$0xf] }
 0x3a6   : > { %5088 = vmatpush.bf16.msrb.mxu3 %v7368_v57  ;;  %5177 = vmatpush.bf16.msrb.mxu0 %v6796_v32  ;;  %v12280_v51 = vadd.f32 %v11793_v14, %v5348_v49  ;;  %v5964_v57 = vor.u32 %v7954_v7, %v5961_v54  ;;  %v6732_v10 = vor.u32 %v8146_v25, %v6729_v29  ;;  %v6249_v3 = vld [vmem:[%s12773_s4 + $0x378] sm:$0xf0]  ;;  %v12294_v12 = vpop.f32.mrf.mxu0 }
 0x3a7   : > { %v8090_v14 = vld [vmem:[%s12773_s4 + $0x55c] sm:$0xf]  ;;  %v12297_v32 = vadd.f32 %v12170_v20, %v4711_v50  ;;  %v6252_v31 = vor.u32 %v8026_v21, %v6249_v3  ;;  %5070 = vmatmul.bf16.vlgmr.msrb.gmra.mxu2 %v9678_v58 }
 0x3a8   : > { %5138 = vmatpush.bf16.msra.mxu2 %v6316_v59  ;;  %5121 = vmatpush.bf16.msra.mxu1 %v5996_v36  ;;  %v6505_v61 = vld [vmem:[%s12773_s4 + $0x578] sm:$0xf0]  ;;  %v4694_v36 = vadd.f32 %v4693_v40, %v4675_v34 }
 0x3a9   : > { %v6508_v52 = vor.u32 %v8090_v14, %v6505_v61  ;;  %v7946_v39 = vld [vmem:[%s12773_s4 + $0xdc] sm:$0xf]  ;;  %5089 = vmatmul.bf16.vlgmr.msrb.gmra.mxu3 %v9683_v0 }
 0x3aa   : > { %5157 = vmatpush.bf16.msra.mxu3 %v6572_v42  ;;  %5178 = vmatpush.bf16.msrb.mxu0 %v6764_v33  ;;  %v5929_v59 = vld [vmem:[%s12773_s4 + $0xf8] sm:$0xf0]  ;;  %v4712_v18 = vpop.f32.mrf.mxu3  ;;  %v4679_v9 = vpop.f32.mrf.mxu1 }
 0x3ab   : > { %v8138_v20 = vld [vmem:[%s12773_s4 + $0x6dc] sm:$0xf]  ;;  %v5932_v42 = vor.u32 %v7946_v39, %v5929_v59  ;;  %v4713_v38 = vadd.f32 %v4712_v18, %v4694_v36  ;;  %v4696_v39 = vpop.f32.mrf.mxu2 }
 0x3ac   : > { %5139 = vmatpush.bf16.msra.mxu2 %v6284_v48  ;;  %5122 = vmatpush.bf16.msra.mxu1 %v5964_v57  ;;  %v6697_v26 = vld [vmem:[%s12773_s4 + $0x6f8] sm:$0xf0] }
 0x3ad   : > { %v6700_v16 = vor.u32 %v8138_v20, %v6697_v26  ;;  %v8018_v37 = vld [vmem:[%s12773_s4 + $0x31c] sm:$0xf]  ;;  %v12354_v57 = vadd.f32 %v12236_v19, %v4713_v38 }
 0x3ae   : > { %5158 = vmatpush.bf16.msra.mxu3 %v6540_v17  ;;  %5179 = vmatpush.bf16.msrb.mxu0 %v6732_v10  ;;  %v6217_v43 = vld [vmem:[%s12773_s4 + $0x338] sm:$0xf0]  ;;  %v12350_v50 = vpop.f32.mrf.mxu0 }
 0x3af   : > { %v8082_v6 = vld [vmem:[%s12773_s4 + $0x51c] sm:$0xf]  ;;  %v6220_v63 = vor.u32 %v8018_v37, %v6217_v43  ;;  %5056 = vmatmul.bf16.gmra.mxu1 %v9752_v53 }
 0x3b0   : > { %5140 = vmatpush.bf16.msra.mxu2 %v6252_v31  ;;  %5123 = vmatpush.bf16.msra.mxu1 %v5932_v42  ;;  %v6473_v33 = vld [vmem:[%s12773_s4 + $0x538] sm:$0xf0]  ;;  %v4678_v31 = vadd.f32 %v4677_v13, %v12221_v45 }
 0x3b1   : > { %v6476_v62 = vor.u32 %v8082_v6, %v6473_v33  ;;  %v7938_v4 = vld [vmem:[%s12773_s4 + $0x9c] sm:$0xf]  ;;  %5113 = vmatmul.bf16.gmra.mxu0 %v9755_v56 }
 0x3b2   : > { %5159 = vmatpush.bf16.msra.mxu3 %v6508_v52  ;;  %5180 = vmatpush.bf16.msrb.mxu0 %v6700_v16  ;;  %v5897_v46 = vld [vmem:[%s12773_s4 + $0xb8] sm:$0xf0]  ;;  %v4697_v42 = vadd.f32 %v4696_v39, %v4678_v31  ;;  %v4715_v26 = vpop.f32.mrf.mxu3 }
 0x3b3   : > { %v8130_v49 = vld [vmem:[%s12773_s4 + $0x69c] sm:$0xf]  ;;  %v5900_v55 = vor.u32 %v7938_v4, %v5897_v46 }
 0x3b4   : > { %5141 = vmatpush.bf16.msra.mxu2 %v6220_v63  ;;  %v6665_v48 = vld [vmem:[%s12773_s4 + $0x6b8] sm:$0xf0]  ;;  %v4716_v18 = vadd.f32 %v4715_v26, %v4697_v42 }
 0x3b5   : > { %v6668_v17 = vor.u32 %v8130_v49, %v6665_v48  ;;  %v8010_v7 = vld [vmem:[%s12773_s4 + $0x2dc] sm:$0xf]  ;;  %5124 = vmatpush.bf16.msra.mxu1 %v5900_v55 }
 0x3b6   : > { %5160 = vmatpush.bf16.msra.mxu3 %v6476_v62  ;;  %v6185_v54 = vld [vmem:[%s12773_s4 + $0x2f8] sm:$0xf0]  ;;  %v4748_v62 = vpop.f32.mrf.mxu1  ;;  %v12406_v55 = vpop.f32.mrf.mxu0  ;;  %v12409_v48 = vadd.f32 %v12294_v12, %v4716_v18 }
 0x3b7   : > { %v8074_v25 = vld [vmem:[%s12773_s4 + $0x4dc] sm:$0xf]  ;;  %v6188_v29 = vor.u32 %v8010_v7, %v6185_v54  ;;  %5181 = vmatpush.bf16.msrb.mxu0 %v6668_v17  ;;  %v12404_v38 = vadd.f32 %v4748_v62, %v12297_v32  ;;  %5075 = vmatmul.bf16.gmra.mxu2 %v9794_v22 }
 0x3b8   : > { %v6441_v10 = vld [vmem:[%s12773_s4 + $0x4f8] sm:$0xf0] }
 0x3b9   : > { %v6444_v21 = vor.u32 %v8074_v25, %v6441_v10  ;;  %v7930_v3 = vld [vmem:[%s12773_s4 + $0x5c] sm:$0xf]  ;;  %5142 = vmatpush.bf16.msra.mxu2 %v6188_v29  ;;  %v4680_v10 = vadd.f32 %v4679_v9, %v12221_v45  ;;  %5094 = vmatmul.bf16.gmra.mxu3 %v9799_v28 }
 0x3ba   : > { %v5865_v14 = vld [vmem:[%s12773_s4 + $0x78] sm:$0xf0] }
 0x3bb   : > { %v8122_v19 = vld [vmem:[%s12773_s4 + $0x65c] sm:$0xf]  ;;  %v5868_v61 = vor.u32 %v7930_v3, %v5865_v14  ;;  %5161 = vmatpush.bf16.msra.mxu3 %v6444_v21  ;;  %v4698_v14 = vpop.f32.mrf.mxu2 }
 0x3bc   : > { %v6633_v52 = vld [vmem:[%s12773_s4 + $0x678] sm:$0xf0] }
 0x3bd   : > { %v6636_v59 = vor.u32 %v8122_v19, %v6633_v52  ;;  %v8002_v20 = vld [vmem:[%s12773_s4 + $0x29c] sm:$0xf]  ;;  %5125 = vmatpush.bf16.msra.mxu1 %v5868_v61  ;;  %v4699_v61 = vadd.f32 %v4698_v14, %v4680_v10  ;;  %v4717_v52 = vpop.f32.mrf.mxu3 }
 0x3be   : > { %v6153_v34 = vld [vmem:[%s12773_s4 + $0x2b8] sm:$0xf0] }
 0x3bf   : > { %v8066_v13 = vld [vmem:[%s12773_s4 + $0x49c] sm:$0xf]  ;;  %v6156_v40 = vor.u32 %v8002_v20, %v6153_v34  ;;  %5182 = vmatpush.bf16.msrb.mxu0 %v6636_v59  ;;  %v4718_v26 = vadd.f32 %v4717_v52, %v4699_v61 }
 0x3c0   : > { %v6409_v16 = vld [vmem:[%s12773_s4 + $0x4b8] sm:$0xf0] }
 0x3c1   : > { %v6412_v37 = vor.u32 %v8066_v13, %v6409_v16  ;;  %v7922_v43 = vld [vmem:[%s12773_s4 + $0x1c] sm:$0xf]  ;;  %5143 = vmatpush.bf16.msra.mxu2 %v6156_v40  ;;  %v12477_v62 = vadd.f32 %v12350_v50, %v4718_v26 }
 0x3c2   : > { %v5833_v6 = vld [vmem:[%s12773_s4 + $0x38] sm:$0xf0] }
 0x3c3   : > { %v8114_v36 = vld [vmem:[%s12773_s4 + $0x61c] sm:$0xf]  ;;  %v5836_v63 = vor.u32 %v7922_v43, %v5833_v6  ;;  %5162 = vmatpush.bf16.msra.mxu3 %v6412_v37  ;;  %v4750_v37 = vpop.f32.mrf.mxu1 }
 0x3c4   : > { %v6601_v33 = vld [vmem:[%s12773_s4 + $0x638] sm:$0xf0] }
 0x3c5   : > { %v6604_v4 = vor.u32 %v8114_v36, %v6601_v33  ;;  %v7994_v46 = vld [vmem:[%s12773_s4 + $0x25c] sm:$0xf]  ;;  %5126 = vmatpush.bf16.msra.mxu1 %v5836_v63  ;;  %v12471_v63 = vadd.f32 %v4750_v37, %v12354_v57  ;;  %v12473_v33 = vpop.f32.mrf.mxu0 }
 0x3c6   : > { %v6121_v49 = vld [vmem:[%s12773_s4 + $0x278] sm:$0xf0] }
 0x3c7   : > { %v6124_v17 = vor.u32 %v7994_v46, %v6121_v49  ;;  %v8058_v7 = vld [vmem:[%s12773_s4 + $0x45c] sm:$0xf]  ;;  %5183 = vmatpush.bf16.msrb.mxu0 %v6604_v4 }
 0x3c8   : > { %v6377_v54 = vld [vmem:[%s12773_s4 + $0x478] sm:$0xf0]  ;;  %5127 = vmatmul.bf16.vlgmr.msra.gmra.mxu1 %v9386_v41 }
 0x3c9   : > { %v6380_v25 = vor.u32 %v8058_v7, %v6377_v54  ;;  %v8234_v32 = vld [vmem:[%s12773_s4 + $0x9dc] sm:$0xf]  ;;  %5144 = vmatpush.bf16.msra.mxu2 %v6124_v17 }
 0x3ca   : > { %v7081_v12 = vld [vmem:[%s12773_s4 + $0x9f8] sm:$0xf0]  ;;  %5184 = vmatmul.bf16.vlgmr.msrb.gmra.mxu0 %v9395_v47 }
 0x3cb   : > { %v8426_v29 = vld [vmem:[%s12773_s4 + $0xfdc] sm:$0xf]  ;;  %v7084_v21 = vor.u32 %v8234_v32, %v7081_v12  ;;  %5163 = vmatpush.bf16.msra.mxu3 %v6380_v25  ;;  %v4767_v25 = vpop.f32.mrf.mxu2 }
 0x3cc   : > { %v7849_v3 = vld [vmem:[%s12773_s4 + $0xff8] sm:$0xf0] }
 0x3cd   : > { %v12432_v19 = vor.u32 %v8426_v29, %v7849_v3  ;;  %v7986_v31 = vld [vmem:[%s12773_s4 + $0x21c] sm:$0xf]  ;;  %5195 = vmatpush.bf16.msrb.mxu1 %v7084_v21  ;;  %v4768_v21 = vadd.f32 %v4767_v25, %v12404_v38  ;;  %v4786_v3 = vpop.f32.mrf.mxu3 }
 0x3ce   : > { %v6089_v45 = vld [vmem:[%s12773_s4 + $0x238] sm:$0xf0] }
 0x3cf   : > { %v8050_v9 = vld [vmem:[%s12773_s4 + $0x41c] sm:$0xf]  ;;  %v6092_v39 = vor.u32 %v7986_v31, %v6089_v45  ;;  %5252 = vmatpush.bf16.msra.mxu0 %v12432_v19  ;;  %v4787_v52 = vadd.f32 %v4786_v3, %v4768_v21 }
 0x3d0   : > { %v6345_v59 = vld [vmem:[%s12773_s4 + $0x438] sm:$0xf0] }
 0x3d1   : > { %v6348_v20 = vor.u32 %v8050_v9, %v6345_v59  ;;  %v8226_v34 = vld [vmem:[%s12773_s4 + $0x99c] sm:$0xf]  ;;  %5145 = vmatpush.bf16.msra.mxu2 %v6092_v39 }
 0x3d2   : > { %v7049_v13 = vld [vmem:[%s12773_s4 + $0x9b8] sm:$0xf0] }
 0x3d3   : > { %v8418_v42 = vld [vmem:[%s12773_s4 + $0xf9c] sm:$0xf]  ;;  %v7052_v40 = vor.u32 %v8226_v34, %v7049_v13  ;;  %5164 = vmatpush.bf16.msra.mxu3 %v6348_v20  ;;  %v4753_v20 = vpop.f32.mrf.mxu1 }
 0x3d4   : > { %v7817_v16 = vld [vmem:[%s12773_s4 + $0xfb8] sm:$0xf0]  ;;  %v12540_v37 = vadd.f32 %v4753_v20, %v12409_v48  ;;  %5146 = vmatmul.bf16.vlgmr.msra.gmra.mxu2 %v9431_v11 }
 0x3d5   : > { %v12459_v43 = vor.u32 %v8418_v42, %v7817_v16  ;;  %v8298_v6 = vld [vmem:[%s12773_s4 + $0xbdc] sm:$0xf]  ;;  %5196 = vmatpush.bf16.msrb.mxu1 %v7052_v40  ;;  %v4806_v40 = vadd.f32 %v12406_v55, %v4787_v52  ;;  %v12537_v16 = vperm.slane %v12041_v8, 4 }
 0x3d6   : > { %v7337_v36 = vld [vmem:[%s12773_s4 + $0xbf8] sm:$0xf0]  ;;  %5165 = vmatmul.bf16.vlgmr.msra.gmra.mxu3 %v9439_v15 }
 0x3d7   : > { %v8362_v18 = vld [vmem:[%s12773_s4 + $0xddc] sm:$0xf]  ;;  %v7340_v4 = vor.u32 %v8298_v6, %v7337_v36  ;;  %5253 = vmatpush.bf16.msra.mxu0 %v12459_v43  ;;  %v12542_v6 = vpop.f32.mrf.mxu0 }
 0x3d8   : > { %v7593_v46 = vld [vmem:[%s12773_s4 + $0xdf8] sm:$0xf0]  ;;  %5132 = vmatmul.bf16.gmra.mxu1 %v9502_v60 }
 0x3d9   : > { %v7596_v49 = vor.u32 %v8362_v18, %v7593_v46  ;;  %v8218_v57 = vld [vmem:[%s12773_s4 + $0x95c] sm:$0xf]  ;;  %5214 = vmatpush.bf16.msrb.mxu2 %v7340_v4  ;;  %v5275_v46 = vmax.f32 %v4806_v40, 0.0 }
 0x3da   : > { %v7017_v50 = vld [vmem:[%s12773_s4 + $0x978] sm:$0xf0]  ;;  %5189 = vmatmul.bf16.gmra.mxu0 %v9511_v2 }
 0x3db   : > { %v8410_v17 = vld [vmem:[%s12773_s4 + $0xf5c] sm:$0xf]  ;;  %v7020_v7 = vor.u32 %v8218_v57, %v7017_v50  ;;  %5233 = vmatpush.bf16.msrb.mxu3 %v7596_v49  ;;  %v4769_v50 = vpop.f32.mrf.mxu2 }
 0x3dc   : > { %v7785_v54 = vld [vmem:[%s12773_s4 + $0xf78] sm:$0xf0] }
 0x3dd   : > { %v12496_v32 = vor.u32 %v8410_v17, %v7785_v54  ;;  %v8290_v12 = vld [vmem:[%s12773_s4 + $0xb9c] sm:$0xf]  ;;  %5197 = vmatpush.bf16.msrb.mxu1 %v7020_v7 }
 0x3de   : > { %v7305_v29 = vld [vmem:[%s12773_s4 + $0xbb8] sm:$0xf0] }
 0x3df   : > { %v8354_v10 = vld [vmem:[%s12773_s4 + $0xd9c] sm:$0xf]  ;;  %v7308_v14 = vor.u32 %v8290_v12, %v7305_v29  ;;  %5254 = vmatpush.bf16.msra.mxu0 %v12496_v32  ;;  %v5325_v12 = vmul.f32 %v12537_v16, %v5275_v46  ;;  %v4770_v29 = vadd.f32 %v4769_v50, %v12471_v63  ;;  %v12607_v40 = vpop.f32.mrf.mxu0 }
 0x3e0   : > { %v7561_v31 = vld [vmem:[%s12773_s4 + $0xdb8] sm:$0xf0] }
 0x3e1   : > { %v7564_v45 = vor.u32 %v8354_v10, %v7561_v31  ;;  %v8210_v9 = vld [vmem:[%s12773_s4 + $0x91c] sm:$0xf]  ;;  %5215 = vmatpush.bf16.msrb.mxu2 %v7308_v14  ;;  %v4788_v10 = vpop.f32.mrf.mxu3  ;;  %v12592_v52 = vadd.f32 %v12092_v44, %v5325_v12 }
 0x3e2   : > { %v6985_v61 = vld [vmem:[%s12773_s4 + $0x938] sm:$0xf0] }
 0x3e3   : > { %v8402_v38 = vld [vmem:[%s12773_s4 + $0xf1c] sm:$0xf]  ;;  %v6988_v39 = vor.u32 %v8210_v9, %v6985_v61  ;;  %5234 = vmatpush.bf16.msrb.mxu3 %v7564_v45  ;;  %v4789_v9 = vadd.f32 %v4788_v10, %v4770_v29 }
 0x3e4   : > { %v7753_v59 = vld [vmem:[%s12773_s4 + $0xf38] sm:$0xf0]  ;;  %5151 = vmatmul.bf16.gmra.mxu2 %v9547_v30 }
 0x3e5   : > { %v12524_v34 = vor.u32 %v8402_v38, %v7753_v59  ;;  %v8282_v13 = vld [vmem:[%s12773_s4 + $0xb5c] sm:$0xf]  ;;  %5198 = vmatpush.bf16.msrb.mxu1 %v6988_v39  ;;  %v4755_v39 = vpop.f32.mrf.mxu1 }
 0x3e6   : > { %v7273_v42 = vld [vmem:[%s12773_s4 + $0xb78] sm:$0xf0]  ;;  %v4756_v44 = vadd.f32 %v4755_v39, %v12477_v62  ;;  %5170 = vmatmul.bf16.gmra.mxu3 %v9558_v35 }
 0x3e7   : > { %v8346_v26 = vld [vmem:[%s12773_s4 + $0xd5c] sm:$0xf]  ;;  %v7276_v36 = vor.u32 %v8282_v13, %v7273_v42  ;;  %5255 = vmatpush.bf16.msra.mxu0 %v12524_v34 }
 0x3e8   : > { %v7529_v18 = vld [vmem:[%s12773_s4 + $0xd78] sm:$0xf0] }
 0x3e9   : > { %v7532_v4 = vor.u32 %v8346_v26, %v7529_v18  ;;  %v8202_v55 = vld [vmem:[%s12773_s4 + $0x8dc] sm:$0xf]  ;;  %5216 = vmatpush.bf16.msrb.mxu2 %v7276_v36  ;;  %v4808_v26 = vadd.f32 %v12473_v33, %v4789_v9  ;;  %v4791_v29 = vpop.f32.mrf.mxu3 }
 0x3ea   : > { %v6953_v8 = vld [vmem:[%s12773_s4 + $0x8f8] sm:$0xf0] }
 0x3eb   : > { %v8394_v48 = vld [vmem:[%s12773_s4 + $0xedc] sm:$0xf]  ;;  %v6956_v49 = vor.u32 %v8202_v55, %v6953_v8  ;;  %5235 = vmatpush.bf16.msrb.mxu3 %v7532_v4  ;;  %v5283_v8 = vmax.f32 %v4808_v26, 0.0 }
 0x3ec   : > { %v7721_v57 = vld [vmem:[%s12773_s4 + $0xef8] sm:$0xf0] }
 0x3ed   : > { %v12562_v17 = vor.u32 %v8394_v48, %v7721_v57  ;;  %v8274_v7 = vld [vmem:[%s12773_s4 + $0xb1c] sm:$0xf]  ;;  %5199 = vmatpush.bf16.msrb.mxu1 %v6956_v49  ;;  %v4772_v49 = vpop.f32.mrf.mxu2 }
 0x3ee   : > { %v7241_v54 = vld [vmem:[%s12773_s4 + $0xb38] sm:$0xf0]  ;;  %v4773_v12 = vadd.f32 %v4772_v49, %v12540_v37 }
 0x3ef   : > { %v8338_v25 = vld [vmem:[%s12773_s4 + $0xd1c] sm:$0xf]  ;;  %v7244_v21 = vor.u32 %v8274_v7, %v7241_v54  ;;  %5256 = vmatpush.bf16.msra.mxu0 %v12562_v17 }
 0x3f0   : > { %v7497_v3 = vld [vmem:[%s12773_s4 + $0xd38] sm:$0xf0] }
 0x3f1   : > { %v7500_v14 = vor.u32 %v8338_v25, %v7497_v3  ;;  %v8194_v31 = vld [vmem:[%s12773_s4 + $0x89c] sm:$0xf]  ;;  %5217 = vmatpush.bf16.msrb.mxu2 %v7244_v21  ;;  %v5333_v25 = vmul.f32 %v12537_v16, %v5283_v8 }
 0x3f2   : > { %v6921_v45 = vld [vmem:[%s12773_s4 + $0x8b8] sm:$0xf0] }
 0x3f3   : > { %v8386_v63 = vld [vmem:[%s12773_s4 + $0xe9c] sm:$0xf]  ;;  %v6924_v61 = vor.u32 %v8194_v31, %v6921_v45  ;;  %5236 = vmatpush.bf16.msrb.mxu3 %v7500_v14  ;;  %v4792_v45 = vadd.f32 %v4791_v29, %v4773_v12 }
 0x3f4   : > { %v7689_v38 = vld [vmem:[%s12773_s4 + $0xeb8] sm:$0xf0] }
 0x3f5   : > { %v12594_v59 = vor.u32 %v8386_v63, %v7689_v38  ;;  %v8266_v20 = vld [vmem:[%s12773_s4 + $0xadc] sm:$0xf]  ;;  %5200 = vmatpush.bf16.msrb.mxu1 %v6924_v61  ;;  %v12657_v61 = vadd.f32 %v12153_v24, %v5333_v25  ;;  %v4824_v38 = vpop.f32.mrf.mxu1  ;;  %v4811_v26 = vadd.f32 %v12542_v6, %v4792_v45  ;;  %v4881_v24 = vpop.f32.mrf.mxu0 }
 0x3f6   : > { %v7209_v13 = vld [vmem:[%s12773_s4 + $0xaf8] sm:$0xf0] }
 0x3f7   : > { %v8330_v42 = vld [vmem:[%s12773_s4 + $0xcdc] sm:$0xf]  ;;  %v7212_v36 = vor.u32 %v8266_v20, %v7209_v13  ;;  %5257 = vmatpush.bf16.msra.mxu0 %v12594_v59 }
 0x3f8   : > { %v7465_v18 = vld [vmem:[%s12773_s4 + $0xcf8] sm:$0xf0] }
 0x3f9   : > { %v7468_v4 = vor.u32 %v8330_v42, %v7465_v18  ;;  %v8186_v33 = vld [vmem:[%s12773_s4 + $0x85c] sm:$0xf]  ;;  %5218 = vmatpush.bf16.msrb.mxu2 %v7212_v36 }
 0x3fa   : > { %v6889_v62 = vld [vmem:[%s12773_s4 + $0x878] sm:$0xf0] }
 0x3fb   : > { %v8378_v55 = vld [vmem:[%s12773_s4 + $0xe5c] sm:$0xf]  ;;  %v6892_v48 = vor.u32 %v8186_v33, %v6889_v62  ;;  %5237 = vmatpush.bf16.msrb.mxu3 %v7468_v4  ;;  %v5291_v33 = vmax.f32 %v4811_v26, 0.0  ;;  %v4774_v62 = vpop.f32.mrf.mxu2 }
 0x3fc   : > { %v7657_v46 = vld [vmem:[%s12773_s4 + $0xe78] sm:$0xf0]  ;;  %v4775_v41 = vadd.f32 %v4774_v62, %v4756_v44 }
 0x3fd   : > { %v12627_v57 = vor.u32 %v8378_v55, %v7657_v46  ;;  %v8258_v50 = vld [vmem:[%s12773_s4 + $0xa9c] sm:$0xf]  ;;  %5201 = vmatpush.bf16.msrb.mxu1 %v6892_v48  ;;  %v5341_v48 = vmul.f32 %v12537_v16, %v5291_v33  ;;  %v4793_v46 = vpop.f32.mrf.mxu3  ;;  %v4826_v12 = vpop.f32.mrf.mxu1 }
 0x3fe   : > { %v7177_v7 = vld [vmem:[%s12773_s4 + $0xab8] sm:$0xf0]  ;;  %v4883_v29 = vpop.f32.mrf.mxu0 }
 0x3ff   : > { %v8322_v54 = vld [vmem:[%s12773_s4 + $0xc9c] sm:$0xf]  ;;  %v7180_v10 = vor.u32 %v8258_v50, %v7177_v7  ;;  %5258 = vmatpush.bf16.msra.mxu0 %v12627_v57  ;;  %v1484_v7 = vperm.slane %v12218_v1, 5  ;;  %v12693_v25 = vadd.f32 %v12213_v5, %v5341_v48 }
 0x400   : > { %v7433_v21 = vld [vmem:[%s12773_s4 + $0xcb8] sm:$0xf0] }
 0x401   : > { %v7436_v3 = vor.u32 %v8322_v54, %v7433_v21  ;;  %v8178_v14 = vld [vmem:[%s12773_s4 + $0x81c] sm:$0xf]  ;;  %5219 = vmatpush.bf16.msrb.mxu2 %v7180_v10  ;;  %v4794_v54 = vadd.f32 %v4793_v46, %v4775_v41 }
 0x402   : > { %v6857_v31 = vld [vmem:[%s12773_s4 + $0x838] sm:$0xf0] }
 0x403   : > { %v8370_v37 = vld [vmem:[%s12773_s4 + $0xe1c] sm:$0xf]  ;;  %v6860_v63 = vor.u32 %v8178_v14, %v6857_v31  ;;  %5238 = vmatpush.bf16.msrb.mxu3 %v7436_v3  ;;  %v4813_v44 = vadd.f32 %v12607_v40, %v4794_v54  ;;  %v4843_v21 = vpop.f32.mrf.mxu2 }
 0x404   : > { %v7625_v9 = vld [vmem:[%s12773_s4 + $0xe38] sm:$0xf0] }
 0x405   : > { %v12659_v39 = vor.u32 %v8370_v37, %v7625_v9  ;;  %v8250_v20 = vld [vmem:[%s12773_s4 + $0xa5c] sm:$0xf]  ;;  %5202 = vmatpush.bf16.msrb.mxu1 %v6860_v63  ;;  %v5299_v10 = vmax.f32 %v4813_v44, 0.0  ;;  %v4862_v31 = vpop.f32.mrf.mxu3  ;;  %v4829_v40 = vpop.f32.mrf.mxu1 }
 0x406   : > { %v7145_v13 = vld [vmem:[%s12773_s4 + $0xa78] sm:$0xf0]  ;;  %v4886_v45 = vpop.f32.mrf.mxu0 }
 0x407   : > { %v8314_v42 = vld [vmem:[%s12773_s4 + $0xc5c] sm:$0xf]  ;;  %v7148_v36 = vor.u32 %v8250_v20, %v7145_v13  ;;  %5259 = vmatpush.bf16.msra.mxu0 %v12659_v39  ;;  %v5349_v3 = vmul.f32 %v12537_v16, %v5299_v10 }
 0x408   : > { %v7401_v18 = vld [vmem:[%s12773_s4 + $0xc78] sm:$0xf0]  ;;  %5203 = vmatmul.bf16.vlgmr.msrb.gmra.mxu1 %v9636_v23 }
 0x409   : > { %v7404_v4 = vor.u32 %v8314_v42, %v7401_v18  ;;  %5220 = vmatpush.bf16.msrb.mxu2 %v7148_v36  ;;  %v8242_v6 = vld [vmem:[%s12773_s4 + $0xa1c] sm:$0xf]  ;;  %8431 = vmatpush.bf16.msra.mxu1 %v12432_v19  ;;  %v4825_v19 = vadd.f32 %v4824_v38, %v1484_v7  ;;  %v12702_v37 = vadd.f32 %v12280_v51, %v5349_v3 }
 0x40a   : > { %v7113_v55 = vld [vmem:[%s12773_s4 + $0xa38] sm:$0xf0]  ;;  %5260 = vmatmul.bf16.vlgmr.msra.gmra.mxu0 %v9639_v27  ;;  %v12720_v27 = vld [vmem:[%s12775_s6] sm:$0xff] }
 0x40b   : > { %5239 = vmatpush.bf16.msrb.mxu3 %v7404_v4  ;;  %v8306_v8 = vld [vmem:[%s12773_s4 + $0xc1c] sm:$0xf]  ;;  %v7116_v47 = vor.u32 %v8242_v6, %v7113_v55  ;;  %v4844_v14 = vadd.f32 %v4843_v21, %v4825_v19  ;;  %v4845_v15 = vpop.f32.mrf.mxu2  ;;  %v5310_v41 = vperm.slane %v12720_v27, 5 }
 0x40c   : > { %v7369_v49 = vld [vmem:[%s12773_s4 + $0xc38] sm:$0xf0] }
 0x40d   : > { %v7372_v50 = vor.u32 %v8306_v8, %v7369_v49  ;;  %5221 = vmatpush.bf16.msrb.mxu2 %v7116_v47  ;;  %8432 = vmatpush.bf16.msra.mxu1 %v12459_v43  ;;  %v4863_v5 = vadd.f32 %v4862_v31, %v4844_v14  ;;  %v4827_v43 = vadd.f32 %v4826_v12, %v1484_v7  ;;  %v4864_v63 = vpop.f32.mrf.mxu3  ;;  %v4831_v9 = vpop.f32.mrf.mxu1 }
 0x40e   : > { %v4888_v38 = vpop.f32.mrf.mxu0  ;;  %v4832_v36 = vadd.f32 %v4831_v9, %v1484_v7 }
 0x40f   : > { %5240 = vmatpush.bf16.msrb.mxu3 %v7372_v50  ;;  %v4882_v11 = vadd.f32 %v4881_v24, %v4863_v5  ;;  %v4846_v16 = vadd.f32 %v4845_v15, %v4827_v43 }
 0x410   : > { %5222 = vmatmul.bf16.vlgmr.msrb.gmra.mxu2 %v9678_v58 }
 0x411   : > { %8433 = vmatpush.bf16.msra.mxu1 %v12496_v32  ;;  %v4865_v32 = vadd.f32 %v4864_v63, %v4846_v16 }
 0x412   : > { %5241 = vmatmul.bf16.vlgmr.msrb.gmra.mxu3 %v9683_v0 }
 0x413   : > { %v4884_v51 = vadd.f32 %v4883_v29, %v4865_v32  ;;  %v4848_v20 = vpop.f32.mrf.mxu2 }
 0x415   : > { %8434 = vmatpush.bf16.msra.mxu1 %v12524_v34  ;;  %v4830_v34 = vadd.f32 %v4829_v40, %v1484_v7  ;;  %v4867_v13 = vpop.f32.mrf.mxu3  ;;  %v4900_v42 = vpop.f32.mrf.mxu1 }
 0x416   : > { %v4901_v26 = vadd.f32 %v4900_v42, %v4882_v11 }
 0x417   : > { %v4849_v60 = vadd.f32 %v4848_v20, %v4830_v34 }
 0x418   : > { %5208 = vmatmul.bf16.gmra.mxu1 %v9752_v53 }
 0x419   : > { %8435 = vmatpush.bf16.msra.mxu1 %v12562_v17  ;;  %v4868_v2 = vadd.f32 %v4867_v13, %v4849_v60  ;;  %v4957_v17 = vpop.f32.mrf.mxu0 }
 0x41b   : > { %v4887_v24 = vadd.f32 %v4886_v45, %v4868_v2  ;;  %v4850_v30 = vpop.f32.mrf.mxu2 }
 0x41c   : > { %v4851_v35 = vadd.f32 %v4850_v30, %v4832_v36 }
 0x41d   : > { %8436 = vmatpush.bf16.msra.mxu1 %v12594_v59  ;;  %v4869_v59 = vpop.f32.mrf.mxu3  ;;  %v4902_v4 = vpop.f32.mrf.mxu1 }
 0x41e   : > { %v4870_v18 = vadd.f32 %v4869_v59, %v4851_v35  ;;  %v4903_v33 = vadd.f32 %v4902_v4, %v4884_v51 }
 0x420   : > { %5227 = vmatmul.bf16.gmra.mxu2 %v9794_v22 }
 0x421   : > { %8437 = vmatpush.bf16.msra.mxu1 %v12627_v57  ;;  %v4959_v62 = vpop.f32.mrf.mxu0  ;;  %v4889_v57 = vadd.f32 %v4888_v38, %v4870_v18 }
 0x422   : > { %5246 = vmatmul.bf16.gmra.mxu3 %v9799_v28  ;;  %v1485_v28 = vperm.slane %v12218_v1, 6 }
 0x423   : > { %v4919_v6 = vpop.f32.mrf.mxu2 }
 0x424   : > { %v4920_v55 = vadd.f32 %v4919_v6, %v4901_v26 }
 0x425   : > { %8438 = vmatpush.bf16.msra.mxu1 %v12659_v39  ;;  %v4938_v39 = vpop.f32.mrf.mxu3  ;;  %v4905_v48 = vpop.f32.mrf.mxu1 }
 0x426   : > { %v4939_v8 = vadd.f32 %v4938_v39, %v4920_v55  ;;  %v4906_v46 = vadd.f32 %v4905_v48, %v4887_v24 }
 0x428   : > { %v4958_v23 = vadd.f32 %v4957_v17, %v4939_v8  ;;  %5265 = vmatmul.bf16.vlgmr.msra.gmra.mxu1 %v9755_v56 }
 0x429   : > { %v4962_v47 = vpop.f32.mrf.mxu0 }
 0x42a   : > { %v5276_v49 = vmax.f32 %v4958_v23, 0.0 }
 0x42b   : > { %v4921_v58 = vpop.f32.mrf.mxu2 }
 0x42c   : > { %v5326_v0 = vmul.f32 %v5310_v41, %v5276_v49  ;;  %v4922_v50 = vadd.f32 %v4921_v58, %v4903_v33 }
 0x42d   : > { %v4940_v7 = vpop.f32.mrf.mxu3  ;;  %v4907_v44 = vpop.f32.mrf.mxu1 }
 0x42e   : > { %v4941_v54 = vadd.f32 %v4940_v7, %v4922_v50  ;;  %v12725_v12 = vadd.f32 %v12592_v52, %v5326_v0  ;;  %v4908_v19 = vadd.f32 %v4907_v44, %v4889_v57 }
 0x430   : > { %v4960_v29 = vadd.f32 %v4959_v62, %v4941_v54 }
 0x431   : > { %v4964_v10 = vpop.f32.mrf.mxu0 }
 0x432   : > { %v5284_v21 = vmax.f32 %v4960_v29, 0.0 }
 0x433   : > { %v4924_v3 = vpop.f32.mrf.mxu2 }
 0x434   : > { %v5334_v14 = vmul.f32 %v5310_v41, %v5284_v21  ;;  %v4925_v53 = vadd.f32 %v4924_v3, %v4906_v46 }
 0x435   : > { %v4943_v31 = vpop.f32.mrf.mxu3  ;;  %v4976_v45 = vpop.f32.mrf.mxu1 }
 0x436   : > { %v4944_v5 = vadd.f32 %v4943_v31, %v4925_v53  ;;  %v12730_v40 = vadd.f32 %v12657_v61, %v5334_v14  ;;  %v4977_v34 = vadd.f32 %v4976_v45, %v1485_v28  ;;  %v5311_v53 = vperm.slane %v12720_v27, 6 }
 0x438   : > { %v4963_v52 = vadd.f32 %v4962_v47, %v4944_v5 }
 0x439   : > { %v5033_v11 = vpop.f32.mrf.mxu0 }
 0x43a   : > { %v5292_v43 = vmax.f32 %v4963_v52, 0.0 }
 0x43b   : > { %v4926_v15 = vpop.f32.mrf.mxu2 }
 0x43c   : > { %v5342_v16 = vmul.f32 %v5310_v41, %v5292_v43  ;;  %v4927_v22 = vadd.f32 %v4926_v15, %v4908_v19 }
 0x43d   : > { %v4945_v63 = vpop.f32.mrf.mxu3  ;;  %v4978_v38 = vpop.f32.mrf.mxu1 }
 0x43e   : > { %v4946_v32 = vadd.f32 %v4945_v63, %v4927_v22  ;;  %v12735_v9 = vadd.f32 %v12693_v25, %v5342_v16  ;;  %v4979_v36 = vadd.f32 %v4978_v38, %v1485_v28 }
 0x440   : > { %v4965_v51 = vadd.f32 %v4964_v10, %v4946_v32 }
 0x441   : > { %v5035_v61 = vpop.f32.mrf.mxu0 }
 0x442   : > { %v5300_v20 = vmax.f32 %v4965_v51, 0.0 }
 0x443   : > { %v4995_v60 = vpop.f32.mrf.mxu2 }
 0x444   : > { %v5350_v13 = vmul.f32 %v5310_v41, %v5300_v20  ;;  %v4996_v2 = vadd.f32 %v4995_v60, %v4977_v34 }
 0x445   : > { %v5014_v42 = vpop.f32.mrf.mxu3  ;;  %v4981_v17 = vpop.f32.mrf.mxu1 }
 0x446   : > { %v5015_v56 = vadd.f32 %v5014_v42, %v4996_v2  ;;  %v12738_v26 = vadd.f32 %v12702_v37, %v5350_v13  ;;  %v4982_v62 = vadd.f32 %v4981_v17, %v1485_v28 }
 0x448   : > { %v5034_v1 = vadd.f32 %v5033_v11, %v5015_v56 }
 0x449   : > { %v5038_v24 = vpop.f32.mrf.mxu0 }
 0x44b   : > { %v4997_v30 = vpop.f32.mrf.mxu2 }
 0x44c   : > { %v4998_v25 = vadd.f32 %v4997_v30, %v4979_v36 }
 0x44d   : > { %v5016_v35 = vpop.f32.mrf.mxu3  ;;  %v4983_v18 = vpop.f32.mrf.mxu1 }
 0x44e   : > { %v5017_v59 = vadd.f32 %v5016_v35, %v4998_v25  ;;  %v4984_v41 = vadd.f32 %v4983_v18, %v1485_v28 }
 0x450   : > { %v5036_v33 = vadd.f32 %v5035_v61, %v5017_v59 }
 0x451   : > { %v5040_v4 = vpop.f32.mrf.mxu0 }
 0x453   : > { %v5000_v57 = vpop.f32.mrf.mxu2 }
 0x454   : > { %v5001_v6 = vadd.f32 %v5000_v57, %v4982_v62 }
 0x455   : > { %v5019_v55 = vpop.f32.mrf.mxu3  ;;  %v5052_v8 = vpop.f32.mrf.mxu1 }
 0x456   : > { %v5020_v39 = vadd.f32 %v5019_v55, %v5001_v6  ;;  %v5053_v48 = vadd.f32 %v5052_v8, %v5034_v1 }
 0x458   : > { %v5039_v23 = vadd.f32 %v5038_v24, %v5020_v39 }
 0x459   : > { %v5109_v37 = vpop.f32.mrf.mxu0 }
 0x45b   : > { %v5002_v46 = vpop.f32.mrf.mxu2 }
 0x45c   : > { %v5003_v47 = vadd.f32 %v5002_v46, %v4984_v41 }
 0x45d   : > { %v5021_v49 = vpop.f32.mrf.mxu3  ;;  %v5054_v0 = vpop.f32.mrf.mxu1 }
 0x45e   : > { %v5022_v58 = vadd.f32 %v5021_v49, %v5003_v47  ;;  %v5055_v50 = vadd.f32 %v5054_v0, %v5036_v33 }
 0x460   : > { %v5041_v54 = vadd.f32 %v5040_v4, %v5022_v58 }
 0x461   : > { %v5111_v7 = vpop.f32.mrf.mxu0 }
 0x463   : > { %v5071_v44 = vpop.f32.mrf.mxu2 }
 0x464   : > { %v5072_v29 = vadd.f32 %v5071_v44, %v5053_v48 }
 0x465   : > { %v5090_v19 = vpop.f32.mrf.mxu3  ;;  %v5057_v21 = vpop.f32.mrf.mxu1 }
 0x466   : > { %v5091_v10 = vadd.f32 %v5090_v19, %v5072_v29  ;;  %v5058_v14 = vadd.f32 %v5057_v21, %v5039_v23 }
 0x468   : > { %v5110_v3 = vadd.f32 %v5109_v37, %v5091_v10 }
 0x469   : > { %v5114_v31 = vpop.f32.mrf.mxu0 }
 0x46a   : > { %v5277_v5 = vmax.f32 %v5110_v3, 0.0 }
 0x46b   : > { %v5073_v45 = vpop.f32.mrf.mxu2 }
 0x46c   : > { %v5074_v52 = vadd.f32 %v5073_v45, %v5055_v50  ;;  %v5327_v43 = vmul.f32 %v5311_v53, %v5277_v5 }
 0x46d   : > { %v5092_v11 = vpop.f32.mrf.mxu3  ;;  %v5059_v22 = vpop.f32.mrf.mxu1 }
 0x46e   : > { %v5093_v15 = vadd.f32 %v5092_v11, %v5074_v52  ;;  %v12742_v16 = vadd.f32 %v12725_v12, %v5327_v43  ;;  %v5060_v28 = vadd.f32 %v5059_v22, %v5041_v54 }
 0x470   : > { %v5112_v63 = vadd.f32 %v5111_v7, %v5093_v15  ;;  %v5312_v15 = vperm.slane %v12720_v27, 7 }
 0x471   : > { %v5116_v38 = vpop.f32.mrf.mxu0 }
 0x472   : > { %v5285_v32 = vmax.f32 %v5112_v63, 0.0 }
 0x473   : > { %v5076_v51 = vpop.f32.mrf.mxu2 }
 0x474   : > { %v5335_v61 = vmul.f32 %v5311_v53, %v5285_v32  ;;  %v5077_v34 = vadd.f32 %v5076_v51, %v5058_v14 }
 0x475   : > { %v5095_v20 = vpop.f32.mrf.mxu3  ;;  %v5128_v2 = vpop.f32.mrf.mxu1 }
 0x476   : > { %v5096_v60 = vadd.f32 %v5095_v20, %v5077_v34  ;;  %v12745_v13 = vadd.f32 %v12730_v40, %v5335_v61 }
 0x478   : > { %v5115_v42 = vadd.f32 %v5114_v31, %v5096_v60 }
 0x479   : > { %v5185_v36 = vpop.f32.mrf.mxu0 }
 0x47a   : > { %v5293_v56 = vmax.f32 %v5115_v42, 0.0 }
 0x47b   : > { %v5078_v17 = vpop.f32.mrf.mxu2 }
 0x47c   : > { %v5079_v24 = vadd.f32 %v5078_v17, %v5060_v28  ;;  %v5343_v1 = vmul.f32 %v5311_v53, %v5293_v56 }
 0x47d   : > { %v5097_v12 = vpop.f32.mrf.mxu3  ;;  %v5130_v35 = vpop.f32.mrf.mxu1 }
 0x47e   : > { %v5098_v30 = vadd.f32 %v5097_v12, %v5079_v24  ;;  %v12748_v25 = vadd.f32 %v12735_v9, %v5343_v1  ;;  %v8469_v9 = vld [vmem:[%s12774_s5] sm:$0xff] }
 0x47f   : > { %v1486_v37 = vperm.slane %v8469_v9, 7 }
 0x480   : > { %v5117_v59 = vadd.f32 %v5116_v38, %v5098_v30 }
 0x481   : > { %v5187_v57 = vpop.f32.mrf.mxu0  ;;  %v5129_v46 = vadd.f32 %v5128_v2, %v1486_v37  ;;  %v5131_v7 = vadd.f32 %v5130_v35, %v1486_v37 }
 0x482   : > { %v5301_v18 = vmax.f32 %v5117_v59, 0.0 }
 0x483   : > { %v5147_v4 = vpop.f32.mrf.mxu2 }
 0x484   : > { %v5351_v33 = vmul.f32 %v5311_v53, %v5301_v18  ;;  %v5148_v49 = vadd.f32 %v5147_v4, %v5129_v46 }
 0x485   : > { %v5166_v62 = vpop.f32.mrf.mxu3  ;;  %v5133_v6 = vpop.f32.mrf.mxu1 }
 0x486   : > { %v12751_v40 = vadd.f32 %v12738_v26, %v5351_v33  ;;  %v5167_v26 = vadd.f32 %v5166_v62, %v5148_v49  ;;  %v5134_v31 = vadd.f32 %v5133_v6, %v1486_v37  ;;  %v8448_v49 = vld [vmem:[#allocation2] ss:$0 sm:$0xff] }
 0x488   : > { %v5186_v29 = vadd.f32 %v5185_v36, %v5167_v26 }
 0x489   : > { %v5190_v48 = vpop.f32.mrf.mxu0 }
 0x48b   : > { %v5149_v55 = vpop.f32.mrf.mxu2 }
 0x48c   : > { %v5150_v44 = vadd.f32 %v5149_v55, %v5131_v7 }
 0x48d   : > { %v5168_v39 = vpop.f32.mrf.mxu3  ;;  %v5135_v8 = vpop.f32.mrf.mxu1 }
 0x48e   : > { %v5169_v21 = vadd.f32 %v5168_v39, %v5150_v44  ;;  %v5136_v34 = vadd.f32 %v5135_v8, %v1486_v37 }
 0x490   : > { %v5188_v11 = vadd.f32 %v5187_v57, %v5169_v21 }
 0x491   : > { %v5192_v58 = vpop.f32.mrf.mxu0 }
 0x493   : > { %v5152_v23 = vpop.f32.mrf.mxu2 }
 0x494   : > { %v5153_v52 = vadd.f32 %v5152_v23, %v5134_v31 }
 0x495   : > { %v5171_v41 = vpop.f32.mrf.mxu3  ;;  %v5204_v47 = vpop.f32.mrf.mxu1 }
 0x496   : > { %v5205_v19 = vadd.f32 %v5204_v47, %v5186_v29  ;;  %v5172_v32 = vadd.f32 %v5171_v41, %v5153_v52 }
 0x498   : > { %v5191_v17 = vadd.f32 %v5190_v48, %v5172_v32 }
 0x499   : > { %v5261_v53 = vpop.f32.mrf.mxu0 }
 0x49b   : > { %v5154_v0 = vpop.f32.mrf.mxu2 }
 0x49c   : > { %v5155_v56 = vadd.f32 %v5154_v0, %v5136_v34 }
 0x49d   : > { %v5173_v50 = vpop.f32.mrf.mxu3  ;;  %v5206_v54 = vpop.f32.mrf.mxu1 }
 0x49e   : > { %v5207_v22 = vadd.f32 %v5206_v54, %v5188_v11  ;;  %v5174_v36 = vadd.f32 %v5173_v50, %v5155_v56 }
 0x4a0   : > { %v5193_v62 = vadd.f32 %v5192_v58, %v5174_v36 }
 0x4a1   : > { %v5263_v2 = vpop.f32.mrf.mxu0 }
 0x4a3   : > { %v5223_v10 = vpop.f32.mrf.mxu2 }
 0x4a4   : > { %v5224_v3 = vadd.f32 %v5223_v10, %v5205_v19 }
 0x4a5   : > { %v5242_v14 = vpop.f32.mrf.mxu3  ;;  %v5209_v45 = vpop.f32.mrf.mxu1 }
 0x4a6   : > { %v5243_v5 = vadd.f32 %v5242_v14, %v5224_v3  ;;  %v5210_v12 = vadd.f32 %v5209_v45, %v5191_v17 }
 0x4a8   : > { %v5262_v43 = vadd.f32 %v5261_v53, %v5243_v5 }
 0x4aa   : > { %v5278_v63 = vmax.f32 %v5262_v43, 0.0 }
 0x4ab   : > { %v5225_v28 = vpop.f32.mrf.mxu2 }
 0x4ac   : > { %v5226_v38 = vadd.f32 %v5225_v28, %v5207_v22  ;;  %v5328_v61 = vmul.f32 %v5312_v15, %v5278_v63 }
 0x4ad   : > { %v5244_v51 = vpop.f32.mrf.mxu3  ;;  %v5211_v42 = vpop.f32.mrf.mxu1 }
 0x4ae   : > { %v5245_v20 = vadd.f32 %v5244_v51, %v5226_v38  ;;  %v5359_v60 = vadd.f32 %v12742_v16, %v5328_v61  ;;  %v5212_v16 = vadd.f32 %v5211_v42, %v5193_v62 }
 0x4b0   : > { %v5264_v24 = vadd.f32 %v5263_v2, %v5245_v20  ;;  %5360 = vadd.xlane.f32.xlu0 %v5359_v60 }
 0x4b2   : > { %v5286_v1 = vmax.f32 %v5264_v24, 0.0 }
 0x4b3   : > { %v5228_v27 = vpop.f32.mrf.mxu2 }
 0x4b4   : > { %v5229_v30 = vadd.f32 %v5228_v27, %v5210_v12  ;;  %v5336_v59 = vmul.f32 %v5312_v15, %v5286_v1 }
 0x4b5   : > { %v5247_v35 = vpop.f32.mrf.mxu3  ;;  %v5266_v33 = vpop.f32.mrf.mxu1 }
 0x4b6   : > { %v5248_v18 = vadd.f32 %v5247_v35, %v5229_v30  ;;  %v5368_v4 = vadd.f32 %v12745_v13, %v5336_v59 }
 0x4b8   : > { %v5267_v57 = vadd.f32 %v5266_v33, %v5248_v18  ;;  %5369 = vadd.xlane.f32.xlu0 %v5368_v4 }
 0x4ba   : > { %v5294_v6 = vmax.f32 %v5267_v57, 0.0 }
 0x4bb   : > { %v5230_v55 = vpop.f32.mrf.mxu2 }
 0x4bc   : > { %v5231_v39 = vadd.f32 %v5230_v55, %v5212_v16  ;;  %v5344_v8 = vmul.f32 %v5312_v15, %v5294_v6 }
 0x4bd   : > { %v5249_v48 = vpop.f32.mrf.mxu3  ;;  %v5268_v23 = vpop.f32.mrf.mxu1 }
 0x4be   : > { %v5250_v9 = vadd.f32 %v5249_v48, %v5231_v39  ;;  %v5377_v37 = vadd.f32 %v12748_v25, %v5344_v8 }
 0x4c0   : > { %v5269_v41 = vadd.f32 %v5268_v23, %v5250_v9  ;;  %5378 = vadd.xlane.f32.xlu1 %v5377_v37 }
 0x4c2   : > { %v5302_v46 = vmax.f32 %v5269_v41, 0.0 }
 0x4c4   : > { %v5352_v47 = vmul.f32 %v5312_v15, %v5302_v46 }
 0x4c6   : > { %v5386_v13 = vadd.f32 %v12751_v40, %v5352_v47 }
 0x4c8   : > { %5387 = vadd.xlane.f32.xlu1 %v5386_v13 }
 0x523   : > { %v5361_v58 = vpop.xlane.xlu0 %5360 }
 0x524   : > { %v5393_v0 = vadd.f32 %v8448_v49, %v5361_v58 }
 0x526   : > { %v5397_v26 = vmin.f32 %v5393_v0, 20.0  ;;  %vm5401_vm1 = vcmp.gt.f32.partialorder %v5393_v0, 20.0 }
 0x528   : > { %v5405_v50 = vmul.f32 1.442695, %v5397_v26 }
 0x52a   : > { %8449 = vpow2.f32 %v5405_v50 }
 0x52b   : > { %v5370_v7 = vpop.xlane.xlu0 %5369 }
 0x52c   : > { %v5394_v54 = vadd.f32 %v8448_v49, %v5370_v7 }
 0x52e   : > { %v5398_v44 = vmin.f32 %v5394_v54, 20.0  ;;  %vm5402_vm3 = vcmp.gt.f32.partialorder %v5394_v54, 20.0 }
 0x530   : > { %v8450_v29 = vpop.eup %8449  ;;  %v5407_v19 = vmul.f32 1.442695, %v5398_v44 }
 0x531   : > { %v5413_v25 = vadd.f32 1.0, %v8450_v29  ;;  %v5416_v10 = vmul.f32 -0.5, %v8450_v29  ;;  %v5419_v53 = vand.u32 2147483647, %v8450_v29 }
 0x532   : > { %8451 = vpow2.f32 %v5407_v19 }
 0x533   : > { %v5379_v21 = vpop.xlane.xlu1 %5378  ;;  %8453 = vlog2.f32 %v5413_v25  ;;  %v5417_v40 = vadd.f32 1.0, %v5416_v10  ;;  %vm5420_vm0 = vcmp.lt.f32.partialorder %v5419_v53, 0.0004427343 }
 0x534   : > { %v5395_v3 = vadd.f32 %v8448_v49, %v5379_v21 }
 0x535   : > { %v5418_v43 = vmul.f32 %v8450_v29, %v5417_v40 }
 0x536   : > { %v5399_v14 = vmin.f32 %v5395_v3, 20.0  ;;  %vm5403_vm5 = vcmp.gt.f32.partialorder %v5395_v3, 20.0 }
 0x538   : > { %v8452_v31 = vpop.eup %8451  ;;  %v5409_v5 = vmul.f32 1.442695, %v5399_v14 }
 0x539   : > { %v8454_v45 = vpop.eup %8453  ;;  %v5422_v52 = vadd.f32 1.0, %v8452_v31  ;;  %v5425_v15 = vmul.f32 -0.5, %v8452_v31  ;;  %v5428_v61 = vand.u32 2147483647, %v8452_v31 }
 0x53a   : > { %8455 = vpow2.f32 %v5409_v5  ;;  %v5415_v11 = vmul.f32 0.6931472, %v8454_v45 }
 0x53b   : > { %v5388_v22 = vpop.xlane.xlu1 %5387  ;;  %8457 = vlog2.f32 %v5422_v52  ;;  %v5426_v51 = vadd.f32 1.0, %v5425_v15  ;;  %vm5429_vm2 = vcmp.lt.f32.partialorder %v5428_v61, 0.0004427343 }
 0x53c   : > { %v5396_v63 = vadd.f32 %v8448_v49, %v5388_v22  ;;  %v5421_v28 = vsel %vm5420_vm0, %v5418_v43, %v5415_v11 }
 0x53d   : > { %v5449_v32 = vsel %vm5401_vm1, %v5393_v0, %v5421_v28  ;;  %v5427_v56 = vmul.f32 %v8452_v31, %v5426_v51 }
 0x53e   : > { %v5400_v38 = vmin.f32 %v5396_v63, 20.0  ;;  %5453 = vxpose.xlu2.b32.start [1/4] (short) (narrow) %v5449_v32, 8  ;;  %vm5404_vm7 = vcmp.gt.f32.partialorder %v5396_v63, 20.0 }
 0x540   : > { %v8456_v34 = vpop.eup %8455  ;;  %v5411_v20 = vmul.f32 1.442695, %v5400_v38 }
 0x541   : > { %v8458_v60 = vpop.eup %8457  ;;  %v5431_v2 = vadd.f32 1.0, %v8456_v34  ;;  %v5434_v17 = vmul.f32 -0.5, %v8456_v34  ;;  %v5437_v27 = vand.u32 2147483647, %v8456_v34 }
 0x542   : > { %8459 = vpow2.f32 %v5411_v20  ;;  %v5424_v42 = vmul.f32 0.6931472, %v8458_v60 }
 0x543   : > { %8461 = vlog2.f32 %v5431_v2  ;;  %v5435_v1 = vadd.f32 1.0, %v5434_v17  ;;  %vm5438_vm4 = vcmp.lt.f32.partialorder %v5437_v27, 0.0004427343 }
 0x544   : > { %v5430_v24 = vsel %vm5429_vm2, %v5427_v56, %v5424_v42 }
 0x545   : > { %v5450_v12 = vsel %vm5402_vm3, %v5394_v54, %v5430_v24  ;;  %v5436_v18 = vmul.f32 %v8456_v34, %v5435_v1 }
 0x546   : > { %5454 = vxpose.xlu2.b32.cont [2/4] (short) (narrow) %v5450_v12, 8 }
 0x548   : > { %v8460_v36 = vpop.eup %8459 }
 0x549   : > { %v8462_v30 = vpop.eup %8461  ;;  %v5440_v35 = vadd.f32 1.0, %v8460_v36  ;;  %v5443_v4 = vmul.f32 -0.5, %v8460_v36  ;;  %v5446_v16 = vand.u32 2147483647, %v8460_v36 }
 0x54a   : > { %v5433_v59 = vmul.f32 0.6931472, %v8462_v30 }
 0x54b   : > { %8463 = vlog2.f32 %v5440_v35  ;;  %v5444_v57 = vadd.f32 1.0, %v5443_v4  ;;  %vm5447_vm6 = vcmp.lt.f32.partialorder %v5446_v16, 0.0004427343 }
 0x54c   : > { %v5439_v33 = vsel %vm5438_vm4, %v5436_v18, %v5433_v59 }
 0x54d   : > { %v5451_v62 = vsel %vm5403_vm5, %v5395_v3, %v5439_v33  ;;  %v5445_v39 = vmul.f32 %v8460_v36, %v5444_v57 }
 0x54e   : > { %5455 = vxpose.xlu2.b32.cont [3/4] (short) (narrow) %v5451_v62, 8 }
 0x551   : > { %v8464_v6 = vpop.eup %8463 }
 0x552   : > { %v5442_v55 = vmul.f32 0.6931472, %v8464_v6 }
 0x554   : > { %v5448_v8 = vsel %vm5447_vm6, %v5445_v39, %v5442_v55 }
 0x555   : > { %v5452_v48 = vsel %vm5404_vm7, %v5396_v63, %v5448_v8 }
 0x556   : > { %5456 = vxpose.xlu2.b32.end [4/4] (short) (narrow) %v5452_v48, 8 }
 0x5d7   : > { %v5469_v9 = vpop.trf.xlu2 }
 0x5d8   : > { %v5485_v37 = vperm.slane %v5469_v9, 0 }
 0x5da   : > { %5487 = vst.msk [vmem:[%s307_s19] sm:$0xff] %vm5486_vm8, %v5485_v37 }
 0x5db PF: > { %s20_s29 = sadd.s32 1, %s8476_s29  }
 0x5dc   : > { %p17_p5 = scmp.ge.s32.totalorder %s20_s29, 4  }
 0x5de   :  { %19 = sbr.rel (!%p17_p5) target bundleno = 3 (0x3), region = 82 }

</bundles_post_ra>
